<compile_context>
chip_gen: v7x
topology: tpu7x:2x2x1
jax: 0.10.0
libtpu: 0.0.40
codegen_flags: <defaults>
</compile_context>

<pallas_src>
import functools

import jax
import jax.numpy as jnp
import numpy as np
from jax.experimental import pallas as pl
from jax.experimental.pallas import tpu as pltpu


# ------------------------------------------------------------------ fused kernel
def fused_lstm_kernel(x_ref, wih1_ref, whh1_ref, b1_ref,
                      wih2_ref, whh2_ref, b2_ref, wfc_ref,
                      o_ref, h1_slab, *, T, B, H1, H2):
    # Gate index convention (matches PyTorch / reference): 0=i, 1=f, 2=g, 3=o.
    x_flat = x_ref[...]                                    # (T*B, D), row = t*B + b

    # ---- Phase 1a: batched layer-1 input projection, per gate (off the chain).
    x1 = [jnp.dot(x_flat, wih1_ref[k], preferred_element_type=jnp.float32)
          + b1_ref[k] for k in range(4)]                   # 4 x (T*B, H1)
    whh1 = [whh1_ref[k] for k in range(4)]                 # 4 x (H1, H1)

    # ---- Phase 1b: layer-1 recurrence; only h1 @ W_hh per gate on the chain.
    h1 = jnp.zeros((B, H1), jnp.float32)
    c1 = jnp.zeros((B, H1), jnp.float32)
    for t in range(T):                                     # static unroll (T small)
        r0, r1 = t * B, (t + 1) * B
        i = jax.nn.sigmoid(x1[0][r0:r1] + jnp.dot(h1, whh1[0], preferred_element_type=jnp.float32))
        f = jax.nn.sigmoid(x1[1][r0:r1] + jnp.dot(h1, whh1[1], preferred_element_type=jnp.float32))
        g = jnp.tanh(      x1[2][r0:r1] + jnp.dot(h1, whh1[2], preferred_element_type=jnp.float32))
        o = jax.nn.sigmoid(x1[3][r0:r1] + jnp.dot(h1, whh1[3], preferred_element_type=jnp.float32))
        c1 = f * c1 + i * g
        h1 = o * jnp.tanh(c1)
        h1_slab[pl.ds(t * B, B), :] = h1                   # stash for phase 2

    # ---- Phase 2a: batched layer-2 input projection on the whole h1 slab.
    h1_all = h1_slab[...]                                  # (T*B, H1)
    x2 = [jnp.dot(h1_all, wih2_ref[k], preferred_element_type=jnp.float32)
          + b2_ref[k] for k in range(4)]                   # 4 x (T*B, H2)
    whh2 = [whh2_ref[k] for k in range(4)]                 # 4 x (H2, H2)
    wfc = wfc_ref[...]                                     # (H2, out)

    # ---- Phase 2b: layer-2 recurrence + per-step FC (FC is off the chain).
    h2 = jnp.zeros((B, H2), jnp.float32)
    c2 = jnp.zeros((B, H2), jnp.float32)
    ys = []
    for t in range(T):
        r0, r1 = t * B, (t + 1) * B
        i = jax.nn.sigmoid(x2[0][r0:r1] + jnp.dot(h2, whh2[0], preferred_element_type=jnp.float32))
        f = jax.nn.sigmoid(x2[1][r0:r1] + jnp.dot(h2, whh2[1], preferred_element_type=jnp.float32))
        g = jnp.tanh(      x2[2][r0:r1] + jnp.dot(h2, whh2[2], preferred_element_type=jnp.float32))
        o = jax.nn.sigmoid(x2[3][r0:r1] + jnp.dot(h2, whh2[3], preferred_element_type=jnp.float32))
        c2 = f * c2 + i * g
        h2 = o * jnp.tanh(c2)
        ys.append(jnp.dot(h2, wfc, preferred_element_type=jnp.float32))  # (B, out)

    # ---- One lane-axis concat + one batch-first store: (B, T*out_dim).
    o_ref[...] = jnp.concatenate(ys, axis=1).astype(o_ref.dtype)


# ------------------------------------------------------------------ weight prep
def _per_gate(w, H):
    """Split columns [i|f|g|o] of (K, 4H) into a stacked (4, K, H) array so each
    gate's weights/bias form an H-wide block starting at lane 0."""
    return jnp.stack([w[:, k * H:(k + 1) * H] for k in range(4)], axis=0)


# ------------------------------------------------------------------ model forward
def lstm_model_forward(x, params, h1=32, h2=16):
    """x: (B, T, input_size) batch_first, like the PyTorch module.
    Returns (B, T, output_size)."""
    B, T, D = x.shape
    out_dim = params["w_fc"].shape[1]

    # time-major flatten: row = t*B + b (tiny 1 KiB transform, single XLA op)
    x_tmf = jnp.transpose(x, (1, 0, 2)).reshape(T * B, D)

    wih1 = _per_gate(params["w_ih1"], h1)   # (4, D,  H1)
    whh1 = _per_gate(params["w_hh1"], h1)   # (4, H1, H1)
    b1 = _per_gate(params["b1"], h1)        # (4, 1,  H1)
    wih2 = _per_gate(params["w_ih2"], h2)   # (4, H1, H2)
    whh2 = _per_gate(params["w_hh2"], h2)   # (4, H2, H2)
    b2 = _per_gate(params["b2"], h2)        # (4, 1,  H2)
    w_fc = params["w_fc"]                   # (H2, out)

    kernel = functools.partial(fused_lstm_kernel, T=T, B=B, H1=h1, H2=h2)

    out = pl.pallas_call(
        kernel,
        out_shape=jax.ShapeDtypeStruct((B, T * out_dim), jnp.float32),
        grid_spec=pltpu.PrefetchScalarGridSpec(
            num_scalar_prefetch=0,
            grid=(1,),
            in_specs=[
                pl.BlockSpec(x_tmf.shape, lambda i: (0, 0)),       # x, fully resident
                pl.BlockSpec(wih1.shape, lambda i: (0, 0, 0)),     # W_ih1 per gate
                pl.BlockSpec(whh1.shape, lambda i: (0, 0, 0)),     # W_hh1 per gate
                pl.BlockSpec(b1.shape, lambda i: (0, 0, 0)),       # b1   per gate
                pl.BlockSpec(wih2.shape, lambda i: (0, 0, 0)),     # W_ih2 per gate
                pl.BlockSpec(whh2.shape, lambda i: (0, 0, 0)),     # W_hh2 per gate
                pl.BlockSpec(b2.shape, lambda i: (0, 0, 0)),       # b2   per gate
                pl.BlockSpec(w_fc.shape, lambda i: (0, 0)),        # FC weight
            ],
            out_specs=pl.BlockSpec((B, T * out_dim), lambda i: (0, 0)),
            scratch_shapes=[pltpu.VMEM((T * B, h1), jnp.float32)],  # h1 slab
        ),
        compiler_params=pltpu.CompilerParams(
            dimension_semantics=("arbitrary",)),        # single sequential step
    )(x_tmf, wih1, whh1, b1, wih2, whh2, b2, w_fc)

    # Already batch-first; only a free reshape (no transpose, no extra HBM trip).
    return out.reshape(B, T, out_dim)


# ------------------------------------------------------------------ pure-JAX reference
def lstm_layer_ref(x_bf, w_ih, w_hh, b):
    B = x_bf.shape[0]
    H = w_hh.shape[0]

    def step(carry, x_t):
        h, c = carry
        gates = x_t @ w_ih + h @ w_hh + b
        i = jax.nn.sigmoid(gates[:, 0 * H:1 * H])
        f = jax.nn.sigmoid(gates[:, 1 * H:2 * H])
        g = jnp.tanh(gates[:, 2 * H:3 * H])
        o = jax.nn.sigmoid(gates[:, 3 * H:4 * H])
        c = f * c + i * g
        h = o * jnp.tanh(c)
        return (h, c), h

    init = (jnp.zeros((B, H), jnp.float32), jnp.zeros((B, H), jnp.float32))
    _, ys = jax.lax.scan(step, init, jnp.transpose(x_bf, (1, 0, 2)))
    return jnp.transpose(ys, (1, 0, 2))


def model_ref(x, params):
    y1 = lstm_layer_ref(x, params["w_ih1"], params["w_hh1"], params["b1"])
    y2 = lstm_layer_ref(y1, params["w_ih2"], params["w_hh2"], params["b2"])
    return y2 @ params["w_fc"]


# ------------------------------------------------------------------ params
def init_params(key, input_size, output_size, h1=32, h2=16):
    # PyTorch-style uniform(-1/sqrt(H), 1/sqrt(H)) init; gate order [i|f|g|o].
    ks = jax.random.split(key, 9)

    def u(k, shape, bound):
        return jax.random.uniform(k, shape, jnp.float32, -bound, bound)

    k1 = 1.0 / np.sqrt(h1)
    k2 = 1.0 / np.sqrt(h2)
    return {
        "w_ih1": u(ks[0], (input_size, 4 * h1), k1),
        "w_hh1": u(ks[1], (h1, 4 * h1), k1),
        "b1": u(ks[2], (1, 4 * h1), k1) + u(ks[3], (1, 4 * h1), k1),
        "w_ih2": u(ks[4], (h1, 4 * h2), k2),
        "w_hh2": u(ks[5], (h2, 4 * h2), k2),
        "b2": u(ks[6], (1, 4 * h2), k2) + u(ks[7], (1, 4 * h2), k2),
        "w_fc": u(ks[8], (h2, output_size), 1.0 / np.sqrt(h2)),
    }


# ------------------------------------------------------------------ main
if __name__ == "__main__":
    B, T, input_size, output_size = 2, 8, 4, 4

    key = jax.random.PRNGKey(0)
    kx, kp = jax.random.split(key)
    x = jax.random.normal(kx, (B, T, input_size), jnp.float32)
    params = init_params(kp, input_size, output_size)

    out = jax.block_until_ready(lstm_model_forward(x, params))
    ref = jax.block_until_ready(model_ref(x, params))

    assert out.shape == (B, T, output_size), out.shape
    np.testing.assert_allclose(np.asarray(out), np.asarray(ref), rtol=1e-5, atol=1e-5)

    print("KERNEL_OK")
</pallas_src>

<mosaic_0001>
module attributes {stable_mosaic.version = 11 : i64} {
  func.func @fused_lstm_kernel(%arg0: i32, %arg1: memref<16x4xf32, #tpu.memory_space<vmem>>, %arg2: memref<4x4x32xf32, #tpu.memory_space<vmem>>, %arg3: memref<4x32x32xf32, #tpu.memory_space<vmem>>, %arg4: memref<4x1x32xf32, #tpu.memory_space<vmem>>, %arg5: memref<4x32x16xf32, #tpu.memory_space<vmem>>, %arg6: memref<4x16x16xf32, #tpu.memory_space<vmem>>, %arg7: memref<4x1x16xf32, #tpu.memory_space<vmem>>, %arg8: memref<16x4xf32, #tpu.memory_space<vmem>>, %arg9: memref<2x32xf32, #tpu.memory_space<vmem>>, %arg10: memref<16x32xf32, #tpu.memory_space<vmem>>) attributes {dimension_semantics = [#tpu.dimension_semantics<arbitrary>], iteration_bounds = array<i64: 1>, scalar_prefetch = 0 : i64, scratch_operands = 1 : i64, tpu.core_type = #tpu.core_type<tc>, window_params = [{pipeline_mode = #tpu.pipeline_mode<synchronous>, transform_indices = @transform_0, window_bounds = array<i64: 16, 4>}, {pipeline_mode = #tpu.pipeline_mode<synchronous>, transform_indices = @transform_1, window_bounds = array<i64: 4, 4, 32>}, {pipeline_mode = #tpu.pipeline_mode<synchronous>, transform_indices = @transform_2, window_bounds = array<i64: 4, 32, 32>}, {pipeline_mode = #tpu.pipeline_mode<synchronous>, transform_indices = @transform_3, window_bounds = array<i64: 4, 1, 32>}, {pipeline_mode = #tpu.pipeline_mode<synchronous>, transform_indices = @transform_4, window_bounds = array<i64: 4, 32, 16>}, {pipeline_mode = #tpu.pipeline_mode<synchronous>, transform_indices = @transform_5, window_bounds = array<i64: 4, 16, 16>}, {pipeline_mode = #tpu.pipeline_mode<synchronous>, transform_indices = @transform_6, window_bounds = array<i64: 4, 1, 16>}, {pipeline_mode = #tpu.pipeline_mode<synchronous>, transform_indices = @transform_7, window_bounds = array<i64: 16, 4>}, {pipeline_mode = #tpu.pipeline_mode<synchronous>, transform_indices = @transform_8, window_bounds = array<i64: 2, 32>}]} {
    %c0 = arith.constant 0 : index
    %c0_0 = arith.constant 0 : index
    %0 = vector.load %arg1[%c0, %c0_0] : memref<16x4xf32, #tpu.memory_space<vmem>>, vector<16x4xf32>
    %c0_1 = arith.constant 0 : index
    %c0_2 = arith.constant 0 : index
    %c0_3 = arith.constant 0 : index
    %1 = vector.load %arg2[%c0_1, %c0_2, %c0_3] : memref<4x4x32xf32, #tpu.memory_space<vmem>>, vector<1x4x32xf32>
    %2 = vector.shape_cast %1 : vector<1x4x32xf32> to vector<4x32xf32>
    %cst = arith.constant dense<0.000000e+00> : vector<16x32xf32>
    %3 = tpu.matmul %0, %2, %cst {dimension_numbers = #tpu.dot_dimension_numbers<[1], [0], [0], [1], [0, 0, 1, 1], [], []>} : vector<16x4xf32>, vector<4x32xf32>, vector<16x32xf32> -> vector<16x32xf32>
    %c0_4 = arith.constant 0 : index
    %c0_5 = arith.constant 0 : index
    %c0_6 = arith.constant 0 : index
    %4 = vector.load %arg4[%c0_4, %c0_5, %c0_6] : memref<4x1x32xf32, #tpu.memory_space<vmem>>, vector<1x1x32xf32>
    %5 = vector.shape_cast %4 : vector<1x1x32xf32> to vector<1x32xf32>
    %6 = vector.broadcast %5 : vector<1x32xf32> to vector<16x32xf32>
    %7 = arith.addf %3, %6 : vector<16x32xf32>
    %c1 = arith.constant 1 : index
    %c0_7 = arith.constant 0 : index
    %c0_8 = arith.constant 0 : index
    %8 = vector.load %arg2[%c1, %c0_7, %c0_8] : memref<4x4x32xf32, #tpu.memory_space<vmem>>, vector<1x4x32xf32>
    %9 = vector.shape_cast %8 : vector<1x4x32xf32> to vector<4x32xf32>
    %cst_9 = arith.constant dense<0.000000e+00> : vector<16x32xf32>
    %10 = tpu.matmul %0, %9, %cst_9 {dimension_numbers = #tpu.dot_dimension_numbers<[1], [0], [0], [1], [0, 0, 1, 1], [], []>} : vector<16x4xf32>, vector<4x32xf32>, vector<16x32xf32> -> vector<16x32xf32>
    %c1_10 = arith.constant 1 : index
    %c0_11 = arith.constant 0 : index
    %c0_12 = arith.constant 0 : index
    %11 = vector.load %arg4[%c1_10, %c0_11, %c0_12] : memref<4x1x32xf32, #tpu.memory_space<vmem>>, vector<1x1x32xf32>
    %12 = vector.shape_cast %11 : vector<1x1x32xf32> to vector<1x32xf32>
    %13 = vector.broadcast %12 : vector<1x32xf32> to vector<16x32xf32>
    %14 = arith.addf %10, %13 : vector<16x32xf32>
    %c2 = arith.constant 2 : index
    %c0_13 = arith.constant 0 : index
    %c0_14 = arith.constant 0 : index
    %15 = vector.load %arg2[%c2, %c0_13, %c0_14] : memref<4x4x32xf32, #tpu.memory_space<vmem>>, vector<1x4x32xf32>
    %16 = vector.shape_cast %15 : vector<1x4x32xf32> to vector<4x32xf32>
    %cst_15 = arith.constant dense<0.000000e+00> : vector<16x32xf32>
    %17 = tpu.matmul %0, %16, %cst_15 {dimension_numbers = #tpu.dot_dimension_numbers<[1], [0], [0], [1], [0, 0, 1, 1], [], []>} : vector<16x4xf32>, vector<4x32xf32>, vector<16x32xf32> -> vector<16x32xf32>
    %c2_16 = arith.constant 2 : index
    %c0_17 = arith.constant 0 : index
    %c0_18 = arith.constant 0 : index
    %18 = vector.load %arg4[%c2_16, %c0_17, %c0_18] : memref<4x1x32xf32, #tpu.memory_space<vmem>>, vector<1x1x32xf32>
    %19 = vector.shape_cast %18 : vector<1x1x32xf32> to vector<1x32xf32>
    %20 = vector.broadcast %19 : vector<1x32xf32> to vector<16x32xf32>
    %21 = arith.addf %17, %20 : vector<16x32xf32>
    %c3 = arith.constant 3 : index
    %c0_19 = arith.constant 0 : index
    %c0_20 = arith.constant 0 : index
    %22 = vector.load %arg2[%c3, %c0_19, %c0_20] : memref<4x4x32xf32, #tpu.memory_space<vmem>>, vector<1x4x32xf32>
    %23 = vector.shape_cast %22 : vector<1x4x32xf32> to vector<4x32xf32>
    %cst_21 = arith.constant dense<0.000000e+00> : vector<16x32xf32>
    %24 = tpu.matmul %0, %23, %cst_21 {dimension_numbers = #tpu.dot_dimension_numbers<[1], [0], [0], [1], [0, 0, 1, 1], [], []>} : vector<16x4xf32>, vector<4x32xf32>, vector<16x32xf32> -> vector<16x32xf32>
    %c3_22 = arith.constant 3 : index
    %c0_23 = arith.constant 0 : index
    %c0_24 = arith.constant 0 : index
    %25 = vector.load %arg4[%c3_22, %c0_23, %c0_24] : memref<4x1x32xf32, #tpu.memory_space<vmem>>, vector<1x1x32xf32>
    %26 = vector.shape_cast %25 : vector<1x1x32xf32> to vector<1x32xf32>
    %27 = vector.broadcast %26 : vector<1x32xf32> to vector<16x32xf32>
    %28 = arith.addf %24, %27 : vector<16x32xf32>
    %c0_25 = arith.constant 0 : index
    %c0_26 = arith.constant 0 : index
    %c0_27 = arith.constant 0 : index
    %29 = vector.load %arg3[%c0_25, %c0_26, %c0_27] : memref<4x32x32xf32, #tpu.memory_space<vmem>>, vector<1x32x32xf32>
    %30 = vector.shape_cast %29 : vector<1x32x32xf32> to vector<32x32xf32>
    %c1_28 = arith.constant 1 : index
    %c0_29 = arith.constant 0 : index
    %c0_30 = arith.constant 0 : index
    %31 = vector.load %arg3[%c1_28, %c0_29, %c0_30] : memref<4x32x32xf32, #tpu.memory_space<vmem>>, vector<1x32x32xf32>
    %32 = vector.shape_cast %31 : vector<1x32x32xf32> to vector<32x32xf32>
    %c2_31 = arith.constant 2 : index
    %c0_32 = arith.constant 0 : index
    %c0_33 = arith.constant 0 : index
    %33 = vector.load %arg3[%c2_31, %c0_32, %c0_33] : memref<4x32x32xf32, #tpu.memory_space<vmem>>, vector<1x32x32xf32>
    %34 = vector.shape_cast %33 : vector<1x32x32xf32> to vector<32x32xf32>
    %c3_34 = arith.constant 3 : index
    %c0_35 = arith.constant 0 : index
    %c0_36 = arith.constant 0 : index
    %35 = vector.load %arg3[%c3_34, %c0_35, %c0_36] : memref<4x32x32xf32, #tpu.memory_space<vmem>>, vector<1x32x32xf32>
    %36 = vector.shape_cast %35 : vector<1x32x32xf32> to vector<32x32xf32>
    %cst_37 = arith.constant 0.000000e+00 : f32
    %37 = vector.broadcast %cst_37 : f32 to vector<2x32xf32>
    %cst_38 = arith.constant 0.000000e+00 : f32
    %38 = vector.broadcast %cst_38 : f32 to vector<2x32xf32>
    %39 = vector.extract_strided_slice %7 {offsets = [0, 0], sizes = [2, 32], strides = [1, 1]} : vector<16x32xf32> to vector<2x32xf32>
    %cst_39 = arith.constant dense<0.000000e+00> : vector<2x32xf32>
    %40 = tpu.matmul %37, %30, %cst_39 {dimension_numbers = #tpu.dot_dimension_numbers<[1], [0], [0], [1], [0, 0, 1, 1], [], []>} : vector<2x32xf32>, vector<32x32xf32>, vector<2x32xf32> -> vector<2x32xf32>
    %41 = arith.addf %39, %40 : vector<2x32xf32>
    %42 = arith.negf %41 : vector<2x32xf32>
    %43 = math.exp %42 : vector<2x32xf32>
    %cst_40 = arith.constant 1.000000e+00 : f32
    %44 = vector.broadcast %cst_40 : f32 to vector<2x32xf32>
    %45 = arith.addf %44, %43 : vector<2x32xf32>
    %46 = arith.divf %44, %45 : vector<2x32xf32>
    %47 = vector.extract_strided_slice %14 {offsets = [0, 0], sizes = [2, 32], strides = [1, 1]} : vector<16x32xf32> to vector<2x32xf32>
    %cst_41 = arith.constant dense<0.000000e+00> : vector<2x32xf32>
    %48 = tpu.matmul %37, %32, %cst_41 {dimension_numbers = #tpu.dot_dimension_numbers<[1], [0], [0], [1], [0, 0, 1, 1], [], []>} : vector<2x32xf32>, vector<32x32xf32>, vector<2x32xf32> -> vector<2x32xf32>
    %49 = arith.addf %47, %48 : vector<2x32xf32>
    %50 = arith.negf %49 : vector<2x32xf32>
    %51 = math.exp %50 : vector<2x32xf32>
    %cst_42 = arith.constant 1.000000e+00 : f32
    %52 = vector.broadcast %cst_42 : f32 to vector<2x32xf32>
    %53 = arith.addf %52, %51 : vector<2x32xf32>
    %54 = arith.divf %52, %53 : vector<2x32xf32>
    %55 = vector.extract_strided_slice %21 {offsets = [0, 0], sizes = [2, 32], strides = [1, 1]} : vector<16x32xf32> to vector<2x32xf32>
    %cst_43 = arith.constant dense<0.000000e+00> : vector<2x32xf32>
    %56 = tpu.matmul %37, %34, %cst_43 {dimension_numbers = #tpu.dot_dimension_numbers<[1], [0], [0], [1], [0, 0, 1, 1], [], []>} : vector<2x32xf32>, vector<32x32xf32>, vector<2x32xf32> -> vector<2x32xf32>
    %57 = arith.addf %55, %56 : vector<2x32xf32>
    %58 = math.tanh %57 : vector<2x32xf32>
    %59 = vector.extract_strided_slice %28 {offsets = [0, 0], sizes = [2, 32], strides = [1, 1]} : vector<16x32xf32> to vector<2x32xf32>
    %cst_44 = arith.constant dense<0.000000e+00> : vector<2x32xf32>
    %60 = tpu.matmul %37, %36, %cst_44 {dimension_numbers = #tpu.dot_dimension_numbers<[1], [0], [0], [1], [0, 0, 1, 1], [], []>} : vector<2x32xf32>, vector<32x32xf32>, vector<2x32xf32> -> vector<2x32xf32>
    %61 = arith.addf %59, %60 : vector<2x32xf32>
    %62 = arith.negf %61 : vector<2x32xf32>
    %63 = math.exp %62 : vector<2x32xf32>
    %cst_45 = arith.constant 1.000000e+00 : f32
    %64 = vector.broadcast %cst_45 : f32 to vector<2x32xf32>
    %65 = arith.addf %64, %63 : vector<2x32xf32>
    %66 = arith.divf %64, %65 : vector<2x32xf32>
    %67 = arith.mulf %54, %38 : vector<2x32xf32>
    %68 = arith.mulf %46, %58 : vector<2x32xf32>
    %69 = arith.addf %67, %68 : vector<2x32xf32>
    %70 = math.tanh %69 : vector<2x32xf32>
    %71 = arith.mulf %66, %70 : vector<2x32xf32>
    %c0_46 = arith.constant 0 : index
    %c0_47 = arith.constant 0 : index
    %72 = vector.load %arg10[%c0_46, %c0_47] : memref<16x32xf32, #tpu.memory_space<vmem>>, vector<2x32xf32>
    tpu.vector_store %arg10[%c0_46, %c0_47], %71 {strides = array<i32>} : memref<16x32xf32, #tpu.memory_space<vmem>>, vector<2x32xf32>,
    %73 = vector.extract_strided_slice %7 {offsets = [2, 0], sizes = [2, 32], strides = [1, 1]} : vector<16x32xf32> to vector<2x32xf32>
    %cst_48 = arith.constant dense<0.000000e+00> : vector<2x32xf32>
    %74 = tpu.matmul %71, %30, %cst_48 {dimension_numbers = #tpu.dot_dimension_numbers<[1], [0], [0], [1], [0, 0, 1, 1], [], []>} : vector<2x32xf32>, vector<32x32xf32>, vector<2x32xf32> -> vector<2x32xf32>
    %75 = arith.addf %73, %74 : vector<2x32xf32>
    %76 = arith.negf %75 : vector<2x32xf32>
    %77 = math.exp %76 : vector<2x32xf32>
    %cst_49 = arith.constant 1.000000e+00 : f32
    %78 = vector.broadcast %cst_49 : f32 to vector<2x32xf32>
    %79 = arith.addf %78, %77 : vector<2x32xf32>
    %80 = arith.divf %78, %79 : vector<2x32xf32>
    %81 = vector.extract_strided_slice %14 {offsets = [2, 0], sizes = [2, 32], strides = [1, 1]} : vector<16x32xf32> to vector<2x32xf32>
    %cst_50 = arith.constant dense<0.000000e+00> : vector<2x32xf32>
    %82 = tpu.matmul %71, %32, %cst_50 {dimension_numbers = #tpu.dot_dimension_numbers<[1], [0], [0], [1], [0, 0, 1, 1], [], []>} : vector<2x32xf32>, vector<32x32xf32>, vector<2x32xf32> -> vector<2x32xf32>
    %83 = arith.addf %81, %82 : vector<2x32xf32>
    %84 = arith.negf %83 : vector<2x32xf32>
    %85 = math.exp %84 : vector<2x32xf32>
    %cst_51 = arith.constant 1.000000e+00 : f32
    %86 = vector.broadcast %cst_51 : f32 to vector<2x32xf32>
    %87 = arith.addf %86, %85 : vector<2x32xf32>
    %88 = arith.divf %86, %87 : vector<2x32xf32>
    %89 = vector.extract_strided_slice %21 {offsets = [2, 0], sizes = [2, 32], strides = [1, 1]} : vector<16x32xf32> to vector<2x32xf32>
    %cst_52 = arith.constant dense<0.000000e+00> : vector<2x32xf32>
    %90 = tpu.matmul %71, %34, %cst_52 {dimension_numbers = #tpu.dot_dimension_numbers<[1], [0], [0], [1], [0, 0, 1, 1], [], []>} : vector<2x32xf32>, vector<32x32xf32>, vector<2x32xf32> -> vector<2x32xf32>
    %91 = arith.addf %89, %90 : vector<2x32xf32>
    %92 = math.tanh %91 : vector<2x32xf32>
    %93 = vector.extract_strided_slice %28 {offsets = [2, 0], sizes = [2, 32], strides = [1, 1]} : vector<16x32xf32> to vector<2x32xf32>
    %cst_53 = arith.constant dense<0.000000e+00> : vector<2x32xf32>
    %94 = tpu.matmul %71, %36, %cst_53 {dimension_numbers = #tpu.dot_dimension_numbers<[1], [0], [0], [1], [0, 0, 1, 1], [], []>} : vector<2x32xf32>, vector<32x32xf32>, vector<2x32xf32> -> vector<2x32xf32>
    %95 = arith.addf %93, %94 : vector<2x32xf32>
    %96 = arith.negf %95 : vector<2x32xf32>
    %97 = math.exp %96 : vector<2x32xf32>
    %cst_54 = arith.constant 1.000000e+00 : f32
    %98 = vector.broadcast %cst_54 : f32 to vector<2x32xf32>
    %99 = arith.addf %98, %97 : vector<2x32xf32>
    %100 = arith.divf %98, %99 : vector<2x32xf32>
    %101 = arith.mulf %88, %69 : vector<2x32xf32>
    %102 = arith.mulf %80, %92 : vector<2x32xf32>
    %103 = arith.addf %101, %102 : vector<2x32xf32>
    %104 = math.tanh %103 : vector<2x32xf32>
    %105 = arith.mulf %100, %104 : vector<2x32xf32>
    %c2_55 = arith.constant 2 : index
    %c0_56 = arith.constant 0 : index
    %106 = vector.load %arg10[%c2_55, %c0_56] : memref<16x32xf32, #tpu.memory_space<vmem>>, vector<2x32xf32>
    tpu.vector_store %arg10[%c2_55, %c0_56], %105 {strides = array<i32>} : memref<16x32xf32, #tpu.memory_space<vmem>>, vector<2x32xf32>,
    %107 = vector.extract_strided_slice %7 {offsets = [4, 0], sizes = [2, 32], strides = [1, 1]} : vector<16x32xf32> to vector<2x32xf32>
    %cst_57 = arith.constant dense<0.000000e+00> : vector<2x32xf32>
    %108 = tpu.matmul %105, %30, %cst_57 {dimension_numbers = #tpu.dot_dimension_numbers<[1], [0], [0], [1], [0, 0, 1, 1], [], []>} : vector<2x32xf32>, vector<32x32xf32>, vector<2x32xf32> -> vector<2x32xf32>
    %109 = arith.addf %107, %108 : vector<2x32xf32>
    %110 = arith.negf %109 : vector<2x32xf32>
    %111 = math.exp %110 : vector<2x32xf32>
    %cst_58 = arith.constant 1.000000e+00 : f32
    %112 = vector.broadcast %cst_58 : f32 to vector<2x32xf32>
    %113 = arith.addf %112, %111 : vector<2x32xf32>
    %114 = arith.divf %112, %113 : vector<2x32xf32>
    %115 = vector.extract_strided_slice %14 {offsets = [4, 0], sizes = [2, 32], strides = [1, 1]} : vector<16x32xf32> to vector<2x32xf32>
    %cst_59 = arith.constant dense<0.000000e+00> : vector<2x32xf32>
    %116 = tpu.matmul %105, %32, %cst_59 {dimension_numbers = #tpu.dot_dimension_numbers<[1], [0], [0], [1], [0, 0, 1, 1], [], []>} : vector<2x32xf32>, vector<32x32xf32>, vector<2x32xf32> -> vector<2x32xf32>
    %117 = arith.addf %115, %116 : vector<2x32xf32>
    %118 = arith.negf %117 : vector<2x32xf32>
    %119 = math.exp %118 : vector<2x32xf32>
    %cst_60 = arith.constant 1.000000e+00 : f32
    %120 = vector.broadcast %cst_60 : f32 to vector<2x32xf32>
    %121 = arith.addf %120, %119 : vector<2x32xf32>
    %122 = arith.divf %120, %121 : vector<2x32xf32>
    %123 = vector.extract_strided_slice %21 {offsets = [4, 0], sizes = [2, 32], strides = [1, 1]} : vector<16x32xf32> to vector<2x32xf32>
    %cst_61 = arith.constant dense<0.000000e+00> : vector<2x32xf32>
    %124 = tpu.matmul %105, %34, %cst_61 {dimension_numbers = #tpu.dot_dimension_numbers<[1], [0], [0], [1], [0, 0, 1, 1], [], []>} : vector<2x32xf32>, vector<32x32xf32>, vector<2x32xf32> -> vector<2x32xf32>
    %125 = arith.addf %123, %124 : vector<2x32xf32>
    %126 = math.tanh %125 : vector<2x32xf32>
    %127 = vector.extract_strided_slice %28 {offsets = [4, 0], sizes = [2, 32], strides = [1, 1]} : vector<16x32xf32> to vector<2x32xf32>
    %cst_62 = arith.constant dense<0.000000e+00> : vector<2x32xf32>
    %128 = tpu.matmul %105, %36, %cst_62 {dimension_numbers = #tpu.dot_dimension_numbers<[1], [0], [0], [1], [0, 0, 1, 1], [], []>} : vector<2x32xf32>, vector<32x32xf32>, vector<2x32xf32> -> vector<2x32xf32>
    %129 = arith.addf %127, %128 : vector<2x32xf32>
    %130 = arith.negf %129 : vector<2x32xf32>
    %131 = math.exp %130 : vector<2x32xf32>
    %cst_63 = arith.constant 1.000000e+00 : f32
    %132 = vector.broadcast %cst_63 : f32 to vector<2x32xf32>
    %133 = arith.addf %132, %131 : vector<2x32xf32>
    %134 = arith.divf %132, %133 : vector<2x32xf32>
    %135 = arith.mulf %122, %103 : vector<2x32xf32>
    %136 = arith.mulf %114, %126 : vector<2x32xf32>
    %137 = arith.addf %135, %136 : vector<2x32xf32>
    %138 = math.tanh %137 : vector<2x32xf32>
    %139 = arith.mulf %134, %138 : vector<2x32xf32>
    %c4 = arith.constant 4 : index
    %c0_64 = arith.constant 0 : index
    %140 = vector.load %arg10[%c4, %c0_64] : memref<16x32xf32, #tpu.memory_space<vmem>>, vector<2x32xf32>
    tpu.vector_store %arg10[%c4, %c0_64], %139 {strides = array<i32>} : memref<16x32xf32, #tpu.memory_space<vmem>>, vector<2x32xf32>,
    %141 = vector.extract_strided_slice %7 {offsets = [6, 0], sizes = [2, 32], strides = [1, 1]} : vector<16x32xf32> to vector<2x32xf32>
    %cst_65 = arith.constant dense<0.000000e+00> : vector<2x32xf32>
    %142 = tpu.matmul %139, %30, %cst_65 {dimension_numbers = #tpu.dot_dimension_numbers<[1], [0], [0], [1], [0, 0, 1, 1], [], []>} : vector<2x32xf32>, vector<32x32xf32>, vector<2x32xf32> -> vector<2x32xf32>
    %143 = arith.addf %141, %142 : vector<2x32xf32>
    %144 = arith.negf %143 : vector<2x32xf32>
    %145 = math.exp %144 : vector<2x32xf32>
    %cst_66 = arith.constant 1.000000e+00 : f32
    %146 = vector.broadcast %cst_66 : f32 to vector<2x32xf32>
    %147 = arith.addf %146, %145 : vector<2x32xf32>
    %148 = arith.divf %146, %147 : vector<2x32xf32>
    %149 = vector.extract_strided_slice %14 {offsets = [6, 0], sizes = [2, 32], strides = [1, 1]} : vector<16x32xf32> to vector<2x32xf32>
    %cst_67 = arith.constant dense<0.000000e+00> : vector<2x32xf32>
    %150 = tpu.matmul %139, %32, %cst_67 {dimension_numbers = #tpu.dot_dimension_numbers<[1], [0], [0], [1], [0, 0, 1, 1], [], []>} : vector<2x32xf32>, vector<32x32xf32>, vector<2x32xf32> -> vector<2x32xf32>
    %151 = arith.addf %149, %150 : vector<2x32xf32>
    %152 = arith.negf %151 : vector<2x32xf32>
    %153 = math.exp %152 : vector<2x32xf32>
    %cst_68 = arith.constant 1.000000e+00 : f32
    %154 = vector.broadcast %cst_68 : f32 to vector<2x32xf32>
    %155 = arith.addf %154, %153 : vector<2x32xf32>
    %156 = arith.divf %154, %155 : vector<2x32xf32>
    %157 = vector.extract_strided_slice %21 {offsets = [6, 0], sizes = [2, 32], strides = [1, 1]} : vector<16x32xf32> to vector<2x32xf32>
    %cst_69 = arith.constant dense<0.000000e+00> : vector<2x32xf32>
    %158 = tpu.matmul %139, %34, %cst_69 {dimension_numbers = #tpu.dot_dimension_numbers<[1], [0], [0], [1], [0, 0, 1, 1], [], []>} : vector<2x32xf32>, vector<32x32xf32>, vector<2x32xf32> -> vector<2x32xf32>
    %159 = arith.addf %157, %158 : vector<2x32xf32>
    %160 = math.tanh %159 : vector<2x32xf32>
    %161 = vector.extract_strided_slice %28 {offsets = [6, 0], sizes = [2, 32], strides = [1, 1]} : vector<16x32xf32> to vector<2x32xf32>
    %cst_70 = arith.constant dense<0.000000e+00> : vector<2x32xf32>
    %162 = tpu.matmul %139, %36, %cst_70 {dimension_numbers = #tpu.dot_dimension_numbers<[1], [0], [0], [1], [0, 0, 1, 1], [], []>} : vector<2x32xf32>, vector<32x32xf32>, vector<2x32xf32> -> vector<2x32xf32>
    %163 = arith.addf %161, %162 : vector<2x32xf32>
    %164 = arith.negf %163 : vector<2x32xf32>
    %165 = math.exp %164 : vector<2x32xf32>
    %cst_71 = arith.constant 1.000000e+00 : f32
    %166 = vector.broadcast %cst_71 : f32 to vector<2x32xf32>
    %167 = arith.addf %166, %165 : vector<2x32xf32>
    %168 = arith.divf %166, %167 : vector<2x32xf32>
    %169 = arith.mulf %156, %137 : vector<2x32xf32>
    %170 = arith.mulf %148, %160 : vector<2x32xf32>
    %171 = arith.addf %169, %170 : vector<2x32xf32>
    %172 = math.tanh %171 : vector<2x32xf32>
    %173 = arith.mulf %168, %172 : vector<2x32xf32>
    %c6 = arith.constant 6 : index
    %c0_72 = arith.constant 0 : index
    %174 = vector.load %arg10[%c6, %c0_72] : memref<16x32xf32, #tpu.memory_space<vmem>>, vector<2x32xf32>
    tpu.vector_store %arg10[%c6, %c0_72], %173 {strides = array<i32>} : memref<16x32xf32, #tpu.memory_space<vmem>>, vector<2x32xf32>,
    %175 = vector.extract_strided_slice %7 {offsets = [8, 0], sizes = [2, 32], strides = [1, 1]} : vector<16x32xf32> to vector<2x32xf32>
    %cst_73 = arith.constant dense<0.000000e+00> : vector<2x32xf32>
    %176 = tpu.matmul %173, %30, %cst_73 {dimension_numbers = #tpu.dot_dimension_numbers<[1], [0], [0], [1], [0, 0, 1, 1], [], []>} : vector<2x32xf32>, vector<32x32xf32>, vector<2x32xf32> -> vector<2x32xf32>
    %177 = arith.addf %175, %176 : vector<2x32xf32>
    %178 = arith.negf %177 : vector<2x32xf32>
    %179 = math.exp %178 : vector<2x32xf32>
    %cst_74 = arith.constant 1.000000e+00 : f32
    %180 = vector.broadcast %cst_74 : f32 to vector<2x32xf32>
    %181 = arith.addf %180, %179 : vector<2x32xf32>
    %182 = arith.divf %180, %181 : vector<2x32xf32>
    %183 = vector.extract_strided_slice %14 {offsets = [8, 0], sizes = [2, 32], strides = [1, 1]} : vector<16x32xf32> to vector<2x32xf32>
    %cst_75 = arith.constant dense<0.000000e+00> : vector<2x32xf32>
    %184 = tpu.matmul %173, %32, %cst_75 {dimension_numbers = #tpu.dot_dimension_numbers<[1], [0], [0], [1], [0, 0, 1, 1], [], []>} : vector<2x32xf32>, vector<32x32xf32>, vector<2x32xf32> -> vector<2x32xf32>
    %185 = arith.addf %183, %184 : vector<2x32xf32>
    %186 = arith.negf %185 : vector<2x32xf32>
    %187 = math.exp %186 : vector<2x32xf32>
    %cst_76 = arith.constant 1.000000e+00 : f32
    %188 = vector.broadcast %cst_76 : f32 to vector<2x32xf32>
    %189 = arith.addf %188, %187 : vector<2x32xf32>
    %190 = arith.divf %188, %189 : vector<2x32xf32>
    %191 = vector.extract_strided_slice %21 {offsets = [8, 0], sizes = [2, 32], strides = [1, 1]} : vector<16x32xf32> to vector<2x32xf32>
    %cst_77 = arith.constant dense<0.000000e+00> : vector<2x32xf32>
    %192 = tpu.matmul %173, %34, %cst_77 {dimension_numbers = #tpu.dot_dimension_numbers<[1], [0], [0], [1], [0, 0, 1, 1], [], []>} : vector<2x32xf32>, vector<32x32xf32>, vector<2x32xf32> -> vector<2x32xf32>
    %193 = arith.addf %191, %192 : vector<2x32xf32>
    %194 = math.tanh %193 : vector<2x32xf32>
    %195 = vector.extract_strided_slice %28 {offsets = [8, 0], sizes = [2, 32], strides = [1, 1]} : vector<16x32xf32> to vector<2x32xf32>
    %cst_78 = arith.constant dense<0.000000e+00> : vector<2x32xf32>
    %196 = tpu.matmul %173, %36, %cst_78 {dimension_numbers = #tpu.dot_dimension_numbers<[1], [0], [0], [1], [0, 0, 1, 1], [], []>} : vector<2x32xf32>, vector<32x32xf32>, vector<2x32xf32> -> vector<2x32xf32>
    %197 = arith.addf %195, %196 : vector<2x32xf32>
    %198 = arith.negf %197 : vector<2x32xf32>
    %199 = math.exp %198 : vector<2x32xf32>
    %cst_79 = arith.constant 1.000000e+00 : f32
    %200 = vector.broadcast %cst_79 : f32 to vector<2x32xf32>
    %201 = arith.addf %200, %199 : vector<2x32xf32>
    %202 = arith.divf %200, %201 : vector<2x32xf32>
    %203 = arith.mulf %190, %171 : vector<2x32xf32>
    %204 = arith.mulf %182, %194 : vector<2x32xf32>
    %205 = arith.addf %203, %204 : vector<2x32xf32>
    %206 = math.tanh %205 : vector<2x32xf32>
    %207 = arith.mulf %202, %206 : vector<2x32xf32>
    %c8 = arith.constant 8 : index
    %c0_80 = arith.constant 0 : index
    %208 = vector.load %arg10[%c8, %c0_80] : memref<16x32xf32, #tpu.memory_space<vmem>>, vector<2x32xf32>
    tpu.vector_store %arg10[%c8, %c0_80], %207 {strides = array<i32>} : memref<16x32xf32, #tpu.memory_space<vmem>>, vector<2x32xf32>,
    %209 = vector.extract_strided_slice %7 {offsets = [10, 0], sizes = [2, 32], strides = [1, 1]} : vector<16x32xf32> to vector<2x32xf32>
    %cst_81 = arith.constant dense<0.000000e+00> : vector<2x32xf32>
    %210 = tpu.matmul %207, %30, %cst_81 {dimension_numbers = #tpu.dot_dimension_numbers<[1], [0], [0], [1], [0, 0, 1, 1], [], []>} : vector<2x32xf32>, vector<32x32xf32>, vector<2x32xf32> -> vector<2x32xf32>
    %211 = arith.addf %209, %210 : vector<2x32xf32>
    %212 = arith.negf %211 : vector<2x32xf32>
    %213 = math.exp %212 : vector<2x32xf32>
    %cst_82 = arith.constant 1.000000e+00 : f32
    %214 = vector.broadcast %cst_82 : f32 to vector<2x32xf32>
    %215 = arith.addf %214, %213 : vector<2x32xf32>
    %216 = arith.divf %214, %215 : vector<2x32xf32>
    %217 = vector.extract_strided_slice %14 {offsets = [10, 0], sizes = [2, 32], strides = [1, 1]} : vector<16x32xf32> to vector<2x32xf32>
    %cst_83 = arith.constant dense<0.000000e+00> : vector<2x32xf32>
    %218 = tpu.matmul %207, %32, %cst_83 {dimension_numbers = #tpu.dot_dimension_numbers<[1], [0], [0], [1], [0, 0, 1, 1], [], []>} : vector<2x32xf32>, vector<32x32xf32>, vector<2x32xf32> -> vector<2x32xf32>
    %219 = arith.addf %217, %218 : vector<2x32xf32>
    %220 = arith.negf %219 : vector<2x32xf32>
    %221 = math.exp %220 : vector<2x32xf32>
    %cst_84 = arith.constant 1.000000e+00 : f32
    %222 = vector.broadcast %cst_84 : f32 to vector<2x32xf32>
    %223 = arith.addf %222, %221 : vector<2x32xf32>
    %224 = arith.divf %222, %223 : vector<2x32xf32>
    %225 = vector.extract_strided_slice %21 {offsets = [10, 0], sizes = [2, 32], strides = [1, 1]} : vector<16x32xf32> to vector<2x32xf32>
    %cst_85 = arith.constant dense<0.000000e+00> : vector<2x32xf32>
    %226 = tpu.matmul %207, %34, %cst_85 {dimension_numbers = #tpu.dot_dimension_numbers<[1], [0], [0], [1], [0, 0, 1, 1], [], []>} : vector<2x32xf32>, vector<32x32xf32>, vector<2x32xf32> -> vector<2x32xf32>
    %227 = arith.addf %225, %226 : vector<2x32xf32>
    %228 = math.tanh %227 : vector<2x32xf32>
    %229 = vector.extract_strided_slice %28 {offsets = [10, 0], sizes = [2, 32], strides = [1, 1]} : vector<16x32xf32> to vector<2x32xf32>
    %cst_86 = arith.constant dense<0.000000e+00> : vector<2x32xf32>
    %230 = tpu.matmul %207, %36, %cst_86 {dimension_numbers = #tpu.dot_dimension_numbers<[1], [0], [0], [1], [0, 0, 1, 1], [], []>} : vector<2x32xf32>, vector<32x32xf32>, vector<2x32xf32> -> vector<2x32xf32>
    %231 = arith.addf %229, %230 : vector<2x32xf32>
    %232 = arith.negf %231 : vector<2x32xf32>
    %233 = math.exp %232 : vector<2x32xf32>
    %cst_87 = arith.constant 1.000000e+00 : f32
    %234 = vector.broadcast %cst_87 : f32 to vector<2x32xf32>
    %235 = arith.addf %234, %233 : vector<2x32xf32>
    %236 = arith.divf %234, %235 : vector<2x32xf32>
    %237 = arith.mulf %224, %205 : vector<2x32xf32>
    %238 = arith.mulf %216, %228 : vector<2x32xf32>
    %239 = arith.addf %237, %238 : vector<2x32xf32>
    %240 = math.tanh %239 : vector<2x32xf32>
    %241 = arith.mulf %236, %240 : vector<2x32xf32>
    %c10 = arith.constant 10 : index
    %c0_88 = arith.constant 0 : index
    %242 = vector.load %arg10[%c10, %c0_88] : memref<16x32xf32, #tpu.memory_space<vmem>>, vector<2x32xf32>
    tpu.vector_store %arg10[%c10, %c0_88], %241 {strides = array<i32>} : memref<16x32xf32, #tpu.memory_space<vmem>>, vector<2x32xf32>,
    %243 = vector.extract_strided_slice %7 {offsets = [12, 0], sizes = [2, 32], strides = [1, 1]} : vector<16x32xf32> to vector<2x32xf32>
    %cst_89 = arith.constant dense<0.000000e+00> : vector<2x32xf32>
    %244 = tpu.matmul %241, %30, %cst_89 {dimension_numbers = #tpu.dot_dimension_numbers<[1], [0], [0], [1], [0, 0, 1, 1], [], []>} : vector<2x32xf32>, vector<32x32xf32>, vector<2x32xf32> -> vector<2x32xf32>
    %245 = arith.addf %243, %244 : vector<2x32xf32>
    %246 = arith.negf %245 : vector<2x32xf32>
    %247 = math.exp %246 : vector<2x32xf32>
    %cst_90 = arith.constant 1.000000e+00 : f32
    %248 = vector.broadcast %cst_90 : f32 to vector<2x32xf32>
    %249 = arith.addf %248, %247 : vector<2x32xf32>
    %250 = arith.divf %248, %249 : vector<2x32xf32>
    %251 = vector.extract_strided_slice %14 {offsets = [12, 0], sizes = [2, 32], strides = [1, 1]} : vector<16x32xf32> to vector<2x32xf32>
    %cst_91 = arith.constant dense<0.000000e+00> : vector<2x32xf32>
    %252 = tpu.matmul %241, %32, %cst_91 {dimension_numbers = #tpu.dot_dimension_numbers<[1], [0], [0], [1], [0, 0, 1, 1], [], []>} : vector<2x32xf32>, vector<32x32xf32>, vector<2x32xf32> -> vector<2x32xf32>
    %253 = arith.addf %251, %252 : vector<2x32xf32>
    %254 = arith.negf %253 : vector<2x32xf32>
    %255 = math.exp %254 : vector<2x32xf32>
    %cst_92 = arith.constant 1.000000e+00 : f32
    %256 = vector.broadcast %cst_92 : f32 to vector<2x32xf32>
    %257 = arith.addf %256, %255 : vector<2x32xf32>
    %258 = arith.divf %256, %257 : vector<2x32xf32>
    %259 = vector.extract_strided_slice %21 {offsets = [12, 0], sizes = [2, 32], strides = [1, 1]} : vector<16x32xf32> to vector<2x32xf32>
    %cst_93 = arith.constant dense<0.000000e+00> : vector<2x32xf32>
    %260 = tpu.matmul %241, %34, %cst_93 {dimension_numbers = #tpu.dot_dimension_numbers<[1], [0], [0], [1], [0, 0, 1, 1], [], []>} : vector<2x32xf32>, vector<32x32xf32>, vector<2x32xf32> -> vector<2x32xf32>
    %261 = arith.addf %259, %260 : vector<2x32xf32>
    %262 = math.tanh %261 : vector<2x32xf32>
    %263 = vector.extract_strided_slice %28 {offsets = [12, 0], sizes = [2, 32], strides = [1, 1]} : vector<16x32xf32> to vector<2x32xf32>
    %cst_94 = arith.constant dense<0.000000e+00> : vector<2x32xf32>
    %264 = tpu.matmul %241, %36, %cst_94 {dimension_numbers = #tpu.dot_dimension_numbers<[1], [0], [0], [1], [0, 0, 1, 1], [], []>} : vector<2x32xf32>, vector<32x32xf32>, vector<2x32xf32> -> vector<2x32xf32>
    %265 = arith.addf %263, %264 : vector<2x32xf32>
    %266 = arith.negf %265 : vector<2x32xf32>
    %267 = math.exp %266 : vector<2x32xf32>
    %cst_95 = arith.constant 1.000000e+00 : f32
    %268 = vector.broadcast %cst_95 : f32 to vector<2x32xf32>
    %269 = arith.addf %268, %267 : vector<2x32xf32>
    %270 = arith.divf %268, %269 : vector<2x32xf32>
    %271 = arith.mulf %258, %239 : vector<2x32xf32>
    %272 = arith.mulf %250, %262 : vector<2x32xf32>
    %273 = arith.addf %271, %272 : vector<2x32xf32>
    %274 = math.tanh %273 : vector<2x32xf32>
    %275 = arith.mulf %270, %274 : vector<2x32xf32>
    %c12 = arith.constant 12 : index
    %c0_96 = arith.constant 0 : index
    %276 = vector.load %arg10[%c12, %c0_96] : memref<16x32xf32, #tpu.memory_space<vmem>>, vector<2x32xf32>
    tpu.vector_store %arg10[%c12, %c0_96], %275 {strides = array<i32>} : memref<16x32xf32, #tpu.memory_space<vmem>>, vector<2x32xf32>,
    %277 = vector.extract_strided_slice %7 {offsets = [14, 0], sizes = [2, 32], strides = [1, 1]} : vector<16x32xf32> to vector<2x32xf32>
    %cst_97 = arith.constant dense<0.000000e+00> : vector<2x32xf32>
    %278 = tpu.matmul %275, %30, %cst_97 {dimension_numbers = #tpu.dot_dimension_numbers<[1], [0], [0], [1], [0, 0, 1, 1], [], []>} : vector<2x32xf32>, vector<32x32xf32>, vector<2x32xf32> -> vector<2x32xf32>
    %279 = arith.addf %277, %278 : vector<2x32xf32>
    %280 = arith.negf %279 : vector<2x32xf32>
    %281 = math.exp %280 : vector<2x32xf32>
    %cst_98 = arith.constant 1.000000e+00 : f32
    %282 = vector.broadcast %cst_98 : f32 to vector<2x32xf32>
    %283 = arith.addf %282, %281 : vector<2x32xf32>
    %284 = arith.divf %282, %283 : vector<2x32xf32>
    %285 = vector.extract_strided_slice %14 {offsets = [14, 0], sizes = [2, 32], strides = [1, 1]} : vector<16x32xf32> to vector<2x32xf32>
    %cst_99 = arith.constant dense<0.000000e+00> : vector<2x32xf32>
    %286 = tpu.matmul %275, %32, %cst_99 {dimension_numbers = #tpu.dot_dimension_numbers<[1], [0], [0], [1], [0, 0, 1, 1], [], []>} : vector<2x32xf32>, vector<32x32xf32>, vector<2x32xf32> -> vector<2x32xf32>
    %287 = arith.addf %285, %286 : vector<2x32xf32>
    %288 = arith.negf %287 : vector<2x32xf32>
    %289 = math.exp %288 : vector<2x32xf32>
    %cst_100 = arith.constant 1.000000e+00 : f32
    %290 = vector.broadcast %cst_100 : f32 to vector<2x32xf32>
    %291 = arith.addf %290, %289 : vector<2x32xf32>
    %292 = arith.divf %290, %291 : vector<2x32xf32>
    %293 = vector.extract_strided_slice %21 {offsets = [14, 0], sizes = [2, 32], strides = [1, 1]} : vector<16x32xf32> to vector<2x32xf32>
    %cst_101 = arith.constant dense<0.000000e+00> : vector<2x32xf32>
    %294 = tpu.matmul %275, %34, %cst_101 {dimension_numbers = #tpu.dot_dimension_numbers<[1], [0], [0], [1], [0, 0, 1, 1], [], []>} : vector<2x32xf32>, vector<32x32xf32>, vector<2x32xf32> -> vector<2x32xf32>
    %295 = arith.addf %293, %294 : vector<2x32xf32>
    %296 = math.tanh %295 : vector<2x32xf32>
    %297 = vector.extract_strided_slice %28 {offsets = [14, 0], sizes = [2, 32], strides = [1, 1]} : vector<16x32xf32> to vector<2x32xf32>
    %cst_102 = arith.constant dense<0.000000e+00> : vector<2x32xf32>
    %298 = tpu.matmul %275, %36, %cst_102 {dimension_numbers = #tpu.dot_dimension_numbers<[1], [0], [0], [1], [0, 0, 1, 1], [], []>} : vector<2x32xf32>, vector<32x32xf32>, vector<2x32xf32> -> vector<2x32xf32>
    %299 = arith.addf %297, %298 : vector<2x32xf32>
    %300 = arith.negf %299 : vector<2x32xf32>
    %301 = math.exp %300 : vector<2x32xf32>
    %cst_103 = arith.constant 1.000000e+00 : f32
    %302 = vector.broadcast %cst_103 : f32 to vector<2x32xf32>
    %303 = arith.addf %302, %301 : vector<2x32xf32>
    %304 = arith.divf %302, %303 : vector<2x32xf32>
    %305 = arith.mulf %292, %273 : vector<2x32xf32>
    %306 = arith.mulf %284, %296 : vector<2x32xf32>
    %307 = arith.addf %305, %306 : vector<2x32xf32>
    %308 = math.tanh %307 : vector<2x32xf32>
    %309 = arith.mulf %304, %308 : vector<2x32xf32>
    %c14 = arith.constant 14 : index
    %c0_104 = arith.constant 0 : index
    %310 = vector.load %arg10[%c14, %c0_104] : memref<16x32xf32, #tpu.memory_space<vmem>>, vector<2x32xf32>
    tpu.vector_store %arg10[%c14, %c0_104], %309 {strides = array<i32>} : memref<16x32xf32, #tpu.memory_space<vmem>>, vector<2x32xf32>,
    %c0_105 = arith.constant 0 : index
    %c0_106 = arith.constant 0 : index
    %311 = vector.load %arg10[%c0_105, %c0_106] : memref<16x32xf32, #tpu.memory_space<vmem>>, vector<16x32xf32>
    %c0_107 = arith.constant 0 : index
    %c0_108 = arith.constant 0 : index
    %c0_109 = arith.constant 0 : index
    %312 = vector.load %arg5[%c0_107, %c0_108, %c0_109] : memref<4x32x16xf32, #tpu.memory_space<vmem>>, vector<1x32x16xf32>
    %313 = vector.shape_cast %312 : vector<1x32x16xf32> to vector<32x16xf32>
    %cst_110 = arith.constant dense<0.000000e+00> : vector<16x16xf32>
    %314 = tpu.matmul %311, %313, %cst_110 {dimension_numbers = #tpu.dot_dimension_numbers<[1], [0], [0], [1], [0, 0, 1, 1], [], []>} : vector<16x32xf32>, vector<32x16xf32>, vector<16x16xf32> -> vector<16x16xf32>
    %c0_111 = arith.constant 0 : index
    %c0_112 = arith.constant 0 : index
    %c0_113 = arith.constant 0 : index
    %315 = vector.load %arg7[%c0_111, %c0_112, %c0_113] : memref<4x1x16xf32, #tpu.memory_space<vmem>>, vector<1x1x16xf32>
    %316 = vector.shape_cast %315 : vector<1x1x16xf32> to vector<1x16xf32>
    %317 = vector.broadcast %316 : vector<1x16xf32> to vector<16x16xf32>
    %318 = arith.addf %314, %317 : vector<16x16xf32>
    %c1_114 = arith.constant 1 : index
    %c0_115 = arith.constant 0 : index
    %c0_116 = arith.constant 0 : index
    %319 = vector.load %arg5[%c1_114, %c0_115, %c0_116] : memref<4x32x16xf32, #tpu.memory_space<vmem>>, vector<1x32x16xf32>
    %320 = vector.shape_cast %319 : vector<1x32x16xf32> to vector<32x16xf32>
    %cst_117 = arith.constant dense<0.000000e+00> : vector<16x16xf32>
    %321 = tpu.matmul %311, %320, %cst_117 {dimension_numbers = #tpu.dot_dimension_numbers<[1], [0], [0], [1], [0, 0, 1, 1], [], []>} : vector<16x32xf32>, vector<32x16xf32>, vector<16x16xf32> -> vector<16x16xf32>
    %c1_118 = arith.constant 1 : index
    %c0_119 = arith.constant 0 : index
    %c0_120 = arith.constant 0 : index
    %322 = vector.load %arg7[%c1_118, %c0_119, %c0_120] : memref<4x1x16xf32, #tpu.memory_space<vmem>>, vector<1x1x16xf32>
    %323 = vector.shape_cast %322 : vector<1x1x16xf32> to vector<1x16xf32>
    %324 = vector.broadcast %323 : vector<1x16xf32> to vector<16x16xf32>
    %325 = arith.addf %321, %324 : vector<16x16xf32>
    %c2_121 = arith.constant 2 : index
    %c0_122 = arith.constant 0 : index
    %c0_123 = arith.constant 0 : index
    %326 = vector.load %arg5[%c2_121, %c0_122, %c0_123] : memref<4x32x16xf32, #tpu.memory_space<vmem>>, vector<1x32x16xf32>
    %327 = vector.shape_cast %326 : vector<1x32x16xf32> to vector<32x16xf32>
    %cst_124 = arith.constant dense<0.000000e+00> : vector<16x16xf32>
    %328 = tpu.matmul %311, %327, %cst_124 {dimension_numbers = #tpu.dot_dimension_numbers<[1], [0], [0], [1], [0, 0, 1, 1], [], []>} : vector<16x32xf32>, vector<32x16xf32>, vector<16x16xf32> -> vector<16x16xf32>
    %c2_125 = arith.constant 2 : index
    %c0_126 = arith.constant 0 : index
    %c0_127 = arith.constant 0 : index
    %329 = vector.load %arg7[%c2_125, %c0_126, %c0_127] : memref<4x1x16xf32, #tpu.memory_space<vmem>>, vector<1x1x16xf32>
    %330 = vector.shape_cast %329 : vector<1x1x16xf32> to vector<1x16xf32>
    %331 = vector.broadcast %330 : vector<1x16xf32> to vector<16x16xf32>
    %332 = arith.addf %328, %331 : vector<16x16xf32>
    %c3_128 = arith.constant 3 : index
    %c0_129 = arith.constant 0 : index
    %c0_130 = arith.constant 0 : index
    %333 = vector.load %arg5[%c3_128, %c0_129, %c0_130] : memref<4x32x16xf32, #tpu.memory_space<vmem>>, vector<1x32x16xf32>
    %334 = vector.shape_cast %333 : vector<1x32x16xf32> to vector<32x16xf32>
    %cst_131 = arith.constant dense<0.000000e+00> : vector<16x16xf32>
    %335 = tpu.matmul %311, %334, %cst_131 {dimension_numbers = #tpu.dot_dimension_numbers<[1], [0], [0], [1], [0, 0, 1, 1], [], []>} : vector<16x32xf32>, vector<32x16xf32>, vector<16x16xf32> -> vector<16x16xf32>
    %c3_132 = arith.constant 3 : index
    %c0_133 = arith.constant 0 : index
    %c0_134 = arith.constant 0 : index
    %336 = vector.load %arg7[%c3_132, %c0_133, %c0_134] : memref<4x1x16xf32, #tpu.memory_space<vmem>>, vector<1x1x16xf32>
    %337 = vector.shape_cast %336 : vector<1x1x16xf32> to vector<1x16xf32>
    %338 = vector.broadcast %337 : vector<1x16xf32> to vector<16x16xf32>
    %339 = arith.addf %335, %338 : vector<16x16xf32>
    %c0_135 = arith.constant 0 : index
    %c0_136 = arith.constant 0 : index
    %c0_137 = arith.constant 0 : index
    %340 = vector.load %arg6[%c0_135, %c0_136, %c0_137] : memref<4x16x16xf32, #tpu.memory_space<vmem>>, vector<1x16x16xf32>
    %341 = vector.shape_cast %340 : vector<1x16x16xf32> to vector<16x16xf32>
    %c1_138 = arith.constant 1 : index
    %c0_139 = arith.constant 0 : index
    %c0_140 = arith.constant 0 : index
    %342 = vector.load %arg6[%c1_138, %c0_139, %c0_140] : memref<4x16x16xf32, #tpu.memory_space<vmem>>, vector<1x16x16xf32>
    %343 = vector.shape_cast %342 : vector<1x16x16xf32> to vector<16x16xf32>
    %c2_141 = arith.constant 2 : index
    %c0_142 = arith.constant 0 : index
    %c0_143 = arith.constant 0 : index
    %344 = vector.load %arg6[%c2_141, %c0_142, %c0_143] : memref<4x16x16xf32, #tpu.memory_space<vmem>>, vector<1x16x16xf32>
    %345 = vector.shape_cast %344 : vector<1x16x16xf32> to vector<16x16xf32>
    %c3_144 = arith.constant 3 : index
    %c0_145 = arith.constant 0 : index
    %c0_146 = arith.constant 0 : index
    %346 = vector.load %arg6[%c3_144, %c0_145, %c0_146] : memref<4x16x16xf32, #tpu.memory_space<vmem>>, vector<1x16x16xf32>
    %347 = vector.shape_cast %346 : vector<1x16x16xf32> to vector<16x16xf32>
    %c0_147 = arith.constant 0 : index
    %c0_148 = arith.constant 0 : index
    %348 = vector.load %arg8[%c0_147, %c0_148] : memref<16x4xf32, #tpu.memory_space<vmem>>, vector<16x4xf32>
    %cst_149 = arith.constant 0.000000e+00 : f32
    %349 = vector.broadcast %cst_149 : f32 to vector<2x16xf32>
    %cst_150 = arith.constant 0.000000e+00 : f32
    %350 = vector.broadcast %cst_150 : f32 to vector<2x16xf32>
    %351 = vector.extract_strided_slice %318 {offsets = [0, 0], sizes = [2, 16], strides = [1, 1]} : vector<16x16xf32> to vector<2x16xf32>
    %cst_151 = arith.constant dense<0.000000e+00> : vector<2x16xf32>
    %352 = tpu.matmul %349, %341, %cst_151 {dimension_numbers = #tpu.dot_dimension_numbers<[1], [0], [0], [1], [0, 0, 1, 1], [], []>} : vector<2x16xf32>, vector<16x16xf32>, vector<2x16xf32> -> vector<2x16xf32>
    %353 = arith.addf %351, %352 : vector<2x16xf32>
    %354 = arith.negf %353 : vector<2x16xf32>
    %355 = math.exp %354 : vector<2x16xf32>
    %cst_152 = arith.constant 1.000000e+00 : f32
    %356 = vector.broadcast %cst_152 : f32 to vector<2x16xf32>
    %357 = arith.addf %356, %355 : vector<2x16xf32>
    %358 = arith.divf %356, %357 : vector<2x16xf32>
    %359 = vector.extract_strided_slice %325 {offsets = [0, 0], sizes = [2, 16], strides = [1, 1]} : vector<16x16xf32> to vector<2x16xf32>
    %cst_153 = arith.constant dense<0.000000e+00> : vector<2x16xf32>
    %360 = tpu.matmul %349, %343, %cst_153 {dimension_numbers = #tpu.dot_dimension_numbers<[1], [0], [0], [1], [0, 0, 1, 1], [], []>} : vector<2x16xf32>, vector<16x16xf32>, vector<2x16xf32> -> vector<2x16xf32>
    %361 = arith.addf %359, %360 : vector<2x16xf32>
    %362 = arith.negf %361 : vector<2x16xf32>
    %363 = math.exp %362 : vector<2x16xf32>
    %cst_154 = arith.constant 1.000000e+00 : f32
    %364 = vector.broadcast %cst_154 : f32 to vector<2x16xf32>
    %365 = arith.addf %364, %363 : vector<2x16xf32>
    %366 = arith.divf %364, %365 : vector<2x16xf32>
    %367 = vector.extract_strided_slice %332 {offsets = [0, 0], sizes = [2, 16], strides = [1, 1]} : vector<16x16xf32> to vector<2x16xf32>
    %cst_155 = arith.constant dense<0.000000e+00> : vector<2x16xf32>
    %368 = tpu.matmul %349, %345, %cst_155 {dimension_numbers = #tpu.dot_dimension_numbers<[1], [0], [0], [1], [0, 0, 1, 1], [], []>} : vector<2x16xf32>, vector<16x16xf32>, vector<2x16xf32> -> vector<2x16xf32>
    %369 = arith.addf %367, %368 : vector<2x16xf32>
    %370 = math.tanh %369 : vector<2x16xf32>
    %371 = vector.extract_strided_slice %339 {offsets = [0, 0], sizes = [2, 16], strides = [1, 1]} : vector<16x16xf32> to vector<2x16xf32>
    %cst_156 = arith.constant dense<0.000000e+00> : vector<2x16xf32>
    %372 = tpu.matmul %349, %347, %cst_156 {dimension_numbers = #tpu.dot_dimension_numbers<[1], [0], [0], [1], [0, 0, 1, 1], [], []>} : vector<2x16xf32>, vector<16x16xf32>, vector<2x16xf32> -> vector<2x16xf32>
    %373 = arith.addf %371, %372 : vector<2x16xf32>
    %374 = arith.negf %373 : vector<2x16xf32>
    %375 = math.exp %374 : vector<2x16xf32>
    %cst_157 = arith.constant 1.000000e+00 : f32
    %376 = vector.broadcast %cst_157 : f32 to vector<2x16xf32>
    %377 = arith.addf %376, %375 : vector<2x16xf32>
    %378 = arith.divf %376, %377 : vector<2x16xf32>
    %379 = arith.mulf %366, %350 : vector<2x16xf32>
    %380 = arith.mulf %358, %370 : vector<2x16xf32>
    %381 = arith.addf %379, %380 : vector<2x16xf32>
    %382 = math.tanh %381 : vector<2x16xf32>
    %383 = arith.mulf %378, %382 : vector<2x16xf32>
    %cst_158 = arith.constant dense<0.000000e+00> : vector<2x4xf32>
    %384 = tpu.matmul %383, %348, %cst_158 {dimension_numbers = #tpu.dot_dimension_numbers<[1], [0], [0], [1], [0, 0, 1, 1], [], []>} : vector<2x16xf32>, vector<16x4xf32>, vector<2x4xf32> -> vector<2x4xf32>
    %385 = vector.extract_strided_slice %318 {offsets = [2, 0], sizes = [2, 16], strides = [1, 1]} : vector<16x16xf32> to vector<2x16xf32>
    %cst_159 = arith.constant dense<0.000000e+00> : vector<2x16xf32>
    %386 = tpu.matmul %383, %341, %cst_159 {dimension_numbers = #tpu.dot_dimension_numbers<[1], [0], [0], [1], [0, 0, 1, 1], [], []>} : vector<2x16xf32>, vector<16x16xf32>, vector<2x16xf32> -> vector<2x16xf32>
    %387 = arith.addf %385, %386 : vector<2x16xf32>
    %388 = arith.negf %387 : vector<2x16xf32>
    %389 = math.exp %388 : vector<2x16xf32>
    %cst_160 = arith.constant 1.000000e+00 : f32
    %390 = vector.broadcast %cst_160 : f32 to vector<2x16xf32>
    %391 = arith.addf %390, %389 : vector<2x16xf32>
    %392 = arith.divf %390, %391 : vector<2x16xf32>
    %393 = vector.extract_strided_slice %325 {offsets = [2, 0], sizes = [2, 16], strides = [1, 1]} : vector<16x16xf32> to vector<2x16xf32>
    %cst_161 = arith.constant dense<0.000000e+00> : vector<2x16xf32>
    %394 = tpu.matmul %383, %343, %cst_161 {dimension_numbers = #tpu.dot_dimension_numbers<[1], [0], [0], [1], [0, 0, 1, 1], [], []>} : vector<2x16xf32>, vector<16x16xf32>, vector<2x16xf32> -> vector<2x16xf32>
    %395 = arith.addf %393, %394 : vector<2x16xf32>
    %396 = arith.negf %395 : vector<2x16xf32>
    %397 = math.exp %396 : vector<2x16xf32>
    %cst_162 = arith.constant 1.000000e+00 : f32
    %398 = vector.broadcast %cst_162 : f32 to vector<2x16xf32>
    %399 = arith.addf %398, %397 : vector<2x16xf32>
    %400 = arith.divf %398, %399 : vector<2x16xf32>
    %401 = vector.extract_strided_slice %332 {offsets = [2, 0], sizes = [2, 16], strides = [1, 1]} : vector<16x16xf32> to vector<2x16xf32>
    %cst_163 = arith.constant dense<0.000000e+00> : vector<2x16xf32>
    %402 = tpu.matmul %383, %345, %cst_163 {dimension_numbers = #tpu.dot_dimension_numbers<[1], [0], [0], [1], [0, 0, 1, 1], [], []>} : vector<2x16xf32>, vector<16x16xf32>, vector<2x16xf32> -> vector<2x16xf32>
    %403 = arith.addf %401, %402 : vector<2x16xf32>
    %404 = math.tanh %403 : vector<2x16xf32>
    %405 = vector.extract_strided_slice %339 {offsets = [2, 0], sizes = [2, 16], strides = [1, 1]} : vector<16x16xf32> to vector<2x16xf32>
    %cst_164 = arith.constant dense<0.000000e+00> : vector<2x16xf32>
    %406 = tpu.matmul %383, %347, %cst_164 {dimension_numbers = #tpu.dot_dimension_numbers<[1], [0], [0], [1], [0, 0, 1, 1], [], []>} : vector<2x16xf32>, vector<16x16xf32>, vector<2x16xf32> -> vector<2x16xf32>
    %407 = arith.addf %405, %406 : vector<2x16xf32>
    %408 = arith.negf %407 : vector<2x16xf32>
    %409 = math.exp %408 : vector<2x16xf32>
    %cst_165 = arith.constant 1.000000e+00 : f32
    %410 = vector.broadcast %cst_165 : f32 to vector<2x16xf32>
    %411 = arith.addf %410, %409 : vector<2x16xf32>
    %412 = arith.divf %410, %411 : vector<2x16xf32>
    %413 = arith.mulf %400, %381 : vector<2x16xf32>
    %414 = arith.mulf %392, %404 : vector<2x16xf32>
    %415 = arith.addf %413, %414 : vector<2x16xf32>
    %416 = math.tanh %415 : vector<2x16xf32>
    %417 = arith.mulf %412, %416 : vector<2x16xf32>
    %cst_166 = arith.constant dense<0.000000e+00> : vector<2x4xf32>
    %418 = tpu.matmul %417, %348, %cst_166 {dimension_numbers = #tpu.dot_dimension_numbers<[1], [0], [0], [1], [0, 0, 1, 1], [], []>} : vector<2x16xf32>, vector<16x4xf32>, vector<2x4xf32> -> vector<2x4xf32>
    %419 = vector.extract_strided_slice %318 {offsets = [4, 0], sizes = [2, 16], strides = [1, 1]} : vector<16x16xf32> to vector<2x16xf32>
    %cst_167 = arith.constant dense<0.000000e+00> : vector<2x16xf32>
    %420 = tpu.matmul %417, %341, %cst_167 {dimension_numbers = #tpu.dot_dimension_numbers<[1], [0], [0], [1], [0, 0, 1, 1], [], []>} : vector<2x16xf32>, vector<16x16xf32>, vector<2x16xf32> -> vector<2x16xf32>
    %421 = arith.addf %419, %420 : vector<2x16xf32>
    %422 = arith.negf %421 : vector<2x16xf32>
    %423 = math.exp %422 : vector<2x16xf32>
    %cst_168 = arith.constant 1.000000e+00 : f32
    %424 = vector.broadcast %cst_168 : f32 to vector<2x16xf32>
    %425 = arith.addf %424, %423 : vector<2x16xf32>
    %426 = arith.divf %424, %425 : vector<2x16xf32>
    %427 = vector.extract_strided_slice %325 {offsets = [4, 0], sizes = [2, 16], strides = [1, 1]} : vector<16x16xf32> to vector<2x16xf32>
    %cst_169 = arith.constant dense<0.000000e+00> : vector<2x16xf32>
    %428 = tpu.matmul %417, %343, %cst_169 {dimension_numbers = #tpu.dot_dimension_numbers<[1], [0], [0], [1], [0, 0, 1, 1], [], []>} : vector<2x16xf32>, vector<16x16xf32>, vector<2x16xf32> -> vector<2x16xf32>
    %429 = arith.addf %427, %428 : vector<2x16xf32>
    %430 = arith.negf %429 : vector<2x16xf32>
    %431 = math.exp %430 : vector<2x16xf32>
    %cst_170 = arith.constant 1.000000e+00 : f32
    %432 = vector.broadcast %cst_170 : f32 to vector<2x16xf32>
    %433 = arith.addf %432, %431 : vector<2x16xf32>
    %434 = arith.divf %432, %433 : vector<2x16xf32>
    %435 = vector.extract_strided_slice %332 {offsets = [4, 0], sizes = [2, 16], strides = [1, 1]} : vector<16x16xf32> to vector<2x16xf32>
    %cst_171 = arith.constant dense<0.000000e+00> : vector<2x16xf32>
    %436 = tpu.matmul %417, %345, %cst_171 {dimension_numbers = #tpu.dot_dimension_numbers<[1], [0], [0], [1], [0, 0, 1, 1], [], []>} : vector<2x16xf32>, vector<16x16xf32>, vector<2x16xf32> -> vector<2x16xf32>
    %437 = arith.addf %435, %436 : vector<2x16xf32>
    %438 = math.tanh %437 : vector<2x16xf32>
    %439 = vector.extract_strided_slice %339 {offsets = [4, 0], sizes = [2, 16], strides = [1, 1]} : vector<16x16xf32> to vector<2x16xf32>
    %cst_172 = arith.constant dense<0.000000e+00> : vector<2x16xf32>
    %440 = tpu.matmul %417, %347, %cst_172 {dimension_numbers = #tpu.dot_dimension_numbers<[1], [0], [0], [1], [0, 0, 1, 1], [], []>} : vector<2x16xf32>, vector<16x16xf32>, vector<2x16xf32> -> vector<2x16xf32>
    %441 = arith.addf %439, %440 : vector<2x16xf32>
    %442 = arith.negf %441 : vector<2x16xf32>
    %443 = math.exp %442 : vector<2x16xf32>
    %cst_173 = arith.constant 1.000000e+00 : f32
    %444 = vector.broadcast %cst_173 : f32 to vector<2x16xf32>
    %445 = arith.addf %444, %443 : vector<2x16xf32>
    %446 = arith.divf %444, %445 : vector<2x16xf32>
    %447 = arith.mulf %434, %415 : vector<2x16xf32>
    %448 = arith.mulf %426, %438 : vector<2x16xf32>
    %449 = arith.addf %447, %448 : vector<2x16xf32>
    %450 = math.tanh %449 : vector<2x16xf32>
    %451 = arith.mulf %446, %450 : vector<2x16xf32>
    %cst_174 = arith.constant dense<0.000000e+00> : vector<2x4xf32>
    %452 = tpu.matmul %451, %348, %cst_174 {dimension_numbers = #tpu.dot_dimension_numbers<[1], [0], [0], [1], [0, 0, 1, 1], [], []>} : vector<2x16xf32>, vector<16x4xf32>, vector<2x4xf32> -> vector<2x4xf32>
    %453 = vector.extract_strided_slice %318 {offsets = [6, 0], sizes = [2, 16], strides = [1, 1]} : vector<16x16xf32> to vector<2x16xf32>
    %cst_175 = arith.constant dense<0.000000e+00> : vector<2x16xf32>
    %454 = tpu.matmul %451, %341, %cst_175 {dimension_numbers = #tpu.dot_dimension_numbers<[1], [0], [0], [1], [0, 0, 1, 1], [], []>} : vector<2x16xf32>, vector<16x16xf32>, vector<2x16xf32> -> vector<2x16xf32>
    %455 = arith.addf %453, %454 : vector<2x16xf32>
    %456 = arith.negf %455 : vector<2x16xf32>
    %457 = math.exp %456 : vector<2x16xf32>
    %cst_176 = arith.constant 1.000000e+00 : f32
    %458 = vector.broadcast %cst_176 : f32 to vector<2x16xf32>
    %459 = arith.addf %458, %457 : vector<2x16xf32>
    %460 = arith.divf %458, %459 : vector<2x16xf32>
    %461 = vector.extract_strided_slice %325 {offsets = [6, 0], sizes = [2, 16], strides = [1, 1]} : vector<16x16xf32> to vector<2x16xf32>
    %cst_177 = arith.constant dense<0.000000e+00> : vector<2x16xf32>
    %462 = tpu.matmul %451, %343, %cst_177 {dimension_numbers = #tpu.dot_dimension_numbers<[1], [0], [0], [1], [0, 0, 1, 1], [], []>} : vector<2x16xf32>, vector<16x16xf32>, vector<2x16xf32> -> vector<2x16xf32>
    %463 = arith.addf %461, %462 : vector<2x16xf32>
    %464 = arith.negf %463 : vector<2x16xf32>
    %465 = math.exp %464 : vector<2x16xf32>
    %cst_178 = arith.constant 1.000000e+00 : f32
    %466 = vector.broadcast %cst_178 : f32 to vector<2x16xf32>
    %467 = arith.addf %466, %465 : vector<2x16xf32>
    %468 = arith.divf %466, %467 : vector<2x16xf32>
    %469 = vector.extract_strided_slice %332 {offsets = [6, 0], sizes = [2, 16], strides = [1, 1]} : vector<16x16xf32> to vector<2x16xf32>
    %cst_179 = arith.constant dense<0.000000e+00> : vector<2x16xf32>
    %470 = tpu.matmul %451, %345, %cst_179 {dimension_numbers = #tpu.dot_dimension_numbers<[1], [0], [0], [1], [0, 0, 1, 1], [], []>} : vector<2x16xf32>, vector<16x16xf32>, vector<2x16xf32> -> vector<2x16xf32>
    %471 = arith.addf %469, %470 : vector<2x16xf32>
    %472 = math.tanh %471 : vector<2x16xf32>
    %473 = vector.extract_strided_slice %339 {offsets = [6, 0], sizes = [2, 16], strides = [1, 1]} : vector<16x16xf32> to vector<2x16xf32>
    %cst_180 = arith.constant dense<0.000000e+00> : vector<2x16xf32>
    %474 = tpu.matmul %451, %347, %cst_180 {dimension_numbers = #tpu.dot_dimension_numbers<[1], [0], [0], [1], [0, 0, 1, 1], [], []>} : vector<2x16xf32>, vector<16x16xf32>, vector<2x16xf32> -> vector<2x16xf32>
    %475 = arith.addf %473, %474 : vector<2x16xf32>
    %476 = arith.negf %475 : vector<2x16xf32>
    %477 = math.exp %476 : vector<2x16xf32>
    %cst_181 = arith.constant 1.000000e+00 : f32
    %478 = vector.broadcast %cst_181 : f32 to vector<2x16xf32>
    %479 = arith.addf %478, %477 : vector<2x16xf32>
    %480 = arith.divf %478, %479 : vector<2x16xf32>
    %481 = arith.mulf %468, %449 : vector<2x16xf32>
    %482 = arith.mulf %460, %472 : vector<2x16xf32>
    %483 = arith.addf %481, %482 : vector<2x16xf32>
    %484 = math.tanh %483 : vector<2x16xf32>
    %485 = arith.mulf %480, %484 : vector<2x16xf32>
    %cst_182 = arith.constant dense<0.000000e+00> : vector<2x4xf32>
    %486 = tpu.matmul %485, %348, %cst_182 {dimension_numbers = #tpu.dot_dimension_numbers<[1], [0], [0], [1], [0, 0, 1, 1], [], []>} : vector<2x16xf32>, vector<16x4xf32>, vector<2x4xf32> -> vector<2x4xf32>
    %487 = vector.extract_strided_slice %318 {offsets = [8, 0], sizes = [2, 16], strides = [1, 1]} : vector<16x16xf32> to vector<2x16xf32>
    %cst_183 = arith.constant dense<0.000000e+00> : vector<2x16xf32>
    %488 = tpu.matmul %485, %341, %cst_183 {dimension_numbers = #tpu.dot_dimension_numbers<[1], [0], [0], [1], [0, 0, 1, 1], [], []>} : vector<2x16xf32>, vector<16x16xf32>, vector<2x16xf32> -> vector<2x16xf32>
    %489 = arith.addf %487, %488 : vector<2x16xf32>
    %490 = arith.negf %489 : vector<2x16xf32>
    %491 = math.exp %490 : vector<2x16xf32>
    %cst_184 = arith.constant 1.000000e+00 : f32
    %492 = vector.broadcast %cst_184 : f32 to vector<2x16xf32>
    %493 = arith.addf %492, %491 : vector<2x16xf32>
    %494 = arith.divf %492, %493 : vector<2x16xf32>
    %495 = vector.extract_strided_slice %325 {offsets = [8, 0], sizes = [2, 16], strides = [1, 1]} : vector<16x16xf32> to vector<2x16xf32>
    %cst_185 = arith.constant dense<0.000000e+00> : vector<2x16xf32>
    %496 = tpu.matmul %485, %343, %cst_185 {dimension_numbers = #tpu.dot_dimension_numbers<[1], [0], [0], [1], [0, 0, 1, 1], [], []>} : vector<2x16xf32>, vector<16x16xf32>, vector<2x16xf32> -> vector<2x16xf32>
    %497 = arith.addf %495, %496 : vector<2x16xf32>
    %498 = arith.negf %497 : vector<2x16xf32>
    %499 = math.exp %498 : vector<2x16xf32>
    %cst_186 = arith.constant 1.000000e+00 : f32
    %500 = vector.broadcast %cst_186 : f32 to vector<2x16xf32>
    %501 = arith.addf %500, %499 : vector<2x16xf32>
    %502 = arith.divf %500, %501 : vector<2x16xf32>
    %503 = vector.extract_strided_slice %332 {offsets = [8, 0], sizes = [2, 16], strides = [1, 1]} : vector<16x16xf32> to vector<2x16xf32>
    %cst_187 = arith.constant dense<0.000000e+00> : vector<2x16xf32>
    %504 = tpu.matmul %485, %345, %cst_187 {dimension_numbers = #tpu.dot_dimension_numbers<[1], [0], [0], [1], [0, 0, 1, 1], [], []>} : vector<2x16xf32>, vector<16x16xf32>, vector<2x16xf32> -> vector<2x16xf32>
    %505 = arith.addf %503, %504 : vector<2x16xf32>
    %506 = math.tanh %505 : vector<2x16xf32>
    %507 = vector.extract_strided_slice %339 {offsets = [8, 0], sizes = [2, 16], strides = [1, 1]} : vector<16x16xf32> to vector<2x16xf32>
    %cst_188 = arith.constant dense<0.000000e+00> : vector<2x16xf32>
    %508 = tpu.matmul %485, %347, %cst_188 {dimension_numbers = #tpu.dot_dimension_numbers<[1], [0], [0], [1], [0, 0, 1, 1], [], []>} : vector<2x16xf32>, vector<16x16xf32>, vector<2x16xf32> -> vector<2x16xf32>
    %509 = arith.addf %507, %508 : vector<2x16xf32>
    %510 = arith.negf %509 : vector<2x16xf32>
    %511 = math.exp %510 : vector<2x16xf32>
    %cst_189 = arith.constant 1.000000e+00 : f32
    %512 = vector.broadcast %cst_189 : f32 to vector<2x16xf32>
    %513 = arith.addf %512, %511 : vector<2x16xf32>
    %514 = arith.divf %512, %513 : vector<2x16xf32>
    %515 = arith.mulf %502, %483 : vector<2x16xf32>
    %516 = arith.mulf %494, %506 : vector<2x16xf32>
    %517 = arith.addf %515, %516 : vector<2x16xf32>
    %518 = math.tanh %517 : vector<2x16xf32>
    %519 = arith.mulf %514, %518 : vector<2x16xf32>
    %cst_190 = arith.constant dense<0.000000e+00> : vector<2x4xf32>
    %520 = tpu.matmul %519, %348, %cst_190 {dimension_numbers = #tpu.dot_dimension_numbers<[1], [0], [0], [1], [0, 0, 1, 1], [], []>} : vector<2x16xf32>, vector<16x4xf32>, vector<2x4xf32> -> vector<2x4xf32>
    %521 = vector.extract_strided_slice %318 {offsets = [10, 0], sizes = [2, 16], strides = [1, 1]} : vector<16x16xf32> to vector<2x16xf32>
    %cst_191 = arith.constant dense<0.000000e+00> : vector<2x16xf32>
    %522 = tpu.matmul %519, %341, %cst_191 {dimension_numbers = #tpu.dot_dimension_numbers<[1], [0], [0], [1], [0, 0, 1, 1], [], []>} : vector<2x16xf32>, vector<16x16xf32>, vector<2x16xf32> -> vector<2x16xf32>
    %523 = arith.addf %521, %522 : vector<2x16xf32>
    %524 = arith.negf %523 : vector<2x16xf32>
    %525 = math.exp %524 : vector<2x16xf32>
    %cst_192 = arith.constant 1.000000e+00 : f32
    %526 = vector.broadcast %cst_192 : f32 to vector<2x16xf32>
    %527 = arith.addf %526, %525 : vector<2x16xf32>
    %528 = arith.divf %526, %527 : vector<2x16xf32>
    %529 = vector.extract_strided_slice %325 {offsets = [10, 0], sizes = [2, 16], strides = [1, 1]} : vector<16x16xf32> to vector<2x16xf32>
    %cst_193 = arith.constant dense<0.000000e+00> : vector<2x16xf32>
    %530 = tpu.matmul %519, %343, %cst_193 {dimension_numbers = #tpu.dot_dimension_numbers<[1], [0], [0], [1], [0, 0, 1, 1], [], []>} : vector<2x16xf32>, vector<16x16xf32>, vector<2x16xf32> -> vector<2x16xf32>
    %531 = arith.addf %529, %530 : vector<2x16xf32>
    %532 = arith.negf %531 : vector<2x16xf32>
    %533 = math.exp %532 : vector<2x16xf32>
    %cst_194 = arith.constant 1.000000e+00 : f32
    %534 = vector.broadcast %cst_194 : f32 to vector<2x16xf32>
    %535 = arith.addf %534, %533 : vector<2x16xf32>
    %536 = arith.divf %534, %535 : vector<2x16xf32>
    %537 = vector.extract_strided_slice %332 {offsets = [10, 0], sizes = [2, 16], strides = [1, 1]} : vector<16x16xf32> to vector<2x16xf32>
    %cst_195 = arith.constant dense<0.000000e+00> : vector<2x16xf32>
    %538 = tpu.matmul %519, %345, %cst_195 {dimension_numbers = #tpu.dot_dimension_numbers<[1], [0], [0], [1], [0, 0, 1, 1], [], []>} : vector<2x16xf32>, vector<16x16xf32>, vector<2x16xf32> -> vector<2x16xf32>
    %539 = arith.addf %537, %538 : vector<2x16xf32>
    %540 = math.tanh %539 : vector<2x16xf32>
    %541 = vector.extract_strided_slice %339 {offsets = [10, 0], sizes = [2, 16], strides = [1, 1]} : vector<16x16xf32> to vector<2x16xf32>
    %cst_196 = arith.constant dense<0.000000e+00> : vector<2x16xf32>
    %542 = tpu.matmul %519, %347, %cst_196 {dimension_numbers = #tpu.dot_dimension_numbers<[1], [0], [0], [1], [0, 0, 1, 1], [], []>} : vector<2x16xf32>, vector<16x16xf32>, vector<2x16xf32> -> vector<2x16xf32>
    %543 = arith.addf %541, %542 : vector<2x16xf32>
    %544 = arith.negf %543 : vector<2x16xf32>
    %545 = math.exp %544 : vector<2x16xf32>
    %cst_197 = arith.constant 1.000000e+00 : f32
    %546 = vector.broadcast %cst_197 : f32 to vector<2x16xf32>
    %547 = arith.addf %546, %545 : vector<2x16xf32>
    %548 = arith.divf %546, %547 : vector<2x16xf32>
    %549 = arith.mulf %536, %517 : vector<2x16xf32>
    %550 = arith.mulf %528, %540 : vector<2x16xf32>
    %551 = arith.addf %549, %550 : vector<2x16xf32>
    %552 = math.tanh %551 : vector<2x16xf32>
    %553 = arith.mulf %548, %552 : vector<2x16xf32>
    %cst_198 = arith.constant dense<0.000000e+00> : vector<2x4xf32>
    %554 = tpu.matmul %553, %348, %cst_198 {dimension_numbers = #tpu.dot_dimension_numbers<[1], [0], [0], [1], [0, 0, 1, 1], [], []>} : vector<2x16xf32>, vector<16x4xf32>, vector<2x4xf32> -> vector<2x4xf32>
    %555 = vector.extract_strided_slice %318 {offsets = [12, 0], sizes = [2, 16], strides = [1, 1]} : vector<16x16xf32> to vector<2x16xf32>
    %cst_199 = arith.constant dense<0.000000e+00> : vector<2x16xf32>
    %556 = tpu.matmul %553, %341, %cst_199 {dimension_numbers = #tpu.dot_dimension_numbers<[1], [0], [0], [1], [0, 0, 1, 1], [], []>} : vector<2x16xf32>, vector<16x16xf32>, vector<2x16xf32> -> vector<2x16xf32>
    %557 = arith.addf %555, %556 : vector<2x16xf32>
    %558 = arith.negf %557 : vector<2x16xf32>
    %559 = math.exp %558 : vector<2x16xf32>
    %cst_200 = arith.constant 1.000000e+00 : f32
    %560 = vector.broadcast %cst_200 : f32 to vector<2x16xf32>
    %561 = arith.addf %560, %559 : vector<2x16xf32>
    %562 = arith.divf %560, %561 : vector<2x16xf32>
    %563 = vector.extract_strided_slice %325 {offsets = [12, 0], sizes = [2, 16], strides = [1, 1]} : vector<16x16xf32> to vector<2x16xf32>
    %cst_201 = arith.constant dense<0.000000e+00> : vector<2x16xf32>
    %564 = tpu.matmul %553, %343, %cst_201 {dimension_numbers = #tpu.dot_dimension_numbers<[1], [0], [0], [1], [0, 0, 1, 1], [], []>} : vector<2x16xf32>, vector<16x16xf32>, vector<2x16xf32> -> vector<2x16xf32>
    %565 = arith.addf %563, %564 : vector<2x16xf32>
    %566 = arith.negf %565 : vector<2x16xf32>
    %567 = math.exp %566 : vector<2x16xf32>
    %cst_202 = arith.constant 1.000000e+00 : f32
    %568 = vector.broadcast %cst_202 : f32 to vector<2x16xf32>
    %569 = arith.addf %568, %567 : vector<2x16xf32>
    %570 = arith.divf %568, %569 : vector<2x16xf32>
    %571 = vector.extract_strided_slice %332 {offsets = [12, 0], sizes = [2, 16], strides = [1, 1]} : vector<16x16xf32> to vector<2x16xf32>
    %cst_203 = arith.constant dense<0.000000e+00> : vector<2x16xf32>
    %572 = tpu.matmul %553, %345, %cst_203 {dimension_numbers = #tpu.dot_dimension_numbers<[1], [0], [0], [1], [0, 0, 1, 1], [], []>} : vector<2x16xf32>, vector<16x16xf32>, vector<2x16xf32> -> vector<2x16xf32>
    %573 = arith.addf %571, %572 : vector<2x16xf32>
    %574 = math.tanh %573 : vector<2x16xf32>
    %575 = vector.extract_strided_slice %339 {offsets = [12, 0], sizes = [2, 16], strides = [1, 1]} : vector<16x16xf32> to vector<2x16xf32>
    %cst_204 = arith.constant dense<0.000000e+00> : vector<2x16xf32>
    %576 = tpu.matmul %553, %347, %cst_204 {dimension_numbers = #tpu.dot_dimension_numbers<[1], [0], [0], [1], [0, 0, 1, 1], [], []>} : vector<2x16xf32>, vector<16x16xf32>, vector<2x16xf32> -> vector<2x16xf32>
    %577 = arith.addf %575, %576 : vector<2x16xf32>
    %578 = arith.negf %577 : vector<2x16xf32>
    %579 = math.exp %578 : vector<2x16xf32>
    %cst_205 = arith.constant 1.000000e+00 : f32
    %580 = vector.broadcast %cst_205 : f32 to vector<2x16xf32>
    %581 = arith.addf %580, %579 : vector<2x16xf32>
    %582 = arith.divf %580, %581 : vector<2x16xf32>
    %583 = arith.mulf %570, %551 : vector<2x16xf32>
    %584 = arith.mulf %562, %574 : vector<2x16xf32>
    %585 = arith.addf %583, %584 : vector<2x16xf32>
    %586 = math.tanh %585 : vector<2x16xf32>
    %587 = arith.mulf %582, %586 : vector<2x16xf32>
    %cst_206 = arith.constant dense<0.000000e+00> : vector<2x4xf32>
    %588 = tpu.matmul %587, %348, %cst_206 {dimension_numbers = #tpu.dot_dimension_numbers<[1], [0], [0], [1], [0, 0, 1, 1], [], []>} : vector<2x16xf32>, vector<16x4xf32>, vector<2x4xf32> -> vector<2x4xf32>
    %589 = vector.extract_strided_slice %318 {offsets = [14, 0], sizes = [2, 16], strides = [1, 1]} : vector<16x16xf32> to vector<2x16xf32>
    %cst_207 = arith.constant dense<0.000000e+00> : vector<2x16xf32>
    %590 = tpu.matmul %587, %341, %cst_207 {dimension_numbers = #tpu.dot_dimension_numbers<[1], [0], [0], [1], [0, 0, 1, 1], [], []>} : vector<2x16xf32>, vector<16x16xf32>, vector<2x16xf32> -> vector<2x16xf32>
    %591 = arith.addf %589, %590 : vector<2x16xf32>
    %592 = arith.negf %591 : vector<2x16xf32>
    %593 = math.exp %592 : vector<2x16xf32>
    %cst_208 = arith.constant 1.000000e+00 : f32
    %594 = vector.broadcast %cst_208 : f32 to vector<2x16xf32>
    %595 = arith.addf %594, %593 : vector<2x16xf32>
    %596 = arith.divf %594, %595 : vector<2x16xf32>
    %597 = vector.extract_strided_slice %325 {offsets = [14, 0], sizes = [2, 16], strides = [1, 1]} : vector<16x16xf32> to vector<2x16xf32>
    %cst_209 = arith.constant dense<0.000000e+00> : vector<2x16xf32>
    %598 = tpu.matmul %587, %343, %cst_209 {dimension_numbers = #tpu.dot_dimension_numbers<[1], [0], [0], [1], [0, 0, 1, 1], [], []>} : vector<2x16xf32>, vector<16x16xf32>, vector<2x16xf32> -> vector<2x16xf32>
    %599 = arith.addf %597, %598 : vector<2x16xf32>
    %600 = arith.negf %599 : vector<2x16xf32>
    %601 = math.exp %600 : vector<2x16xf32>
    %cst_210 = arith.constant 1.000000e+00 : f32
    %602 = vector.broadcast %cst_210 : f32 to vector<2x16xf32>
    %603 = arith.addf %602, %601 : vector<2x16xf32>
    %604 = arith.divf %602, %603 : vector<2x16xf32>
    %605 = vector.extract_strided_slice %332 {offsets = [14, 0], sizes = [2, 16], strides = [1, 1]} : vector<16x16xf32> to vector<2x16xf32>
    %cst_211 = arith.constant dense<0.000000e+00> : vector<2x16xf32>
    %606 = tpu.matmul %587, %345, %cst_211 {dimension_numbers = #tpu.dot_dimension_numbers<[1], [0], [0], [1], [0, 0, 1, 1], [], []>} : vector<2x16xf32>, vector<16x16xf32>, vector<2x16xf32> -> vector<2x16xf32>
    %607 = arith.addf %605, %606 : vector<2x16xf32>
    %608 = math.tanh %607 : vector<2x16xf32>
    %609 = vector.extract_strided_slice %339 {offsets = [14, 0], sizes = [2, 16], strides = [1, 1]} : vector<16x16xf32> to vector<2x16xf32>
    %cst_212 = arith.constant dense<0.000000e+00> : vector<2x16xf32>
    %610 = tpu.matmul %587, %347, %cst_212 {dimension_numbers = #tpu.dot_dimension_numbers<[1], [0], [0], [1], [0, 0, 1, 1], [], []>} : vector<2x16xf32>, vector<16x16xf32>, vector<2x16xf32> -> vector<2x16xf32>
    %611 = arith.addf %609, %610 : vector<2x16xf32>
    %612 = arith.negf %611 : vector<2x16xf32>
    %613 = math.exp %612 : vector<2x16xf32>
    %cst_213 = arith.constant 1.000000e+00 : f32
    %614 = vector.broadcast %cst_213 : f32 to vector<2x16xf32>
    %615 = arith.addf %614, %613 : vector<2x16xf32>
    %616 = arith.divf %614, %615 : vector<2x16xf32>
    %617 = arith.mulf %604, %585 : vector<2x16xf32>
    %618 = arith.mulf %596, %608 : vector<2x16xf32>
    %619 = arith.addf %617, %618 : vector<2x16xf32>
    %620 = math.tanh %619 : vector<2x16xf32>
    %621 = arith.mulf %616, %620 : vector<2x16xf32>
    %cst_214 = arith.constant dense<0.000000e+00> : vector<2x4xf32>
    %622 = tpu.matmul %621, %348, %cst_214 {dimension_numbers = #tpu.dot_dimension_numbers<[1], [0], [0], [1], [0, 0, 1, 1], [], []>} : vector<2x16xf32>, vector<16x4xf32>, vector<2x4xf32> -> vector<2x4xf32>
    %623 = tpu.concatenate %384, %418, %452, %486, %520, %554, %588, %622 in 1 : vector<2x4xf32>, vector<2x4xf32>, vector<2x4xf32>, vector<2x4xf32>, vector<2x4xf32>, vector<2x4xf32>, vector<2x4xf32>, vector<2x4xf32> -> vector<2x32xf32>
    %c0_215 = arith.constant 0 : index
    %c0_216 = arith.constant 0 : index
    %624 = vector.load %arg9[%c0_215, %c0_216] : memref<2x32xf32, #tpu.memory_space<vmem>>, vector<2x32xf32>
    tpu.vector_store %arg9[%c0_215, %c0_216], %623 {strides = array<i32>} : memref<2x32xf32, #tpu.memory_space<vmem>>, vector<2x32xf32>,
    return
  }
  func.func @transform_0(%arg0: i32) -> (i32, i32) {
    %c0_i32 = arith.constant 0 : i32
    %c0_i32_0 = arith.constant 0 : i32
    %c0_i32_1 = arith.constant 0 : i32
    return %c0_i32, %c0_i32_0 : i32, i32
  }
  func.func @transform_1(%arg0: i32) -> (i32, i32, i32) {
    %c0_i32 = arith.constant 0 : i32
    %c0_i32_0 = arith.constant 0 : i32
    %c0_i32_1 = arith.constant 0 : i32
    %c0_i32_2 = arith.constant 0 : i32
    return %c0_i32, %c0_i32_0, %c0_i32_1 : i32, i32, i32
  }
  func.func @transform_2(%arg0: i32) -> (i32, i32, i32) {
    %c0_i32 = arith.constant 0 : i32
    %c0_i32_0 = arith.constant 0 : i32
    %c0_i32_1 = arith.constant 0 : i32
    %c0_i32_2 = arith.constant 0 : i32
    return %c0_i32, %c0_i32_0, %c0_i32_1 : i32, i32, i32
  }
  func.func @transform_3(%arg0: i32) -> (i32, i32, i32) {
    %c0_i32 = arith.constant 0 : i32
    %c0_i32_0 = arith.constant 0 : i32
    %c0_i32_1 = arith.constant 0 : i32
    %c0_i32_2 = arith.constant 0 : i32
    return %c0_i32, %c0_i32_0, %c0_i32_1 : i32, i32, i32
  }
  func.func @transform_4(%arg0: i32) -> (i32, i32, i32) {
    %c0_i32 = arith.constant 0 : i32
    %c0_i32_0 = arith.constant 0 : i32
    %c0_i32_1 = arith.constant 0 : i32
    %c0_i32_2 = arith.constant 0 : i32
    return %c0_i32, %c0_i32_0, %c0_i32_1 : i32, i32, i32
  }
  func.func @transform_5(%arg0: i32) -> (i32, i32, i32) {
    %c0_i32 = arith.constant 0 : i32
    %c0_i32_0 = arith.constant 0 : i32
    %c0_i32_1 = arith.constant 0 : i32
    %c0_i32_2 = arith.constant 0 : i32
    return %c0_i32, %c0_i32_0, %c0_i32_1 : i32, i32, i32
  }
  func.func @transform_6(%arg0: i32) -> (i32, i32, i32) {
    %c0_i32 = arith.constant 0 : i32
    %c0_i32_0 = arith.constant 0 : i32
    %c0_i32_1 = arith.constant 0 : i32
    %c0_i32_2 = arith.constant 0 : i32
    return %c0_i32, %c0_i32_0, %c0_i32_1 : i32, i32, i32
  }
  func.func @transform_7(%arg0: i32) -> (i32, i32) {
    %c0_i32 = arith.constant 0 : i32
    %c0_i32_0 = arith.constant 0 : i32
    %c0_i32_1 = arith.constant 0 : i32
    return %c0_i32, %c0_i32_0 : i32, i32
  }
  func.func @transform_8(%arg0: i32) -> (i32, i32) {
    %c0_i32 = arith.constant 0 : i32
    %c0_i32_0 = arith.constant 0 : i32
    %c0_i32_1 = arith.constant 0 : i32
    return %c0_i32, %c0_i32_0 : i32, i32
  }
}

</mosaic_0001>

<bundles_post_ra>
// kernel: tpu_custom_call.1
= control target key start
LH: loop header
LB: loop body
LE: loop exit
PB: predicated region body
PF: predicated region fallthrough
CT: control target
= control target key end

     0   :  { %vm47_vm0 = vcmask 1043456   ;;  %vm40_vm1 = vcmask 31744   ;;  %s9296_s0 = inlined_call_operand.vmem [shape: f32[16,4], index: 0, kind: input, shape index: {}]   ;;  %s9297_s1 = inlined_call_operand.vmem [shape: f32[4,4,32], index: 1, kind: input, shape index: {}]   ;;  %s9298_s2 = inlined_call_operand.vmem [shape: f32[4,32,32], index: 2, kind: input, shape index: {}]   ;;  %s9299_s3 = inlined_call_operand.vmem [shape: f32[4,1,32], index: 3, kind: input, shape index: {}]   ;;  %s9300_s4 = inlined_call_operand.vmem [shape: f32[4,32,16], index: 4, kind: input, shape index: {}]   ;;  %s9301_s5 = inlined_call_operand.vmem [shape: f32[4,16,16], index: 5, kind: input, shape index: {}]   ;;  %s9302_s6 = inlined_call_operand.vmem [shape: f32[4,1,16], index: 6, kind: input, shape index: {}]   ;;  %s9303_s7 = inlined_call_operand.vmem [shape: f32[16,4], index: 7, kind: input, shape index: {}]   ;;  %s9304_s8 = inlined_call_operand.hbm [shape: f32[2,32], index: 8, kind: output, shape index: {}]  }
   0x1   :  { %v32_v0 = vld [vmem:[%s9297_s1] sm:$0xf]  ;;  %v6588_v1 = vld [vmem:[%s9297_s1 + $0x4] sm:$0xf]  ;;  %v31_v3 = vld [vmem:[%s9296_s0 + $0x8] sm:$0xff] }
   0x2   :  { %v30_v2 = vld [vmem:[%s9296_s0] sm:$0xff]  ;;  %7079 = vmatprep.subr.msk.mxu0 %vm47_vm0, %v32_v0  ;;  %7084 = vmatprep.subr.msk.mxu1 %vm47_vm0, %v6588_v1  ;;  %v6594_v4 = vld [vmem:[%s9297_s1 + $0x8] sm:$0xf]  ;;  %v6600_v5 = vld [vmem:[%s9297_s1 + $0xc] sm:$0xf] }
   0x3   :  { %7080 = vmatpush3.msk.msra.mxu0 %vm47_vm0, %v32_v0  ;;  %7081 = vmatprep.mubr.msk.f32.mxu0 %vm40_vm1, %v30_v2  ;;  %v390_v6 = vld [vmem:[%s9298_s2] sm:$0xff]  ;;  %v391_v7 = vld [vmem:[%s9298_s2 + $0x8] sm:$0xff]  ;;  %v392_v12 = vld [vmem:[%s9298_s2 + $0x10] sm:$0xff] }
   0x4   :  { %7085 = vmatpush3.msk.msra.mxu1 %vm47_vm0, %v6588_v1  ;;  %7086 = vmatprep.mubr.msk.f32.mxu1 %vm40_vm1, %v30_v2  ;;  %v6606_v8 = vld [vmem:[%s9298_s2 + $0x20] sm:$0xff]  ;;  %v6607_v9 = vld [vmem:[%s9298_s2 + $0x28] sm:$0xff]  ;;  %v8508_v10 = vpack.c.bf16 %v391_v7, %v390_v6  ;;  %v393_v13 = vld [vmem:[%s9298_s2 + $0x18] sm:$0xff] }
   0x5   :  { %7082 = vmatmul.mubr.msk.f32.vlgmr.msra.gmra.mrb[0].mxu0 %vm40_vm1, %v31_v3  ;;  %7087 = vmatmul.mubr.msk.f32.vlgmr.msra.gmra.mrb[0].mxu1 %vm40_vm1, %v31_v3  ;;  %v8510_v11 = vpack.c.bf16 %v6607_v9, %v6606_v8  ;;  %v6608_v14 = vld [vmem:[%s9298_s2 + $0x30] sm:$0xff]  ;;  %v6609_v15 = vld [vmem:[%s9298_s2 + $0x38] sm:$0xff] }
   0x6   :  { %7089 = vmatprep.subr.msk.mxu0 %vm47_vm0, %v6594_v4  ;;  %7094 = vmatprep.subr.msk.mxu1 %vm47_vm0, %v6600_v5 }
   0x7   :  { %7090 = vmatpush3.msk.msra.mxu0 %vm47_vm0, %v6594_v4  ;;  %7095 = vmatpush3.msk.msra.mxu1 %vm47_vm0, %v6600_v5 }
   0x8   :  { %7091 = vmatprep.mubr.msk.f32.mxu0 %vm40_vm1, %v30_v2  ;;  %7096 = vmatprep.mubr.msk.f32.mxu1 %vm40_vm1, %v30_v2 }
   0x9   :  { %13 = vsyncpa [#allocation4], 0  ;;  %v8410_v16 = vmov 0.0|0.0   ;;  %7092 = vmatmul.mubr.msk.f32.vlgmr.msra.gmra.mrb[2].mxu0 %vm40_vm1, %v31_v3  ;;  %7097 = vmatmul.mubr.msk.f32.vlgmr.msra.gmra.mrb[2].mxu1 %vm40_vm1, %v31_v3  ;;  %v8532_v17 = vpack.c.bf16 %v393_v13, %v392_v12  ;;  %v8534_v18 = vpack.c.bf16 %v6609_v15, %v6608_v14  ;;  %v6610_v19 = vld [vmem:[%s9298_s2 + $0x40] sm:$0xff]  ;;  %v6611_v20 = vld [vmem:[%s9298_s2 + $0x48] sm:$0xff]  ;;  %vm8411_vm2 = vmmov 0  }
   0xa   :  { %7775 = vmatprep.subr.bf16.mxu0 %v8410_v16  ;;  %7781 = vmatprep.subr.bf16.mxu1 %v8410_v16  ;;  %v6614_v21 = vld [vmem:[%s9298_s2 + $0x60] sm:$0xff]  ;;  %v6615_v22 = vld [vmem:[%s9298_s2 + $0x68] sm:$0xff]  ;;  %v8412_v23 = vmov 0.0   ;;  %v8556_v24 = vpack.c.bf16 %v6611_v20, %v6610_v19  ;;  %v6612_v26 = vld [vmem:[%s9298_s2 + $0x50] sm:$0xff]  ;;  %vm409_vm3 = vcmask 261120   ;;  %vm721_vm4 = vcmask 254976  }
   0xb   :  { %7777 = vmatpush3.bf16.msra.mxu0 %v8508_v10  ;;  %7783 = vmatpush3.bf16.msra.mxu1 %v8510_v11  ;;  %v8558_v25 = vpack.c.bf16 %v6615_v22, %v6614_v21  ;;  %v6613_v27 = vld [vmem:[%s9298_s2 + $0x58] sm:$0xff]  ;;  %v6616_v28 = vld [vmem:[%s9298_s2 + $0x70] sm:$0xff]  ;;  %v6584_v32 = vld [vmem:[%s9299_s3] ss:$0 sm:$0xff]  ;;  %vm1049_vm5 = vcmask 257026   ;;  %vm1378_vm6 = vcmask 259076  }
   0xc   :  { %7778 = vmatprep.subr.bf16.mxu0 %v8410_v16  ;;  %7784 = vmatprep.subr.bf16.mxu1 %v8410_v16  ;;  %v6617_v29 = vld [vmem:[%s9298_s2 + $0x78] sm:$0xff]  ;;  %v8578_v30 = vpack.c.bf16 %v6613_v27, %v6612_v26  ;;  %v6590_v33 = vld [vmem:[%s9299_s3 + $0x1] ss:$0 sm:$0xff]  ;;  %v6596_v40 = vld [vmem:[%s9299_s3 + $0x2] ss:$0 sm:$0xff]  ;;  %vm1707_vm7 = vcmask 261126  }
   0xd   :  { %7107 = vmatprep.mubr.msk.f32.mxu0 %vm8411_vm2, %v8412_v23  ;;  %7118 = vmatprep.mubr.msk.f32.mxu1 %vm8411_vm2, %v8412_v23  ;;  %v8580_v31 = vpack.c.bf16 %v6617_v29, %v6616_v28  ;;  %v6602_v41 = vld [vmem:[%s9299_s3 + $0x3] ss:$0 sm:$0xff]  ;;  %vm3379_vm8 = vcmask 130048   ;;  %s8414_s12 = smov 8   ;;  %s8415_s13 = smov 12   ;;  %vm6558_vm9 = vcmask 64512  }
   0xe   :  { %s8416_s14 = smov 16   ;;  %s8418_s15 = smov 24   ;;  %vm6560_vm10 = vcmask 97280   ;;  %vm6563_vm11 = vcmask 162816   ;;  %vm6565_vm12 = vcmask 195584   ;;  %vm6567_vm13 = vcmask 228352  }
   0xf   :  { %7780 = vmatpush3.bf16.msra.mxu0 %v8532_v17  ;;  %7786 = vmatpush3.bf16.msra.mxu1 %v8534_v18  ;;  %s8419_s16 = smov 28   ;;  %s8420_s17 = smov [#allocation3]  }
  0x10   :  { %7787 = vmatprep.subr.bf16.mxu0 %v8410_v16  ;;  %7793 = vmatprep.subr.bf16.mxu1 %v8410_v16  ;;  %s6576_s18 = sshll.u32 %s8420_s17, 4  ;;  %s6577_s18 = int_to_ptr.vmem [resolvable:$true] %s6576_s18 }
  0x11   :  { %s8386_s0 = scalar_lea.vmem %s6577_s18, 32  ;;  %p8391_p1 = scmp.lt.s32.totalorder %s6577_s18, %s6577_s18 }
  0x12   :  { %7108 = vmatmul.mubr.f32.vlgmr.msra.gmra.mrb[4].mxu0 %v8412_v23  ;;  %7119 = vmatmul.mubr.f32.vlgmr.msra.gmra.mrb[4].mxu1 %v8412_v23  ;;  %p8387_p0 = scmp.ne.s32.totalorder %s6577_s18, %s8386_s0  ;;  %p8392_p2 = scmp.lt.s32.totalorder %s8386_s0, %s8386_s0 }
  0x13   :  { %7789 = vmatpush3.bf16.msra.mxu0 %v8556_v24  ;;  %7795 = vmatpush3.bf16.msra.mxu1 %v8558_v25 }
  0x14   :  { %7790 = vmatprep.subr.bf16.mxu0 %v8410_v16  ;;  %7796 = vmatprep.subr.bf16.mxu1 %v8410_v16  ;;  %p8393_p3 = por %p8392_p2, %p8391_p1 }
  0x15   :  { %7129 = vmatprep.mubr.msk.f32.mxu0 %vm8411_vm2, %v8412_v23  ;;  %7140 = vmatprep.mubr.msk.f32.mxu1 %vm8411_vm2, %v8412_v23 }
  0x16   :  { %p8394_p4 = pnand %p8393_p3, %p8387_p0 }
  0x17   :  { %7792 = vmatpush3.bf16.msra.mxu0 %v8578_v30  ;;  %7798 = vmatpush3.bf16.msra.mxu1 %v8580_v31 }
  0x18   :  { %7799 = vmatprep.subr.bf16.mxu0 %v8410_v16  ;;  %7805 = vmatprep.subr.bf16.mxu1 %v8410_v16 }
  0x1a   :  { %7130 = vmatmul.mubr.f32.vlgmr.msra.gmra.mrb[6].mxu0 %v8412_v23  ;;  %7141 = vmatmul.mubr.f32.vlgmr.msra.gmra.mrb[6].mxu1 %v8412_v23 }
  0x1b   :  { %7801 = vmatpush3.bf16.msra.mxu0 %v8508_v10  ;;  %7807 = vmatpush3.bf16.msra.mxu1 %v8510_v11 }
  0x1c   :  { %7802 = vmatprep.subr.bf16.mxu0 %v8410_v16  ;;  %7808 = vmatprep.subr.bf16.mxu1 %v8410_v16 }
  0x1d   :  { %7151 = vmatprep.mubr.msk.f32.mxu0 %vm8411_vm2, %v8412_v23  ;;  %7162 = vmatprep.mubr.msk.f32.mxu1 %vm8411_vm2, %v8412_v23 }
  0x1f   :  { %7804 = vmatpush3.bf16.msra.mxu0 %v8532_v17  ;;  %7810 = vmatpush3.bf16.msra.mxu1 %v8534_v18 }
  0x20   :  { %7811 = vmatprep.subr.bf16.mxu0 %v8410_v16  ;;  %7817 = vmatprep.subr.bf16.mxu1 %v8410_v16 }
  0xd8   :  { %v7083_v34 = vpop.f32.mrb[0].mxu0  ;;  %v7088_v35 = vpop.f32.mrb[0].mxu1 }
  0xd9   :  { %v8612_v36 = vadd.f32 %v7083_v34, %v6584_v32  ;;  %v8614_v37 = vadd.f32 %v7088_v35, %v6590_v33  ;;  %v117_v38 = vpop.f32.mrb[1].mxu0  ;;  %v205_v39 = vpop.f32.mrb[1].mxu1 }
  0xda   :  { %v8626_v48 = vadd.f32 %v6584_v32, %v117_v38  ;;  %v8628_v49 = vadd.f32 %v6590_v33, %v205_v39 }
  0xdc   :  { %v7093_v42 = vpop.f32.mrb[2].mxu0  ;;  %v7098_v43 = vpop.f32.mrb[2].mxu1 }
  0xdd   :  { %v8622_v44 = vadd.f32 %v7093_v42, %v6596_v40  ;;  %v8624_v45 = vadd.f32 %v7098_v43, %v6602_v41  ;;  %v293_v46 = vpop.f32.mrb[3].mxu0  ;;  %v381_v47 = vpop.f32.mrb[3].mxu1 }
  0xde   :  { %v8632_v58 = vadd.f32 %v6602_v41, %v381_v47  ;;  %v8635_v0 = vadd.f32 %v6596_v40, %v293_v46 }
  0xe5   :  { %v479_v50 = vpop.f32.mrb[4].mxu0  ;;  %v556_v51 = vpop.f32.mrb[4].mxu1 }
  0xe6   :  { %v483_v52 = vadd.f32 %v479_v50, %v8626_v48  ;;  %v560_v53 = vadd.f32 %v556_v51, %v8628_v49  ;;  %v7109_v54 = vpop.f32.mrb[5].mxu0  ;;  %v7120_v55 = vpop.f32.mrb[5].mxu1 }
  0xe8   :  { %v6618_v56 = vmul.f32 -1.442695, %v483_v52  ;;  %v6619_v57 = vmul.f32 -1.442695, %v560_v53 }
  0xea   :  { %8130 = vpow2.f32 %v6618_v56 }
  0xeb   :  { %8132 = vpow2.f32 %v6619_v57 }
  0xed   :  { %v633_v59 = vpop.f32.mrb[6].mxu0  ;;  %v705_v60 = vpop.f32.mrb[6].mxu1 }
  0xee   :  { %v709_v61 = vadd.f32 %v705_v60, %v8632_v58  ;;  %v7131_v62 = vpop.f32.mrb[7].mxu0  ;;  %v7142_v63 = vpop.f32.mrb[7].mxu1  ;;  %v637_v2 = vadd.f32 %v633_v59, %v8635_v0 }
  0xf0   :  { %v6620_v1 = vmul.f32 -1.442695, %v709_v61 }
  0xf2   :  { %8134 = vpow2.f32 %v6620_v1 }
  0xf3   :  { %8136 = vtanh.f32 %v637_v2 }
  0xf4   :  { %v8131_v3 = vpop.eup %8130 }
  0xf5   :  { %v8133_v4 = vpop.eup %8132  ;;  %v487_v5 = vadd.f32 1.0, %v8131_v3 }
  0xf6   :  { %v564_v6 = vadd.f32 1.0, %v8133_v4 }
  0xf7   :  { %8138 = vrcp.f32 %v487_v5 }
  0xf8   :  { %8140 = vrcp.f32 %v564_v6 }
  0xfc   :  { %v8135_v7 = vpop.eup %8134 }
  0xfd   :  { %v8137_v8 = vpop.eup %8136  ;;  %v713_v14 = vadd.f32 1.0, %v8135_v7 }
  0xff   :  { %8142 = vrcp.f32 %v713_v14 }
 0x101   :  { %v8139_v9 = vpop.eup %8138 }
 0x102   :  { %v8141_v12 = vpop.eup %8140  ;;  %v717_v13 = vmul.f32 %v8139_v9, %v8137_v8 }
 0x103   :  { %v716_v15 = vmul.f32 0.0, %v8141_v12 }
 0x105   :  { %v8638_v19 = vadd.f32 %v717_v13, %v716_v15 }
 0x107   :  { %8144 = vtanh.f32 %v8638_v19  ;;  %v1042_v61 = vrot.slane %v8638_v19, 6 }
 0x109   :  { %v8143_v20 = vpop.eup %8142 }
 0x111   :  { %v8145_v21 = vpop.eup %8144 }
 0x112   :  { %v720_v22 = vmul.f32 %v8145_v21, %v8143_v20 }
 0x114   :  { %722 = vst.msk [vmem:[#allocation2] sm:$0x3] %vm721_vm4, %v720_v22  ;;  %7152 = vmatmul.mubr.msk.f32.vlgmr.msra.gmra.mrb[8].mxu0 %vm409_vm3, %v720_v22  ;;  %7163 = vmatmul.mubr.msk.f32.vlgmr.msra.gmra.mrb[8].mxu1 %vm409_vm3, %v720_v22 }
 0x115   :  { %7813 = vmatpush3.bf16.msra.mxu0 %v8556_v24  ;;  %7819 = vmatpush3.bf16.msra.mxu1 %v8558_v25 }
 0x116   :  { %7814 = vmatprep.subr.bf16.mxu0 %v8410_v16  ;;  %7820 = vmatprep.subr.bf16.mxu1 %v8410_v16 }
 0x117   :  { %7173 = vmatprep.mubr.msk.f32.mxu0 %vm8411_vm2, %v8412_v23  ;;  %7184 = vmatprep.mubr.msk.f32.mxu1 %vm8411_vm2, %v8412_v23 }
 0x119   :  { %7816 = vmatpush3.bf16.msra.mxu0 %v8578_v30  ;;  %7822 = vmatpush3.bf16.msra.mxu1 %v8580_v31 }
 0x11a   :  { %7823 = vmatprep.subr.bf16.mxu0 %v8410_v16  ;;  %7829 = vmatprep.subr.bf16.mxu1 %v8410_v16 }
 0x11c   :  { %7174 = vmatmul.mubr.msk.f32.vlgmr.msra.gmra.mrb[10].mxu0 %vm409_vm3, %v720_v22  ;;  %7185 = vmatmul.mubr.msk.f32.vlgmr.msra.gmra.mrb[10].mxu1 %vm409_vm3, %v720_v22 }
 0x11d   :  { %7825 = vmatpush3.bf16.msra.mxu0 %v8508_v10  ;;  %7831 = vmatpush3.bf16.msra.mxu1 %v8510_v11 }
 0x11e   :  { %7826 = vmatprep.subr.bf16.mxu0 %v8410_v16  ;;  %7832 = vmatprep.subr.bf16.mxu1 %v8410_v16 }
 0x11f   :  { %7195 = vmatprep.mubr.msk.f32.mxu0 %vm8411_vm2, %v8412_v23  ;;  %7206 = vmatprep.mubr.msk.f32.mxu1 %vm8411_vm2, %v8412_v23 }
 0x121   :  { %7828 = vmatpush3.bf16.msra.mxu0 %v8532_v17  ;;  %7834 = vmatpush3.bf16.msra.mxu1 %v8534_v18 }
 0x122   :  { %7835 = vmatprep.subr.bf16.mxu0 %v8410_v16  ;;  %7841 = vmatprep.subr.bf16.mxu1 %v8410_v16 }
 0x1e7   :  { %v792_v26 = vpop.f32.mrb[8].mxu0  ;;  %v872_v27 = vpop.f32.mrb[8].mxu1 }
 0x1e8   :  { %v797_v28 = vrot.slane %v792_v26, 6  ;;  %v877_v29 = vrot.slane %v872_v27, 6  ;;  %v7153_v32 = vpop.f32.mrb[9].mxu0  ;;  %v7164_v33 = vpop.f32.mrb[9].mxu1 }
 0x1ea   :  { %v799_v34 = vadd.f32 %v797_v28, %v8626_v48  ;;  %v879_v35 = vadd.f32 %v877_v29, %v8628_v49 }
 0x1ec   :  { %v6622_v38 = vmul.f32 -1.442695, %v799_v34  ;;  %v6624_v39 = vmul.f32 -1.442695, %v879_v35 }
 0x1ee   :  { %8146 = vpow2.f32 %v6622_v38 }
 0x1ef   :  { %8148 = vpow2.f32 %v6624_v39  ;;  %v952_v40 = vpop.f32.mrb[10].mxu0  ;;  %v1027_v41 = vpop.f32.mrb[10].mxu1 }
 0x1f0   :  { %v1032_v42 = vrot.slane %v1027_v41, 6  ;;  %v7175_v43 = vpop.f32.mrb[11].mxu0  ;;  %v7186_v46 = vpop.f32.mrb[11].mxu1  ;;  %v957_v47 = vrot.slane %v952_v40, 6 }
 0x1f2   :  { %v1034_v50 = vadd.f32 %v1032_v42, %v8632_v58  ;;  %v959_v52 = vadd.f32 %v957_v47, %v8635_v0 }
 0x1f4   :  { %v6627_v51 = vmul.f32 -1.442695, %v1034_v50 }
 0x1f6   :  { %8150 = vpow2.f32 %v6627_v51 }
 0x1f7   :  { %8152 = vtanh.f32 %v959_v52 }
 0x1f8   :  { %v8147_v53 = vpop.eup %8146 }
 0x1f9   :  { %v8149_v54 = vpop.eup %8148  ;;  %v803_v55 = vadd.f32 1.0, %v8147_v53 }
 0x1fa   :  { %v883_v56 = vadd.f32 1.0, %v8149_v54 }
 0x1fb   :  { %8154 = vrcp.f32 %v803_v55 }
 0x1fc   :  { %8156 = vrcp.f32 %v883_v56 }
 0x200   :  { %v8151_v57 = vpop.eup %8150 }
 0x201   :  { %v8153_v59 = vpop.eup %8152  ;;  %v1038_v1 = vadd.f32 1.0, %v8151_v57 }
 0x203   :  { %8158 = vrcp.f32 %v1038_v1 }
 0x205   :  { %v8155_v60 = vpop.eup %8154 }
 0x206   :  { %v8157_v62 = vpop.eup %8156  ;;  %v1045_v63 = vmul.f32 %v8155_v60, %v8153_v59 }
 0x207   :  { %v1044_v2 = vmul.f32 %v8157_v62, %v1042_v61 }
 0x209   :  { %v8675_v3 = vadd.f32 %v1045_v63, %v1044_v2 }
 0x20b   :  { %8160 = vtanh.f32 %v8675_v3  ;;  %v1371_v50 = vrot.slane %v8675_v3, 6 }
 0x20d   :  { %v8159_v4 = vpop.eup %8158 }
 0x215   :  { %v8161_v5 = vpop.eup %8160 }
 0x216   :  { %v1048_v6 = vmul.f32 %v8161_v5, %v8159_v4 }
 0x218   :  { %1050 = vst.msk [vmem:[#allocation2] sm:$0xc] %vm1049_vm5, %v1048_v6  ;;  %v1052_v7 = vrot.slane %v1048_v6, 2 }
 0x21a   :  { %7196 = vmatmul.mubr.msk.f32.vlgmr.msra.gmra.mrb[12].mxu0 %vm409_vm3, %v1052_v7  ;;  %7207 = vmatmul.mubr.msk.f32.vlgmr.msra.gmra.mrb[12].mxu1 %vm409_vm3, %v1052_v7 }
 0x21b   :  { %7837 = vmatpush3.bf16.msra.mxu0 %v8556_v24  ;;  %7843 = vmatpush3.bf16.msra.mxu1 %v8558_v25 }
 0x21c   :  { %7838 = vmatprep.subr.bf16.mxu0 %v8410_v16  ;;  %7844 = vmatprep.subr.bf16.mxu1 %v8410_v16 }
 0x21d   :  { %7217 = vmatprep.mubr.msk.f32.mxu0 %vm8411_vm2, %v8412_v23  ;;  %7228 = vmatprep.mubr.msk.f32.mxu1 %vm8411_vm2, %v8412_v23 }
 0x21f   :  { %7840 = vmatpush3.bf16.msra.mxu0 %v8578_v30  ;;  %7846 = vmatpush3.bf16.msra.mxu1 %v8580_v31 }
 0x220   :  { %7847 = vmatprep.subr.bf16.mxu0 %v8410_v16  ;;  %7853 = vmatprep.subr.bf16.mxu1 %v8410_v16 }
 0x222   :  { %7218 = vmatmul.mubr.msk.f32.vlgmr.msra.gmra.mrb[14].mxu0 %vm409_vm3, %v1052_v7  ;;  %7229 = vmatmul.mubr.msk.f32.vlgmr.msra.gmra.mrb[14].mxu1 %vm409_vm3, %v1052_v7 }
 0x223   :  { %7849 = vmatpush3.bf16.msra.mxu0 %v8508_v10  ;;  %7855 = vmatpush3.bf16.msra.mxu1 %v8510_v11 }
 0x224   :  { %7850 = vmatprep.subr.bf16.mxu0 %v8410_v16  ;;  %7856 = vmatprep.subr.bf16.mxu1 %v8410_v16 }
 0x225   :  { %7239 = vmatprep.mubr.msk.f32.mxu0 %vm8411_vm2, %v8412_v23  ;;  %7250 = vmatprep.mubr.msk.f32.mxu1 %vm8411_vm2, %v8412_v23 }
 0x227   :  { %7852 = vmatpush3.bf16.msra.mxu0 %v8532_v17  ;;  %7858 = vmatpush3.bf16.msra.mxu1 %v8534_v18 }
 0x228   :  { %7859 = vmatprep.subr.bf16.mxu0 %v8410_v16  ;;  %7865 = vmatprep.subr.bf16.mxu1 %v8410_v16 }
 0x2ed   :  { %v1121_v8 = vpop.f32.mrb[12].mxu0  ;;  %v1201_v9 = vpop.f32.mrb[12].mxu1 }
 0x2ee   :  { %v1126_v12 = vrot.slane %v1121_v8, 4  ;;  %v1206_v13 = vrot.slane %v1201_v9, 4  ;;  %v7197_v14 = vpop.f32.mrb[13].mxu0  ;;  %v7208_v15 = vpop.f32.mrb[13].mxu1 }
 0x2f0   :  { %v1128_v19 = vadd.f32 %v1126_v12, %v8626_v48  ;;  %v1208_v20 = vadd.f32 %v1206_v13, %v8628_v49 }
 0x2f2   :  { %v6629_v21 = vmul.f32 -1.442695, %v1128_v19  ;;  %v6631_v22 = vmul.f32 -1.442695, %v1208_v20 }
 0x2f4   :  { %8162 = vpow2.f32 %v6629_v21 }
 0x2f5   :  { %8164 = vpow2.f32 %v6631_v22  ;;  %v1281_v26 = vpop.f32.mrb[14].mxu0  ;;  %v1356_v27 = vpop.f32.mrb[14].mxu1 }
 0x2f6   :  { %v1361_v28 = vrot.slane %v1356_v27, 4  ;;  %v7219_v29 = vpop.f32.mrb[15].mxu0  ;;  %v7230_v32 = vpop.f32.mrb[15].mxu1  ;;  %v1286_v33 = vrot.slane %v1281_v26, 4 }
 0x2f8   :  { %v1363_v34 = vadd.f32 %v1361_v28, %v8632_v58  ;;  %v1288_v38 = vadd.f32 %v1286_v33, %v8635_v0 }
 0x2fa   :  { %v6634_v35 = vmul.f32 -1.442695, %v1363_v34 }
 0x2fc   :  { %8166 = vpow2.f32 %v6634_v35 }
 0x2fd   :  { %8168 = vtanh.f32 %v1288_v38 }
 0x2fe   :  { %v8163_v39 = vpop.eup %8162 }
 0x2ff   :  { %v8165_v40 = vpop.eup %8164  ;;  %v1132_v41 = vadd.f32 1.0, %v8163_v39 }
 0x300   :  { %v1212_v42 = vadd.f32 1.0, %v8165_v40 }
 0x301   :  { %8170 = vrcp.f32 %v1132_v41 }
 0x302   :  { %8172 = vrcp.f32 %v1212_v42 }
 0x306   :  { %v8167_v43 = vpop.eup %8166 }
 0x307   :  { %v8169_v46 = vpop.eup %8168  ;;  %v1367_v53 = vadd.f32 1.0, %v8167_v43 }
 0x309   :  { %8174 = vrcp.f32 %v1367_v53 }
 0x30b   :  { %v8171_v47 = vpop.eup %8170 }
 0x30c   :  { %v8173_v51 = vpop.eup %8172  ;;  %v1374_v52 = vmul.f32 %v8171_v47, %v8169_v46 }
 0x30d   :  { %v1373_v54 = vmul.f32 %v8173_v51, %v1371_v50 }
 0x30f   :  { %v8712_v55 = vadd.f32 %v1374_v52, %v1373_v54 }
 0x311   :  { %8176 = vtanh.f32 %v8712_v55  ;;  %v1700_v32 = vrot.slane %v8712_v55, 6 }
 0x313   :  { %v8175_v56 = vpop.eup %8174 }
 0x31b   :  { %v8177_v57 = vpop.eup %8176 }
 0x31c   :  { %v1377_v59 = vmul.f32 %v8177_v57, %v8175_v56 }
 0x31e   :  { %1379 = vst.msk [vmem:[#allocation2] sm:$0x30] %vm1378_vm6, %v1377_v59  ;;  %v1381_v60 = vrot.slane %v1377_v59, 4 }
 0x320   :  { %7240 = vmatmul.mubr.msk.f32.vlgmr.msra.gmra.mrb[16].mxu0 %vm409_vm3, %v1381_v60  ;;  %7251 = vmatmul.mubr.msk.f32.vlgmr.msra.gmra.mrb[16].mxu1 %vm409_vm3, %v1381_v60 }
 0x321   :  { %7861 = vmatpush3.bf16.msra.mxu0 %v8556_v24  ;;  %7867 = vmatpush3.bf16.msra.mxu1 %v8558_v25 }
 0x322   :  { %7862 = vmatprep.subr.bf16.mxu0 %v8410_v16  ;;  %7868 = vmatprep.subr.bf16.mxu1 %v8410_v16 }
 0x323   :  { %7261 = vmatprep.mubr.msk.f32.mxu0 %vm8411_vm2, %v8412_v23  ;;  %7272 = vmatprep.mubr.msk.f32.mxu1 %vm8411_vm2, %v8412_v23 }
 0x325   :  { %7864 = vmatpush3.bf16.msra.mxu0 %v8578_v30  ;;  %7870 = vmatpush3.bf16.msra.mxu1 %v8580_v31 }
 0x326   :  { %7871 = vmatprep.subr.bf16.mxu0 %v8410_v16  ;;  %7877 = vmatprep.subr.bf16.mxu1 %v8410_v16 }
 0x328   :  { %7262 = vmatmul.mubr.msk.f32.vlgmr.msra.gmra.mrb[18].mxu0 %vm409_vm3, %v1381_v60  ;;  %7273 = vmatmul.mubr.msk.f32.vlgmr.msra.gmra.mrb[18].mxu1 %vm409_vm3, %v1381_v60 }
 0x329   :  { %7873 = vmatpush3.bf16.msra.mxu0 %v8508_v10  ;;  %7879 = vmatpush3.bf16.msra.mxu1 %v8510_v11 }
 0x32a   :  { %7874 = vmatprep.subr.bf16.mxu0 %v8410_v16  ;;  %7880 = vmatprep.subr.bf16.mxu1 %v8410_v16 }
 0x32b   :  { %7283 = vmatprep.mubr.msk.f32.mxu0 %vm8411_vm2, %v8412_v23  ;;  %7294 = vmatprep.mubr.msk.f32.mxu1 %vm8411_vm2, %v8412_v23 }
 0x32d   :  { %7876 = vmatpush3.bf16.msra.mxu0 %v8532_v17  ;;  %7882 = vmatpush3.bf16.msra.mxu1 %v8534_v18 }
 0x32e   :  { %7883 = vmatprep.subr.bf16.mxu0 %v8410_v16  ;;  %7889 = vmatprep.subr.bf16.mxu1 %v8410_v16 }
 0x3f3   :  { %v1450_v61 = vpop.f32.mrb[16].mxu0  ;;  %v1530_v62 = vpop.f32.mrb[16].mxu1 }
 0x3f4   :  { %v1455_v63 = vrot.slane %v1450_v61, 2  ;;  %v1535_v1 = vrot.slane %v1530_v62, 2  ;;  %v7241_v2 = vpop.f32.mrb[17].mxu0  ;;  %v7252_v3 = vpop.f32.mrb[17].mxu1 }
 0x3f6   :  { %v1457_v4 = vadd.f32 %v1455_v63, %v8626_v48  ;;  %v1537_v5 = vadd.f32 %v1535_v1, %v8628_v49 }
 0x3f8   :  { %v6636_v6 = vmul.f32 -1.442695, %v1457_v4  ;;  %v6638_v7 = vmul.f32 -1.442695, %v1537_v5 }
 0x3fa   :  { %8178 = vpow2.f32 %v6636_v6 }
 0x3fb   :  { %8180 = vpow2.f32 %v6638_v7  ;;  %v1610_v8 = vpop.f32.mrb[18].mxu0  ;;  %v1685_v9 = vpop.f32.mrb[18].mxu1 }
 0x3fc   :  { %v1690_v12 = vrot.slane %v1685_v9, 2  ;;  %v7263_v13 = vpop.f32.mrb[19].mxu0  ;;  %v7274_v14 = vpop.f32.mrb[19].mxu1  ;;  %v1615_v15 = vrot.slane %v1610_v8, 2 }
 0x3fe   :  { %v1692_v19 = vadd.f32 %v1690_v12, %v8632_v58  ;;  %v1617_v21 = vadd.f32 %v1615_v15, %v8635_v0 }
 0x400   :  { %v6641_v20 = vmul.f32 -1.442695, %v1692_v19 }
 0x402   :  { %8182 = vpow2.f32 %v6641_v20 }
 0x403   :  { %8184 = vtanh.f32 %v1617_v21 }
 0x404   :  { %v8179_v22 = vpop.eup %8178 }
 0x405   :  { %v8181_v26 = vpop.eup %8180  ;;  %v1461_v48 = vadd.f32 1.0, %v8179_v22 }
 0x406   :  { %v1541_v49 = vadd.f32 1.0, %v8181_v26 }
 0x407   :  { %8186 = vrcp.f32 %v1461_v48 }
 0x408   :  { %8188 = vrcp.f32 %v1541_v49 }
 0x40c   :  { %v8183_v27 = vpop.eup %8182 }
 0x40d   :  { %v8185_v28 = vpop.eup %8184  ;;  %v1696_v35 = vadd.f32 1.0, %v8183_v27 }
 0x40f   :  { %8190 = vrcp.f32 %v1696_v35 }
 0x411   :  { %v8187_v29 = vpop.eup %8186 }
 0x412   :  { %v8189_v33 = vpop.eup %8188  ;;  %v1703_v34 = vmul.f32 %v8187_v29, %v8185_v28 }
 0x413   :  { %v1702_v58 = vmul.f32 %v8189_v33, %v1700_v32 }
 0x415   :  { %v8749_v38 = vadd.f32 %v1703_v34, %v1702_v58 }
 0x417   :  { %8192 = vtanh.f32 %v8749_v38  ;;  %v2017_v6 = vrot.slane %v8749_v38, 6 }
 0x419   :  { %v8191_v0 = vpop.eup %8190 }
 0x421   :  { %v8193_v39 = vpop.eup %8192 }
 0x422   :  { %v1706_v40 = vmul.f32 %v8193_v39, %v8191_v0 }
 0x424   :  { %1708 = vst.msk [vmem:[#allocation2] sm:$0xc0] %vm1707_vm7, %v1706_v40  ;;  %v1710_v41 = vrot.slane %v1706_v40, 6 }
 0x426   :  { %7284 = vmatmul.mubr.msk.f32.vlgmr.msra.gmra.mrb[20].mxu0 %vm409_vm3, %v1710_v41  ;;  %7295 = vmatmul.mubr.msk.f32.vlgmr.msra.gmra.mrb[20].mxu1 %vm409_vm3, %v1710_v41 }
 0x427   :  { %7885 = vmatpush3.bf16.msra.mxu0 %v8556_v24  ;;  %7891 = vmatpush3.bf16.msra.mxu1 %v8558_v25 }
 0x428   :  { %7886 = vmatprep.subr.bf16.mxu0 %v8410_v16  ;;  %7892 = vmatprep.subr.bf16.mxu1 %v8410_v16 }
 0x429   :  { %7305 = vmatprep.mubr.msk.f32.mxu0 %vm8411_vm2, %v8412_v23  ;;  %7316 = vmatprep.mubr.msk.f32.mxu1 %vm8411_vm2, %v8412_v23 }
 0x42b   :  { %7888 = vmatpush3.bf16.msra.mxu0 %v8578_v30  ;;  %7894 = vmatpush3.bf16.msra.mxu1 %v8580_v31 }
 0x42c   :  { %7895 = vmatprep.subr.bf16.mxu0 %v8410_v16  ;;  %7901 = vmatprep.subr.bf16.mxu1 %v8410_v16 }
 0x42e   :  { %7306 = vmatmul.mubr.msk.f32.vlgmr.msra.gmra.mrb[22].mxu0 %vm409_vm3, %v1710_v41  ;;  %7317 = vmatmul.mubr.msk.f32.vlgmr.msra.gmra.mrb[22].mxu1 %vm409_vm3, %v1710_v41 }
 0x42f   :  { %7897 = vmatpush3.bf16.msra.mxu0 %v8508_v10  ;;  %7903 = vmatpush3.bf16.msra.mxu1 %v8510_v11 }
 0x430   :  { %7898 = vmatprep.subr.bf16.mxu0 %v8410_v16  ;;  %7904 = vmatprep.subr.bf16.mxu1 %v8410_v16 }
 0x431   :  { %7327 = vmatprep.mubr.msk.f32.mxu0 %vm8411_vm2, %v8412_v23  ;;  %7338 = vmatprep.mubr.msk.f32.mxu1 %vm8411_vm2, %v8412_v23 }
 0x433   :  { %7900 = vmatpush3.bf16.msra.mxu0 %v8532_v17  ;;  %7906 = vmatpush3.bf16.msra.mxu1 %v8534_v18 }
 0x434   :  { %7907 = vmatprep.subr.bf16.mxu0 %v8410_v16  ;;  %7913 = vmatprep.subr.bf16.mxu1 %v8410_v16 }
 0x4f9   :  { %v1779_v42 = vpop.f32.mrb[20].mxu0  ;;  %v1856_v43 = vpop.f32.mrb[20].mxu1 }
 0x4fa   :  { %v1783_v46 = vadd.f32 %v1779_v42, %v8612_v36  ;;  %v1860_v47 = vadd.f32 %v1856_v43, %v8614_v37  ;;  %v7285_v50 = vpop.f32.mrb[21].mxu0  ;;  %v7296_v51 = vpop.f32.mrb[21].mxu1 }
 0x4fc   :  { %v6643_v52 = vmul.f32 -1.442695, %v1783_v46  ;;  %v6645_v53 = vmul.f32 -1.442695, %v1860_v47 }
 0x4fe   :  { %8194 = vpow2.f32 %v6643_v52 }
 0x4ff   :  { %8196 = vpow2.f32 %v6645_v53 }
 0x501   :  { %v1933_v54 = vpop.f32.mrb[22].mxu0  ;;  %v2005_v55 = vpop.f32.mrb[22].mxu1 }
 0x502   :  { %v2009_v56 = vadd.f32 %v2005_v55, %v8624_v45  ;;  %v7307_v57 = vpop.f32.mrb[23].mxu0  ;;  %v7318_v59 = vpop.f32.mrb[23].mxu1  ;;  %v1937_v61 = vadd.f32 %v1933_v54, %v8622_v44 }
 0x504   :  { %v6648_v60 = vmul.f32 -1.442695, %v2009_v56 }
 0x506   :  { %8198 = vpow2.f32 %v6648_v60 }
 0x507   :  { %8200 = vtanh.f32 %v1937_v61 }
 0x508   :  { %v8195_v62 = vpop.eup %8194 }
 0x509   :  { %v8197_v63 = vpop.eup %8196  ;;  %v1787_v1 = vadd.f32 1.0, %v8195_v62 }
 0x50a   :  { %v1864_v2 = vadd.f32 1.0, %v8197_v63 }
 0x50b   :  { %8202 = vrcp.f32 %v1787_v1 }
 0x50c   :  { %8204 = vrcp.f32 %v1864_v2 }
 0x510   :  { %v8199_v3 = vpop.eup %8198 }
 0x511   :  { %v8201_v4 = vpop.eup %8200  ;;  %v2013_v9 = vadd.f32 1.0, %v8199_v3 }
 0x513   :  { %8206 = vrcp.f32 %v2013_v9 }
 0x515   :  { %v8203_v5 = vpop.eup %8202 }
 0x516   :  { %v8205_v7 = vpop.eup %8204  ;;  %v2020_v8 = vmul.f32 %v8203_v5, %v8201_v4 }
 0x517   :  { %v2019_v12 = vmul.f32 %v8205_v7, %v2017_v6 }
 0x519   :  { %v8786_v13 = vadd.f32 %v2020_v8, %v2019_v12 }
 0x51b   :  { %8208 = vtanh.f32 %v8786_v13  ;;  %v2344_v53 = vrot.slane %v8786_v13, 6 }
 0x51d   :  { %v8207_v14 = vpop.eup %8206 }
 0x525   :  { %v8209_v15 = vpop.eup %8208 }
 0x526   :  { %v2023_v19 = vmul.f32 %v8209_v15, %v8207_v14 }
 0x528   :  { %2024 = vst.msk [vmem:[#allocation2 + $0x8] sm:$0x3] %vm721_vm4, %v2023_v19  ;;  %7328 = vmatmul.mubr.msk.f32.vlgmr.msra.gmra.mrb[24].mxu0 %vm409_vm3, %v2023_v19  ;;  %7339 = vmatmul.mubr.msk.f32.vlgmr.msra.gmra.mrb[24].mxu1 %vm409_vm3, %v2023_v19 }
 0x529   :  { %7909 = vmatpush3.bf16.msra.mxu0 %v8556_v24  ;;  %7915 = vmatpush3.bf16.msra.mxu1 %v8558_v25 }
 0x52a   :  { %7910 = vmatprep.subr.bf16.mxu0 %v8410_v16  ;;  %7916 = vmatprep.subr.bf16.mxu1 %v8410_v16 }
 0x52b   :  { %7349 = vmatprep.mubr.msk.f32.mxu0 %vm8411_vm2, %v8412_v23  ;;  %7360 = vmatprep.mubr.msk.f32.mxu1 %vm8411_vm2, %v8412_v23 }
 0x52d   :  { %7912 = vmatpush3.bf16.msra.mxu0 %v8578_v30  ;;  %7918 = vmatpush3.bf16.msra.mxu1 %v8580_v31 }
 0x52e   :  { %7919 = vmatprep.subr.bf16.mxu0 %v8410_v16  ;;  %7925 = vmatprep.subr.bf16.mxu1 %v8410_v16 }
 0x530   :  { %7350 = vmatmul.mubr.msk.f32.vlgmr.msra.gmra.mrb[26].mxu0 %vm409_vm3, %v2023_v19  ;;  %7361 = vmatmul.mubr.msk.f32.vlgmr.msra.gmra.mrb[26].mxu1 %vm409_vm3, %v2023_v19 }
 0x531   :  { %7921 = vmatpush3.bf16.msra.mxu0 %v8508_v10  ;;  %7927 = vmatpush3.bf16.msra.mxu1 %v8510_v11 }
 0x532   :  { %7922 = vmatprep.subr.bf16.mxu0 %v8410_v16  ;;  %7928 = vmatprep.subr.bf16.mxu1 %v8410_v16 }
 0x533   :  { %7371 = vmatprep.mubr.msk.f32.mxu0 %vm8411_vm2, %v8412_v23  ;;  %7382 = vmatprep.mubr.msk.f32.mxu1 %vm8411_vm2, %v8412_v23 }
 0x535   :  { %7924 = vmatpush3.bf16.msra.mxu0 %v8532_v17  ;;  %7930 = vmatpush3.bf16.msra.mxu1 %v8534_v18 }
 0x536   :  { %7931 = vmatprep.subr.bf16.mxu0 %v8410_v16  ;;  %7937 = vmatprep.subr.bf16.mxu1 %v8410_v16 }
 0x5fb   :  { %v2094_v20 = vpop.f32.mrb[24].mxu0  ;;  %v2174_v21 = vpop.f32.mrb[24].mxu1 }
 0x5fc   :  { %v2099_v22 = vrot.slane %v2094_v20, 6  ;;  %v2179_v26 = vrot.slane %v2174_v21, 6  ;;  %v7329_v48 = vpop.f32.mrb[25].mxu0  ;;  %v7340_v49 = vpop.f32.mrb[25].mxu1 }
 0x5fe   :  { %v2101_v27 = vadd.f32 %v2099_v22, %v8612_v36  ;;  %v2181_v28 = vadd.f32 %v2179_v26, %v8614_v37 }
 0x600   :  { %v6650_v29 = vmul.f32 -1.442695, %v2101_v27  ;;  %v6652_v32 = vmul.f32 -1.442695, %v2181_v28 }
 0x602   :  { %8210 = vpow2.f32 %v6650_v29 }
 0x603   :  { %8212 = vpow2.f32 %v6652_v32  ;;  %v2254_v33 = vpop.f32.mrb[26].mxu0  ;;  %v2329_v34 = vpop.f32.mrb[26].mxu1 }
 0x604   :  { %v2334_v35 = vrot.slane %v2329_v34, 6  ;;  %v7351_v58 = vpop.f32.mrb[27].mxu0  ;;  %v7362_v38 = vpop.f32.mrb[27].mxu1  ;;  %v2259_v0 = vrot.slane %v2254_v33, 6 }
 0x606   :  { %v2336_v39 = vadd.f32 %v2334_v35, %v8624_v45  ;;  %v2261_v41 = vadd.f32 %v2259_v0, %v8622_v44 }
 0x608   :  { %v6655_v40 = vmul.f32 -1.442695, %v2336_v39 }
 0x60a   :  { %8214 = vpow2.f32 %v6655_v40 }
 0x60b   :  { %8216 = vtanh.f32 %v2261_v41 }
 0x60c   :  { %v8211_v42 = vpop.eup %8210 }
 0x60d   :  { %v8213_v43 = vpop.eup %8212  ;;  %v2105_v46 = vadd.f32 1.0, %v8211_v42  ;;  %v6674_v42 = vld [vmem:[%s9300_s4 + $0x28] sm:$0xff] }
 0x60e   :  { %v2185_v47 = vadd.f32 1.0, %v8213_v43 }
 0x60f   :  { %8218 = vrcp.f32 %v2105_v46  ;;  %v3012_v46 = vld [vmem:[%s9300_s4 + $0x10] sm:$0xff] }
 0x610   :  { %8220 = vrcp.f32 %v2185_v47  ;;  %v3013_v47 = vld [vmem:[%s9300_s4 + $0x18] sm:$0xff] }
 0x614   :  { %v8215_v50 = vpop.eup %8214 }
 0x615   :  { %v8217_v51 = vpop.eup %8216  ;;  %v2340_v56 = vadd.f32 1.0, %v8215_v50  ;;  %v6675_v50 = vld [vmem:[%s9300_s4 + $0x30] sm:$0xff] }
 0x617   :  { %8222 = vrcp.f32 %v2340_v56 }
 0x619   :  { %v8219_v52 = vpop.eup %8218 }
 0x61a   :  { %v8221_v54 = vpop.eup %8220  ;;  %v2347_v55 = vmul.f32 %v8219_v52, %v8217_v51  ;;  %v7971_v51 = vpack.c.bf16 %v3013_v47, %v3012_v46  ;;  %v6676_v52 = vld [vmem:[%s9300_s4 + $0x38] sm:$0xff]  ;;  %v6701_v46 = vld [vmem:[%s9301_s5 + $0x30] sm:$0xff] }
 0x61b   :  { %v2346_v57 = vmul.f32 %v8221_v54, %v2344_v53  ;;  %v6681_v53 = vld [vmem:[%s9300_s4 + $0x40] sm:$0xff]  ;;  %v6682_v54 = vld [vmem:[%s9300_s4 + $0x48] sm:$0xff]  ;;  %v6702_v47 = vld [vmem:[%s9301_s5 + $0x38] sm:$0xff] }
 0x61c   :  { %v8914_v56 = vpack.c.bf16 %v6682_v54, %v6681_v53  ;;  %v3378_v53 = vld [vmem:[%s9303_s7 + $0x8] sm:$0xff] }
 0x61d   :  { %v8823_v59 = vadd.f32 %v2347_v55, %v2346_v57  ;;  %v7979_v55 = vpack.c.bf16 %v6676_v52, %v6675_v50  ;;  %v6689_v57 = vld [vmem:[%s9300_s4 + $0x60] sm:$0xff] }
 0x61e   :  { %v3377_v52 = vld [vmem:[%s9303_s7] sm:$0xff] }
 0x61f   :  { %8224 = vtanh.f32 %v8823_v59  ;;  %v2672_v29 = vrot.slane %v8823_v59, 6  ;;  %v6690_v59 = vld [vmem:[%s9300_s4 + $0x68] sm:$0xff]  ;;  %v9016_v54 = vpack.c.bf16 %v3378_v53, %v3377_v52 }
 0x621   :  { %v8223_v60 = vpop.eup %8222 }
 0x629   :  { %v8225_v61 = vpop.eup %8224 }
 0x62a   :  { %v2350_v62 = vmul.f32 %v8225_v61, %v8223_v60  ;;  %v7991_v60 = vpack.c.bf16 %v6690_v59, %v6689_v57 }
 0x62c   :  { %2351 = vst.msk [vmem:[#allocation2 + $0x8] sm:$0xc] %vm1049_vm5, %v2350_v62  ;;  %v2353_v63 = vrot.slane %v2350_v62, 2 }
 0x62e   :  { %7372 = vmatmul.mubr.msk.f32.vlgmr.msra.gmra.mrb[28].mxu0 %vm409_vm3, %v2353_v63  ;;  %7383 = vmatmul.mubr.msk.f32.vlgmr.msra.gmra.mrb[28].mxu1 %vm409_vm3, %v2353_v63 }
 0x62f   :  { %7933 = vmatpush3.bf16.msra.mxu0 %v8556_v24  ;;  %7939 = vmatpush3.bf16.msra.mxu1 %v8558_v25 }
 0x630   :  { %7934 = vmatprep.subr.bf16.mxu0 %v8410_v16  ;;  %7940 = vmatprep.subr.bf16.mxu1 %v8410_v16 }
 0x631   :  { %7393 = vmatprep.mubr.msk.f32.mxu0 %vm8411_vm2, %v8412_v23  ;;  %7404 = vmatprep.mubr.msk.f32.mxu1 %vm8411_vm2, %v8412_v23 }
 0x633   :  { %7936 = vmatpush3.bf16.msra.mxu0 %v8578_v30  ;;  %7942 = vmatpush3.bf16.msra.mxu1 %v8580_v31 }
 0x634   :  { %7943 = vmatprep.subr.bf16.mxu0 %v8410_v16  ;;  %7949 = vmatprep.subr.bf16.mxu1 %v8410_v16 }
 0x636   :  { %7394 = vmatmul.mubr.msk.f32.vlgmr.msra.gmra.mrb[30].mxu0 %vm409_vm3, %v2353_v63  ;;  %7405 = vmatmul.mubr.msk.f32.vlgmr.msra.gmra.mrb[30].mxu1 %vm409_vm3, %v2353_v63 }
 0x637   :  { %7945 = vmatpush3.bf16.msra.mxu0 %v8508_v10  ;;  %7951 = vmatpush3.bf16.msra.mxu1 %v8510_v11 }
 0x638   :  { %7946 = vmatprep.subr.bf16.mxu0 %v8410_v16  ;;  %7952 = vmatprep.subr.bf16.mxu1 %v8410_v16 }
 0x639   :  { %7415 = vmatprep.mubr.msk.f32.mxu0 %vm8411_vm2, %v8412_v23  ;;  %7426 = vmatprep.mubr.msk.f32.mxu1 %vm8411_vm2, %v8412_v23 }
 0x63b   :  { %7948 = vmatpush3.bf16.msra.mxu0 %v8532_v17  ;;  %7954 = vmatpush3.bf16.msra.mxu1 %v8534_v18 }
 0x63c   :  { %7955 = vmatprep.subr.bf16.mxu0 %v8410_v16  ;;  %7961 = vmatprep.subr.bf16.mxu1 %v8410_v16 }
 0x701   :  { %v2422_v10 = vpop.f32.mrb[28].mxu0  ;;  %v2502_v11 = vpop.f32.mrb[28].mxu1 }
 0x702   :  { %v2427_v1 = vrot.slane %v2422_v10, 4  ;;  %v2507_v2 = vrot.slane %v2502_v11, 4  ;;  %v7373_v3 = vpop.f32.mrb[29].mxu0  ;;  %v7384_v4 = vpop.f32.mrb[29].mxu1 }
 0x704   :  { %v2429_v5 = vadd.f32 %v2427_v1, %v8612_v36  ;;  %v2509_v6 = vadd.f32 %v2507_v2, %v8614_v37 }
 0x706   :  { %v6657_v7 = vmul.f32 -1.442695, %v2429_v5  ;;  %v6659_v8 = vmul.f32 -1.442695, %v2509_v6 }
 0x708   :  { %8226 = vpow2.f32 %v6657_v7 }
 0x709   :  { %8228 = vpow2.f32 %v6659_v8  ;;  %v2582_v17 = vpop.f32.mrb[30].mxu0  ;;  %v2657_v18 = vpop.f32.mrb[30].mxu1 }
 0x70a   :  { %v2662_v9 = vrot.slane %v2657_v18, 4  ;;  %v7395_v12 = vpop.f32.mrb[31].mxu0  ;;  %v7406_v13 = vpop.f32.mrb[31].mxu1  ;;  %v2587_v14 = vrot.slane %v2582_v17, 4 }
 0x70c   :  { %v2664_v15 = vadd.f32 %v2662_v9, %v8624_v45  ;;  %v2589_v20 = vadd.f32 %v2587_v14, %v8622_v44 }
 0x70e   :  { %v6662_v19 = vmul.f32 -1.442695, %v2664_v15 }
 0x710   :  { %8230 = vpow2.f32 %v6662_v19 }
 0x711   :  { %8232 = vtanh.f32 %v2589_v20 }
 0x712   :  { %v8227_v21 = vpop.eup %8226 }
 0x713   :  { %v8229_v22 = vpop.eup %8228  ;;  %v2433_v26 = vadd.f32 1.0, %v8227_v21 }
 0x714   :  { %v2513_v48 = vadd.f32 1.0, %v8229_v22 }
 0x715   :  { %8234 = vrcp.f32 %v2433_v26 }
 0x716   :  { %8236 = vrcp.f32 %v2513_v48 }
 0x71a   :  { %v8231_v49 = vpop.eup %8230 }
 0x71b   :  { %v8233_v27 = vpop.eup %8232  ;;  %v2668_v34 = vadd.f32 1.0, %v8231_v49 }
 0x71d   :  { %8238 = vrcp.f32 %v2668_v34  ;;  %v6684_v34 = vld [vmem:[%s9300_s4 + $0x58] sm:$0xff] }
 0x71f   :  { %v8235_v28 = vpop.eup %8234 }
 0x720   :  { %v8237_v32 = vpop.eup %8236  ;;  %v2675_v33 = vmul.f32 %v8235_v28, %v8233_v27 }
 0x721   :  { %v2674_v35 = vmul.f32 %v8237_v32, %v2672_v29 }
 0x723   :  { %v8860_v58 = vadd.f32 %v2675_v33, %v2674_v35  ;;  %v6683_v33 = vld [vmem:[%s9300_s4 + $0x50] sm:$0xff] }
 0x724   :  { %v6691_v35 = vld [vmem:[%s9300_s4 + $0x70] sm:$0xff] }
 0x725   :  { %8240 = vtanh.f32 %v8860_v58  ;;  %v3000_v26 = vrot.slane %v8860_v58, 6  ;;  %v6692_v58 = vld [vmem:[%s9300_s4 + $0x78] sm:$0xff] }
 0x727   :  { %v8239_v38 = vpop.eup %8238 }
 0x72f   :  { %v8241_v0 = vpop.eup %8240 }
 0x730   :  { %v2678_v39 = vmul.f32 %v8241_v0, %v8239_v38  ;;  %v7987_v0 = vpack.c.bf16 %v6684_v34, %v6683_v33 }
 0x732   :  { %2679 = vst.msk [vmem:[#allocation2 + $0x8] sm:$0x30] %vm1378_vm6, %v2678_v39  ;;  %v2681_v40 = vrot.slane %v2678_v39, 4  ;;  %v7995_v39 = vpack.c.bf16 %v6692_v58, %v6691_v35 }
 0x734   :  { %7416 = vmatmul.mubr.msk.f32.vlgmr.msra.gmra.mrb[32].mxu0 %vm409_vm3, %v2681_v40  ;;  %7427 = vmatmul.mubr.msk.f32.vlgmr.msra.gmra.mrb[32].mxu1 %vm409_vm3, %v2681_v40 }
 0x735   :  { %7957 = vmatpush3.bf16.msra.mxu0 %v8556_v24  ;;  %7963 = vmatpush3.bf16.msra.mxu1 %v8558_v25  ;;  %v8878_v24 = vld [vmem:[#allocation2] sm:$0xff]  ;;  %v3010_v25 = vld [vmem:[%s9300_s4] sm:$0xff] }
 0x736   :  { %7958 = vmatprep.subr.bf16.mxu0 %v8410_v16  ;;  %7964 = vmatprep.subr.bf16.mxu1 %v8410_v16 }
 0x737   :  { %7437 = vmatprep.mubr.msk.f32.mxu0 %vm8411_vm2, %v8412_v23  ;;  %7448 = vmatprep.mubr.msk.f32.mxu1 %vm8411_vm2, %v8412_v23 }
 0x739   :  { %7960 = vmatpush3.bf16.msra.mxu0 %v8578_v30  ;;  %7966 = vmatpush3.bf16.msra.mxu1 %v8580_v31  ;;  %v3011_v30 = vld [vmem:[%s9300_s4 + $0x8] sm:$0xff]  ;;  %v6673_v31 = vld [vmem:[%s9300_s4 + $0x20] sm:$0xff]  ;;  %s8417_s4 = smov 20  }
 0x73a   :  { %v7967_v41 = vpack.c.bf16 %v3011_v30, %v3010_v25  ;;  %v7975_v43 = vpack.c.bf16 %v6674_v42, %v6673_v31  ;;  %v3367_v25 = vld [vmem:[%s9301_s5 + $0x8] sm:$0xff]  ;;  %v6697_v30 = vld [vmem:[%s9301_s5 + $0x10] sm:$0xff]  ;;  %v6698_v31 = vld [vmem:[%s9301_s5 + $0x18] sm:$0xff] }
 0x73b   :  { %v8962_v42 = vpack.c.bf16 %v6698_v31, %v6697_v30 }
 0x73c   :  { %7438 = vmatmul.mubr.msk.f32.vlgmr.msra.gmra.mrb[34].mxu0 %vm409_vm3, %v2681_v40  ;;  %7449 = vmatmul.mubr.msk.f32.vlgmr.msra.gmra.mrb[34].mxu1 %vm409_vm3, %v2681_v40  ;;  %v3366_v40 = vld [vmem:[%s9301_s5] sm:$0xff] }
 0x73d   :  { %7459 = vmatprep.mubr.msk.f32.mxu0 %vm409_vm3, %v8878_v24  ;;  %7470 = vmatprep.mubr.msk.f32.mxu1 %vm409_vm3, %v8878_v24 }
 0x73e   :  { %7968 = vmatprep.subr.bf16.mxu0 %v7967_v41  ;;  %7976 = vmatprep.subr.bf16.mxu1 %v7975_v43 }
 0x73f   :  { %7970 = vmatpush3.bf16.msra.mxu0 %v7967_v41  ;;  %7978 = vmatpush3.bf16.msra.mxu1 %v7975_v43  ;;  %v8960_v41 = vpack.c.bf16 %v3367_v25, %v3366_v40  ;;  %v6700_v43 = vld [vmem:[%s9301_s5 + $0x28] sm:$0xff] }
 0x740   :  { %7972 = vmatprep.subr.bf16.mxu0 %v7971_v51  ;;  %7980 = vmatprep.subr.bf16.mxu1 %v7979_v55 }
 0x743   :  { %7974 = vmatpush3.bf16.msra.mxu0 %v7971_v51  ;;  %7982 = vmatpush3.bf16.msra.mxu1 %v7979_v55  ;;  %v8984_v51 = vpack.c.bf16 %v6702_v47, %v6701_v46  ;;  %v6670_v55 = vld [vmem:[%s9302_s6] ss:$0 sm:$0xff] }
 0x744   :  { %7984 = vmatprep.subr.bf16.mxu0 %v8914_v56  ;;  %7992 = vmatprep.subr.bf16.mxu1 %v7991_v60 }
 0x807   :  { %v2750_v61 = vpop.f32.mrb[32].mxu0  ;;  %v2830_v62 = vpop.f32.mrb[32].mxu1 }
 0x808   :  { %v2755_v63 = vrot.slane %v2750_v61, 2  ;;  %v2835_v10 = vrot.slane %v2830_v62, 2  ;;  %v7417_v11 = vpop.f32.mrb[33].mxu0  ;;  %v7428_v1 = vpop.f32.mrb[33].mxu1 }
 0x809   :  { %v6694_v11 = vld [vmem:[%s9302_s6 + $0x3] ss:$0 sm:$0xff] }
 0x80a   :  { %v2757_v2 = vadd.f32 %v2755_v63, %v8612_v36  ;;  %v2837_v3 = vadd.f32 %v2835_v10, %v8614_v37  ;;  %v6686_v10 = vld [vmem:[%s9302_s6 + $0x2] ss:$0 sm:$0xff] }
 0x80c   :  { %v6664_v4 = vmul.f32 -1.442695, %v2757_v2  ;;  %v6666_v5 = vmul.f32 -1.442695, %v2837_v3 }
 0x80e   :  { %8242 = vpow2.f32 %v6664_v4 }
 0x80f   :  { %8244 = vpow2.f32 %v6666_v5  ;;  %v2910_v6 = vpop.f32.mrb[34].mxu0  ;;  %v2985_v7 = vpop.f32.mrb[34].mxu1 }
 0x810   :  { %v2990_v8 = vrot.slane %v2985_v7, 2  ;;  %v7439_v17 = vpop.f32.mrb[35].mxu0  ;;  %v7450_v18 = vpop.f32.mrb[35].mxu1  ;;  %v2915_v9 = vrot.slane %v2910_v6, 2 }
 0x812   :  { %v2992_v12 = vadd.f32 %v2990_v8, %v8624_v45  ;;  %v2917_v14 = vadd.f32 %v2915_v9, %v8622_v44 }
 0x814   :  { %v6669_v13 = vmul.f32 -1.442695, %v2992_v12 }
 0x816   :  { %8246 = vpow2.f32 %v6669_v13 }
 0x817   :  { %8248 = vtanh.f32 %v2917_v14 }
 0x818   :  { %v8243_v15 = vpop.eup %8242 }
 0x819   :  { %v8245_v19 = vpop.eup %8244  ;;  %v2761_v36 = vadd.f32 1.0, %v8243_v15 }
 0x81a   :  { %v2841_v37 = vadd.f32 1.0, %v8245_v19 }
 0x81b   :  { %8250 = vrcp.f32 %v2761_v36 }
 0x81c   :  { %8252 = vrcp.f32 %v2841_v37 }
 0x820   :  { %v8247_v20 = vpop.eup %8246 }
 0x821   :  { %v8249_v21 = vpop.eup %8248  ;;  %v2996_v27 = vadd.f32 1.0, %v8247_v20 }
 0x823   :  { %8254 = vrcp.f32 %v2996_v27 }
 0x825   :  { %v8251_v22 = vpop.eup %8250 }
 0x826   :  { %v8253_v48 = vpop.eup %8252  ;;  %v3003_v49 = vmul.f32 %v8251_v22, %v8249_v21 }
 0x827   :  { %v3002_v45 = vmul.f32 %v8253_v48, %v3000_v26 }
 0x829   :  { %v3004_v28 = vadd.f32 %v3003_v49, %v3002_v45 }
 0x82b   :  { %8256 = vtanh.f32 %v3004_v28 }
 0x82d   :  { %v8255_v44 = vpop.eup %8254 }
 0x835   :  { %v8257_v29 = vpop.eup %8256 }
 0x836   :  { %v3006_v32 = vmul.f32 %v8257_v29, %v8255_v44 }
 0x838   :  { %3007 = vst.msk [vmem:[#allocation2 + $0x8] sm:$0xc0] %vm1707_vm7, %v3006_v32 }
 0x83f   :  { %v3009_v38 = vld [vmem:[#allocation2 + $0x8] sm:$0xff] }
 0x840   :  { %7460 = vmatmul.mubr.msk.f32.vlgmr.msra.gmra.mrb[36].mxu0 %vm409_vm3, %v3009_v38  ;;  %7471 = vmatmul.mubr.msk.f32.vlgmr.msra.gmra.mrb[36].mxu1 %vm409_vm3, %v3009_v38 }
 0x841   :  { %7986 = vmatpush3.bf16.msra.mxu0 %v8914_v56  ;;  %7994 = vmatpush3.bf16.msra.mxu1 %v7991_v60  ;;  %v6678_v56 = vld [vmem:[%s9302_s6 + $0x1] ss:$0 sm:$0xff]  ;;  %s8413_s6 = smov 4  }
 0x842   :  { %7481 = vmatprep.mubr.msk.f32.mxu0 %vm409_vm3, %v8878_v24  ;;  %7492 = vmatprep.mubr.msk.f32.mxu1 %vm409_vm3, %v8878_v24  ;;  %v6699_v24 = vld [vmem:[%s9301_s5 + $0x20] sm:$0xff] }
 0x843   :  { %7988 = vmatprep.subr.bf16.mxu0 %v7987_v0  ;;  %7996 = vmatprep.subr.bf16.mxu1 %v7995_v39  ;;  %v8982_v50 = vpack.c.bf16 %v6700_v43, %v6699_v24 }
 0x845   :  { %7990 = vmatpush3.bf16.msra.mxu0 %v7987_v0  ;;  %7998 = vmatpush3.bf16.msra.mxu1 %v7995_v39 }
 0x846   :  { %7999 = vmatprep.subr.bf16.mxu0 %v8410_v16  ;;  %8002 = vmatprep.subr.bf16.mxu1 %v8410_v16 }
 0x848   :  { %7482 = vmatmul.mubr.msk.f32.vlgmr.msra.gmra.mrb[38].mxu0 %vm409_vm3, %v3009_v38  ;;  %7493 = vmatmul.mubr.msk.f32.vlgmr.msra.gmra.mrb[38].mxu1 %vm409_vm3, %v3009_v38 }
 0x849   :  { %8001 = vmatpush3.bf16.msra.mxu0 %v8960_v41  ;;  %8004 = vmatpush3.bf16.msra.mxu1 %v8962_v42 }
 0x84a   :  { %7499 = vmatprep.mubr.msk.f32.mxu0 %vm8411_vm2, %v8412_v23  ;;  %7506 = vmatprep.mubr.msk.f32.mxu1 %vm8411_vm2, %v8412_v23 }
 0x84b   :  { %8005 = vmatprep.subr.bf16.mxu0 %v8410_v16  ;;  %8008 = vmatprep.subr.bf16.mxu1 %v8410_v16 }
 0x84c   :  { %7500 = vmatmul.mubr.f32.vlgmr.msra.gmra.mrb[40].mxu0 %v8412_v23  ;;  %7507 = vmatmul.mubr.f32.vlgmr.msra.gmra.mrb[40].mxu1 %v8412_v23 }
 0x84d   :  { %8007 = vmatpush3.bf16.msra.mxu0 %v8982_v50  ;;  %8010 = vmatpush3.bf16.msra.mxu1 %v8984_v51 }
 0x84e   :  { %7513 = vmatprep.mubr.msk.f32.mxu0 %vm8411_vm2, %v8412_v23  ;;  %7520 = vmatprep.mubr.msk.f32.mxu1 %vm8411_vm2, %v8412_v23 }
 0x84f   :  { %8011 = vmatprep.subr.bf16.mxu0 %v8410_v16  ;;  %8014 = vmatprep.subr.bf16.mxu1 %v8410_v16 }
 0x850   :  { %7514 = vmatmul.mubr.f32.vlgmr.msra.gmra.mrb[42].mxu0 %v8412_v23  ;;  %7521 = vmatmul.mubr.f32.vlgmr.msra.gmra.mrb[42].mxu1 %v8412_v23 }
 0x851   :  { %8016 = vmatpush3.bf16.msra.mxu1 %v8960_v41  ;;  %7527 = vmatprep.mubr.msk.f32.mxu0 %vm8411_vm2, %v8412_v23 }
 0x852   :  { %7534 = vmatprep.mubr.msk.f32.mxu1 %vm8411_vm2, %v8412_v23  ;;  %8020 = vmatprep.subr.bf16.mxu1 %v8410_v16 }
 0x853   :  { %8013 = vmatpush3.bf16.msra.mxu0 %v9016_v54 }
 0x854   :  { %8017 = vmatprep.subr.bf16.mxu0 %v8410_v16 }
 0x913   :  { %v7461_v57 = vpop.f32.mrb[36].mxu0  ;;  %v7472_v59 = vpop.f32.mrb[36].mxu1 }
 0x914   :  { %v9026_v60 = vadd.f32 %v7461_v57, %v6670_v55  ;;  %v9028_v61 = vadd.f32 %v7472_v59, %v6678_v56  ;;  %v3093_v62 = vpop.f32.mrb[37].mxu0  ;;  %v3181_v63 = vpop.f32.mrb[37].mxu1 }
 0x915   :  { %v9040_v7 = vadd.f32 %v6670_v55, %v3093_v62  ;;  %v9042_v8 = vadd.f32 %v6678_v56, %v3181_v63 }
 0x91b   :  { %v7483_v1 = vpop.f32.mrb[38].mxu0  ;;  %v7494_v2 = vpop.f32.mrb[38].mxu1 }
 0x91c   :  { %v9036_v3 = vadd.f32 %v7483_v1, %v6686_v10  ;;  %v9038_v4 = vadd.f32 %v7494_v2, %v6694_v11  ;;  %v3269_v5 = vpop.f32.mrb[39].mxu0  ;;  %v3357_v6 = vpop.f32.mrb[39].mxu1 }
 0x91d   :  { %v9046_v22 = vadd.f32 %v6694_v11, %v3357_v6  ;;  %v9049_v48 = vadd.f32 %v6686_v10, %v3269_v5 }
 0x91f   :  { %v3448_v17 = vpop.f32.mrb[40].mxu0  ;;  %v3525_v18 = vpop.f32.mrb[40].mxu1 }
 0x920   :  { %v3452_v9 = vadd.f32 %v3448_v17, %v9040_v7  ;;  %v3529_v12 = vadd.f32 %v3525_v18, %v9042_v8  ;;  %v7501_v13 = vpop.f32.mrb[41].mxu0  ;;  %v7508_v14 = vpop.f32.mrb[41].mxu1 }
 0x922   :  { %v6703_v15 = vmul.f32 -1.442695, %v3452_v9  ;;  %v6704_v19 = vmul.f32 -1.442695, %v3529_v12 }
 0x923   :  { %v3602_v36 = vpop.f32.mrb[42].mxu0  ;;  %v3674_v37 = vpop.f32.mrb[42].mxu1 }
 0x924   :  { %8258 = vpow2.f32 %v6703_v15  ;;  %v7515_v20 = vpop.f32.mrb[43].mxu0  ;;  %v7522_v21 = vpop.f32.mrb[43].mxu1  ;;  %v3678_v26 = vadd.f32 %v3674_v37, %v9046_v22  ;;  %v3606_v27 = vadd.f32 %v3602_v36, %v9049_v48 }
 0x925   :  { %8260 = vpow2.f32 %v6704_v19 }
 0x926   :  { %v6705_v49 = vmul.f32 -1.442695, %v3678_v26 }
 0x928   :  { %8262 = vpow2.f32 %v6705_v49 }
 0x929   :  { %8264 = vtanh.f32 %v3606_v27 }
 0x92e   :  { %v8259_v45 = vpop.eup %8258 }
 0x92f   :  { %v8261_v28 = vpop.eup %8260  ;;  %v3456_v44 = vadd.f32 1.0, %v8259_v45 }
 0x930   :  { %v3533_v29 = vadd.f32 1.0, %v8261_v28 }
 0x931   :  { %8266 = vrcp.f32 %v3456_v44 }
 0x932   :  { %8268 = vrcp.f32 %v3533_v29  ;;  %v8263_v32 = vpop.eup %8262 }
 0x933   :  { %v8265_v33 = vpop.eup %8264  ;;  %v3682_v38 = vadd.f32 1.0, %v8263_v32 }
 0x935   :  { %8270 = vrcp.f32 %v3682_v38 }
 0x93b   :  { %v8267_v34 = vpop.eup %8266 }
 0x93c   :  { %v8269_v35 = vpop.eup %8268  ;;  %v3686_v58 = vmul.f32 %v8267_v34, %v8265_v33 }
 0x93d   :  { %v3685_v0 = vmul.f32 0.0, %v8269_v35 }
 0x93f   :  { %v9052_v39 = vadd.f32 %v3686_v58, %v3685_v0  ;;  %v8271_v40 = vpop.eup %8270 }
 0x941   :  { %8272 = vtanh.f32 %v9052_v39  ;;  %v4079_v20 = vrot.slane %v9052_v39, 6 }
 0x94b   :  { %v8273_v25 = vpop.eup %8272 }
 0x94c   :  { %v3689_v30 = vmul.f32 %v8273_v25, %v8271_v40 }
 0x94e   :  { %7528 = vmatmul.mubr.msk.f32.vlgmr.msra.gmra.mrb[44].mxu0 %vm3379_vm8, %v3689_v30  ;;  %7535 = vmatmul.mubr.msk.f32.vlgmr.msra.gmra.mrb[44].mxu1 %vm3379_vm8, %v3689_v30 }
 0x94f   :  { %8019 = vmatpush3.bf16.msra.mxu0 %v8962_v42  ;;  %8022 = vmatpush3.bf16.msra.mxu1 %v8982_v50 }
 0x950   :  { %7541 = vmatprep.mubr.msk.f32.mxu0 %vm8411_vm2, %v8412_v23  ;;  %7548 = vmatprep.mubr.msk.f32.mxu1 %vm8411_vm2, %v8412_v23 }
 0x951   :  { %8023 = vmatprep.subr.bf16.mxu0 %v8410_v16  ;;  %8026 = vmatprep.subr.bf16.mxu1 %v8410_v16 }
 0x952   :  { %7542 = vmatmul.mubr.msk.f32.vlgmr.msra.gmra.mrb[46].mxu0 %vm3379_vm8, %v3689_v30  ;;  %7549 = vmatmul.mubr.msk.f32.vlgmr.msra.gmra.mrb[46].mxu1 %vm3379_vm8, %v3689_v30 }
 0x953   :  { %8025 = vmatpush3.bf16.msra.mxu0 %v8984_v51  ;;  %7555 = vmatprep.mubr.msk.f32.mxu0 %vm8411_vm2, %v8412_v23 }
 0x954   :  { %8029 = vmatprep.subr.bf16.mxu0 %v8410_v16  ;;  %8028 = vmatpush3.bf16.msra.mxu1 %v9016_v54 }
 0x955   :  { %7562 = vmatprep.mubr.msk.f32.mxu1 %vm8411_vm2, %v8412_v23  ;;  %8032 = vmatprep.subr.bf16.mxu1 %v8410_v16 }
 0x956   :  { %7556 = vmatmul.mubr.msk.f32.vlgmr.msra.gmra.mrb[48].mxu0 %vm3379_vm8, %v3689_v30 }
 0x957   :  { %8031 = vmatpush3.bf16.msra.mxu0 %v8960_v41  ;;  %7569 = vmatprep.mubr.msk.f32.mxu0 %vm8411_vm2, %v8412_v23 }
 0x958   :  { %8035 = vmatprep.subr.bf16.mxu0 %v8410_v16 }
 0xa21   :  { %v9080_v31 = vpop.f32.mrb[44].mxu0  ;;  %v3829_v24 = vpop.f32.mrb[44].mxu1 }
 0xa22   :  { %v3834_v43 = vrot.slane %v3829_v24, 6  ;;  %v7529_v46 = vpop.f32.mrb[45].mxu0  ;;  %v7536_v47 = vpop.f32.mrb[45].mxu1 }
 0xa24   :  { %v3836_v52 = vadd.f32 %v3834_v43, %v9040_v7 }
 0xa25   :  { %v3909_v53 = vpop.f32.mrb[46].mxu0  ;;  %v3989_v55 = vpop.f32.mrb[46].mxu1 }
 0xa26   :  { %v6708_v56 = vmul.f32 -1.442695, %v3836_v52  ;;  %v3914_v57 = vrot.slane %v3909_v53, 6  ;;  %v7543_v59 = vpop.f32.mrb[47].mxu0  ;;  %v7550_v62 = vpop.f32.mrb[47].mxu1  ;;  %v3994_v5 = vrot.slane %v3989_v55, 6 }
 0xa28   :  { %8274 = vpow2.f32 %v6708_v56  ;;  %v3916_v63 = vadd.f32 %v3914_v57, %v9042_v8  ;;  %v3996_v17 = vadd.f32 %v3994_v5, %v9049_v48 }
 0xa29   :  { %v4064_v10 = vpop.f32.mrb[48].mxu0 }
 0xa2a   :  { %v6710_v11 = vmul.f32 -1.442695, %v3916_v63  ;;  %v4069_v1 = vrot.slane %v4064_v10, 6  ;;  %v7557_v2 = vpop.f32.mrb[49].mxu0 }
 0xa2c   :  { %8276 = vpow2.f32 %v6710_v11  ;;  %v4071_v6 = vadd.f32 %v4069_v1, %v9046_v22 }
 0xa2d   :  { %8278 = vtanh.f32 %v3996_v17 }
 0xa2e   :  { %v6713_v9 = vmul.f32 -1.442695, %v4071_v6 }
 0xa32   :  { %v8275_v18 = vpop.eup %8274 }
 0xa33   :  { %v3840_v12 = vadd.f32 1.0, %v8275_v18 }
 0xa35   :  { %8280 = vrcp.f32 %v3840_v12 }
 0xa36   :  { %v8277_v13 = vpop.eup %8276  ;;  %8282 = vpow2.f32 %v6713_v9 }
 0xa37   :  { %v3920_v14 = vadd.f32 1.0, %v8277_v13  ;;  %v8279_v15 = vpop.eup %8278 }
 0xa39   :  { %8284 = vrcp.f32 %v3920_v14 }
 0xa3f   :  { %v8281_v19 = vpop.eup %8280 }
 0xa40   :  { %v8283_v36 = vpop.eup %8282  ;;  %v4082_v37 = vmul.f32 %v8281_v19, %v8279_v15 }
 0xa41   :  { %v4075_v26 = vadd.f32 1.0, %v8283_v36 }
 0xa43   :  { %v8285_v21 = vpop.eup %8284  ;;  %8286 = vrcp.f32 %v4075_v26 }
 0xa44   :  { %v4081_v49 = vmul.f32 %v8285_v21, %v4079_v20 }
 0xa46   :  { %v9087_v27 = vadd.f32 %v4082_v37, %v4081_v49 }
 0xa48   :  { %8288 = vtanh.f32 %v9087_v27  ;;  %v4476_v17 = vrot.slane %v9087_v27, 6 }
 0xa4d   :  { %v8287_v45 = vpop.eup %8286 }
 0xa52   :  { %v8289_v28 = vpop.eup %8288 }
 0xa53   :  { %v4085_v44 = vmul.f32 %v8289_v28, %v8287_v45 }
 0xa55   :  { %v4087_v29 = vrot.slane %v4085_v44, 2 }
 0xa57   :  { %7563 = vmatmul.mubr.msk.f32.vlgmr.msra.gmra.mrb[48].mxu1 %vm3379_vm8, %v4087_v29  ;;  %7570 = vmatmul.mubr.msk.f32.vlgmr.msra.gmra.mrb[50].mxu0 %vm3379_vm8, %v4087_v29 }
 0xa58   :  { %8034 = vmatpush3.bf16.msra.mxu1 %v8962_v42  ;;  %8037 = vmatpush3.bf16.msra.mxu0 %v8982_v50 }
 0xa59   :  { %7576 = vmatprep.mubr.msk.f32.mxu1 %vm8411_vm2, %v8412_v23  ;;  %7583 = vmatprep.mubr.msk.f32.mxu0 %vm8411_vm2, %v8412_v23 }
 0xa5a   :  { %8038 = vmatprep.subr.bf16.mxu1 %v8410_v16  ;;  %8041 = vmatprep.subr.bf16.mxu0 %v8410_v16 }
 0xa5b   :  { %7577 = vmatmul.mubr.msk.f32.vlgmr.msra.gmra.mrb[50].mxu1 %vm3379_vm8, %v4087_v29  ;;  %7584 = vmatmul.mubr.msk.f32.vlgmr.msra.gmra.mrb[52].mxu0 %vm3379_vm8, %v4087_v29 }
 0xa5c   :  { %8040 = vmatpush3.bf16.msra.mxu1 %v8984_v51  ;;  %7590 = vmatprep.mubr.msk.f32.mxu1 %vm8411_vm2, %v8412_v23 }
 0xa5d   :  { %8044 = vmatprep.subr.bf16.mxu1 %v8410_v16  ;;  %8043 = vmatpush3.bf16.msra.mxu0 %v9016_v54 }
 0xa5e   :  { %7597 = vmatprep.mubr.msk.f32.mxu0 %vm8411_vm2, %v8412_v23  ;;  %8047 = vmatprep.subr.bf16.mxu0 %v8410_v16 }
 0xa5f   :  { %7591 = vmatmul.mubr.msk.f32.vlgmr.msra.gmra.mrb[52].mxu1 %vm3379_vm8, %v4087_v29 }
 0xa60   :  { %8046 = vmatpush3.bf16.msra.mxu1 %v8960_v41  ;;  %7604 = vmatprep.mubr.msk.f32.mxu1 %vm8411_vm2, %v8412_v23 }
 0xa61   :  { %8050 = vmatprep.subr.bf16.mxu1 %v8410_v16 }
 0xb2a   :  { %v4156_v32 = vpop.f32.mrb[48].mxu1  ;;  %v4226_v33 = vpop.f32.mrb[50].mxu0 }
 0xb2b   :  { %v4231_v34 = vrot.slane %v4226_v33, 4  ;;  %6530 = vrot.lane.b32.xlu0 %v4156_v32, %s8413_s6  ;;  %v7564_v35 = vpop.f32.mrb[49].mxu1  ;;  %v7571_v58 = vpop.f32.mrb[51].mxu0 }
 0xb2d   :  { %v4233_v38 = vadd.f32 %v4231_v34, %v9040_v7 }
 0xb2e   :  { %v4306_v0 = vpop.f32.mrb[50].mxu1  ;;  %v4386_v39 = vpop.f32.mrb[52].mxu0 }
 0xb2f   :  { %v6716_v40 = vmul.f32 -1.442695, %v4233_v38  ;;  %v4311_v25 = vrot.slane %v4306_v0, 4  ;;  %v7578_v30 = vpop.f32.mrb[51].mxu1  ;;  %v7585_v24 = vpop.f32.mrb[53].mxu0  ;;  %v4391_v55 = vrot.slane %v4386_v39, 4 }
 0xb31   :  { %8290 = vpow2.f32 %v6716_v40  ;;  %v4313_v43 = vadd.f32 %v4311_v25, %v9042_v8  ;;  %v4393_v57 = vadd.f32 %v4391_v55, %v9049_v48 }
 0xb32   :  { %v4461_v46 = vpop.f32.mrb[52].mxu1 }
 0xb33   :  { %v6718_v47 = vmul.f32 -1.442695, %v4313_v43  ;;  %v4466_v52 = vrot.slane %v4461_v46, 4  ;;  %v7592_v53 = vpop.f32.mrb[53].mxu1 }
 0xb35   :  { %8292 = vpow2.f32 %v6718_v47  ;;  %v4468_v56 = vadd.f32 %v4466_v52, %v9046_v22 }
 0xb36   :  { %8294 = vtanh.f32 %v4393_v57 }
 0xb37   :  { %v6721_v62 = vmul.f32 -1.442695, %v4468_v56 }
 0xb3b   :  { %v8291_v59 = vpop.eup %8290 }
 0xb3c   :  { %v4237_v63 = vadd.f32 1.0, %v8291_v59 }
 0xb3e   :  { %8296 = vrcp.f32 %v4237_v63 }
 0xb3f   :  { %v8293_v10 = vpop.eup %8292  ;;  %8298 = vpow2.f32 %v6721_v62 }
 0xb40   :  { %v4317_v11 = vadd.f32 1.0, %v8293_v10  ;;  %v8295_v1 = vpop.eup %8294 }
 0xb42   :  { %8300 = vrcp.f32 %v4317_v11 }
 0xb48   :  { %v8297_v2 = vpop.eup %8296 }
 0xb49   :  { %v8299_v5 = vpop.eup %8298  ;;  %v4479_v6 = vmul.f32 %v8297_v2, %v8295_v1 }
 0xb4a   :  { %v4472_v9 = vadd.f32 1.0, %v8299_v5 }
 0xb4c   :  { %v8301_v18 = vpop.eup %8300  ;;  %8302 = vrcp.f32 %v4472_v9 }
 0xb4d   :  { %v4478_v12 = vmul.f32 %v8301_v18, %v4476_v17 }
 0xb4f   :  { %v9120_v13 = vadd.f32 %v4479_v6, %v4478_v12 }
 0xb51   :  { %8304 = vtanh.f32 %v9120_v13  ;;  %v4873_v55 = vrot.slane %v9120_v13, 6 }
 0xb56   :  { %v8303_v14 = vpop.eup %8302 }
 0xb5b   :  { %v8305_v15 = vpop.eup %8304 }
 0xb5c   :  { %v4482_v19 = vmul.f32 %v8305_v15, %v8303_v14 }
 0xb5e   :  { %v4484_v36 = vrot.slane %v4482_v19, 4 }
 0xb60   :  { %7598 = vmatmul.mubr.msk.f32.vlgmr.msra.gmra.mrb[54].mxu0 %vm3379_vm8, %v4484_v36  ;;  %7605 = vmatmul.mubr.msk.f32.vlgmr.msra.gmra.mrb[54].mxu1 %vm3379_vm8, %v4484_v36 }
 0xb61   :  { %8049 = vmatpush3.bf16.msra.mxu0 %v8962_v42  ;;  %8052 = vmatpush3.bf16.msra.mxu1 %v8982_v50 }
 0xb62   :  { %7611 = vmatprep.mubr.msk.f32.mxu0 %vm8411_vm2, %v8412_v23  ;;  %7618 = vmatprep.mubr.msk.f32.mxu1 %vm8411_vm2, %v8412_v23 }
 0xb63   :  { %8053 = vmatprep.subr.bf16.mxu0 %v8410_v16  ;;  %8056 = vmatprep.subr.bf16.mxu1 %v8410_v16 }
 0xb64   :  { %7612 = vmatmul.mubr.msk.f32.vlgmr.msra.gmra.mrb[56].mxu0 %vm3379_vm8, %v4484_v36  ;;  %7619 = vmatmul.mubr.msk.f32.vlgmr.msra.gmra.mrb[56].mxu1 %vm3379_vm8, %v4484_v36 }
 0xb65   :  { %8055 = vmatpush3.bf16.msra.mxu0 %v8984_v51  ;;  %7625 = vmatprep.mubr.msk.f32.mxu0 %vm8411_vm2, %v8412_v23 }
 0xb66   :  { %8059 = vmatprep.subr.bf16.mxu0 %v8410_v16  ;;  %8058 = vmatpush3.bf16.msra.mxu1 %v9016_v54 }
 0xb67   :  { %7632 = vmatprep.mubr.msk.f32.mxu1 %vm8411_vm2, %v8412_v23  ;;  %8062 = vmatprep.subr.bf16.mxu1 %v8410_v16 }
 0xb68   :  { %7626 = vmatmul.mubr.msk.f32.vlgmr.msra.gmra.mrb[58].mxu0 %vm3379_vm8, %v4484_v36 }
 0xb69   :  { %8061 = vmatpush3.bf16.msra.mxu0 %v8960_v41  ;;  %7639 = vmatprep.mubr.msk.f32.mxu0 %vm8411_vm2, %v8412_v23 }
 0xb6a   :  { %8065 = vmatprep.subr.bf16.mxu0 %v8410_v16 }
 0xc33   :  { %v4553_v37 = vpop.f32.mrb[54].mxu0  ;;  %v4623_v20 = vpop.f32.mrb[54].mxu1 }
 0xc34   :  { %v4628_v21 = vrot.slane %v4623_v20, 2  ;;  %v7606_v26 = vpop.f32.mrb[55].mxu1  ;;  %6534 = vrot.lane.b32.xlu0 %v4553_v37, %s8414_s12  ;;  %v7599_v49 = vpop.f32.mrb[55].mxu0 }
 0xc36   :  { %v4630_v27 = vadd.f32 %v4628_v21, %v9040_v7 }
 0xc37   :  { %v4703_v45 = vpop.f32.mrb[56].mxu0  ;;  %v4783_v28 = vpop.f32.mrb[56].mxu1 }
 0xc38   :  { %v6724_v44 = vmul.f32 -1.442695, %v4630_v27  ;;  %v4708_v29 = vrot.slane %v4703_v45, 2  ;;  %v7613_v32 = vpop.f32.mrb[57].mxu0  ;;  %v7620_v33 = vpop.f32.mrb[57].mxu1  ;;  %v4788_v39 = vrot.slane %v4783_v28, 2 }
 0xc3a   :  { %8306 = vpow2.f32 %v6724_v44  ;;  %v4710_v34 = vadd.f32 %v4708_v29, %v9042_v8  ;;  %v4790_v25 = vadd.f32 %v4788_v39, %v9049_v48 }
 0xc3b   :  { %v4858_v35 = vpop.f32.mrb[58].mxu0 }
 0xc3c   :  { %v6726_v58 = vmul.f32 -1.442695, %v4710_v34  ;;  %v4863_v38 = vrot.slane %v4858_v35, 2  ;;  %v7627_v0 = vpop.f32.mrb[59].mxu0 }
 0xc3e   :  { %8308 = vpow2.f32 %v6726_v58  ;;  %v4865_v40 = vadd.f32 %v4863_v38, %v9046_v22 }
 0xc3f   :  { %8310 = vtanh.f32 %v4790_v25 }
 0xc40   :  { %v6729_v30 = vmul.f32 -1.442695, %v4865_v40 }
 0xc44   :  { %v8307_v7 = vpop.eup %8306 }
 0xc45   :  { %v4634_v24 = vadd.f32 1.0, %v8307_v7 }
 0xc47   :  { %8312 = vrcp.f32 %v4634_v24 }
 0xc48   :  { %v8309_v43 = vpop.eup %8308  ;;  %8314 = vpow2.f32 %v6729_v30 }
 0xc49   :  { %v4714_v46 = vadd.f32 1.0, %v8309_v43  ;;  %v8311_v8 = vpop.eup %8310 }
 0xc4b   :  { %8316 = vrcp.f32 %v4714_v46 }
 0xc51   :  { %v8313_v47 = vpop.eup %8312 }
 0xc52   :  { %v8315_v52 = vpop.eup %8314  ;;  %v4876_v53 = vmul.f32 %v8313_v47, %v8311_v8 }
 0xc53   :  { %v4869_v57 = vadd.f32 1.0, %v8315_v52 }
 0xc55   :  { %v8317_v56 = vpop.eup %8316  ;;  %8318 = vrcp.f32 %v4869_v57 }
 0xc56   :  { %v4875_v22 = vmul.f32 %v8317_v56, %v4873_v55 }
 0xc58   :  { %v9153_v59 = vadd.f32 %v4876_v53, %v4875_v22 }
 0xc5a   :  { %8320 = vtanh.f32 %v9153_v59  ;;  %v5258_v33 = vrot.slane %v9153_v59, 6 }
 0xc5f   :  { %v8319_v48 = vpop.eup %8318 }
 0xc64   :  { %v8321_v62 = vpop.eup %8320 }
 0xc65   :  { %v4879_v63 = vmul.f32 %v8321_v62, %v8319_v48 }
 0xc67   :  { %v4881_v10 = vrot.slane %v4879_v63, 6 }
 0xc69   :  { %7633 = vmatmul.mubr.msk.f32.vlgmr.msra.gmra.mrb[58].mxu1 %vm3379_vm8, %v4881_v10  ;;  %7640 = vmatmul.mubr.msk.f32.vlgmr.msra.gmra.mrb[60].mxu0 %vm3379_vm8, %v4881_v10 }
 0xc6a   :  { %8064 = vmatpush3.bf16.msra.mxu1 %v8962_v42  ;;  %8067 = vmatpush3.bf16.msra.mxu0 %v8982_v50 }
 0xc6b   :  { %7646 = vmatprep.mubr.msk.f32.mxu1 %vm8411_vm2, %v8412_v23  ;;  %7653 = vmatprep.mubr.msk.f32.mxu0 %vm8411_vm2, %v8412_v23 }
 0xc6c   :  { %8068 = vmatprep.subr.bf16.mxu1 %v8410_v16  ;;  %8071 = vmatprep.subr.bf16.mxu0 %v8410_v16 }
 0xc6d   :  { %7647 = vmatmul.mubr.msk.f32.vlgmr.msra.gmra.mrb[60].mxu1 %vm3379_vm8, %v4881_v10  ;;  %7654 = vmatmul.mubr.msk.f32.vlgmr.msra.gmra.mrb[62].mxu0 %vm3379_vm8, %v4881_v10 }
 0xc6e   :  { %8070 = vmatpush3.bf16.msra.mxu1 %v8984_v51  ;;  %7660 = vmatprep.mubr.msk.f32.mxu1 %vm8411_vm2, %v8412_v23 }
 0xc6f   :  { %8074 = vmatprep.subr.bf16.mxu1 %v8410_v16  ;;  %8073 = vmatpush3.bf16.msra.mxu0 %v9016_v54 }
 0xc70   :  { %7667 = vmatprep.mubr.msk.f32.mxu0 %vm8411_vm2, %v8412_v23  ;;  %8077 = vmatprep.subr.bf16.mxu0 %v8410_v16 }
 0xc71   :  { %7661 = vmatmul.mubr.msk.f32.vlgmr.msra.gmra.mrb[62].mxu1 %vm3379_vm8, %v4881_v10 }
 0xc72   :  { %8076 = vmatpush3.bf16.msra.mxu1 %v8960_v41  ;;  %7674 = vmatprep.mubr.msk.f32.mxu1 %vm8411_vm2, %v8412_v23 }
 0xc73   :  { %8080 = vmatprep.subr.bf16.mxu1 %v8410_v16 }
 0xd3c   :  { %v4950_v11 = vpop.f32.mrb[58].mxu1  ;;  %v5020_v1 = vpop.f32.mrb[60].mxu0 }
 0xd3d   :  { %v5024_v2 = vadd.f32 %v5020_v1, %v9026_v60  ;;  %6538 = vrot.lane.b32.xlu1 %v4950_v11, %s8415_s13  ;;  %v7634_v5 = vpop.f32.mrb[59].mxu1  ;;  %v7641_v6 = vpop.f32.mrb[61].mxu0 }
 0xd3f   :  { %v6732_v17 = vmul.f32 -1.442695, %v5024_v2 }
 0xd40   :  { %v5097_v18 = vpop.f32.mrb[60].mxu1  ;;  %v5174_v9 = vpop.f32.mrb[62].mxu0 }
 0xd41   :  { %8322 = vpow2.f32 %v6732_v17  ;;  %v5101_v12 = vadd.f32 %v5097_v18, %v9028_v61  ;;  %v7648_v13 = vpop.f32.mrb[61].mxu1  ;;  %v7655_v14 = vpop.f32.mrb[63].mxu0  ;;  %v5178_v20 = vadd.f32 %v5174_v9, %v9036_v3 }
 0xd43   :  { %v6734_v15 = vmul.f32 -1.442695, %v5101_v12 }
 0xd44   :  { %v5246_v19 = vpop.f32.mrb[62].mxu1 }
 0xd45   :  { %8324 = vpow2.f32 %v6734_v15  ;;  %v7662_v36 = vpop.f32.mrb[63].mxu1  ;;  %v5250_v37 = vadd.f32 %v5246_v19, %v9038_v4 }
 0xd46   :  { %8326 = vtanh.f32 %v5178_v20 }
 0xd47   :  { %v6737_v26 = vmul.f32 -1.442695, %v5250_v37 }
 0xd4b   :  { %v8323_v21 = vpop.eup %8322 }
 0xd4c   :  { %v5028_v49 = vadd.f32 1.0, %v8323_v21 }
 0xd4e   :  { %8328 = vrcp.f32 %v5028_v49 }
 0xd4f   :  { %v8325_v27 = vpop.eup %8324  ;;  %8330 = vpow2.f32 %v6737_v26 }
 0xd50   :  { %v5105_v45 = vadd.f32 1.0, %v8325_v27  ;;  %v8327_v28 = vpop.eup %8326 }
 0xd52   :  { %8332 = vrcp.f32 %v5105_v45 }
 0xd58   :  { %v8329_v44 = vpop.eup %8328 }
 0xd59   :  { %v8331_v29 = vpop.eup %8330  ;;  %v5261_v32 = vmul.f32 %v8329_v44, %v8327_v28 }
 0xd5a   :  { %v5254_v35 = vadd.f32 1.0, %v8331_v29 }
 0xd5c   :  { %v8333_v34 = vpop.eup %8332  ;;  %8334 = vrcp.f32 %v5254_v35 }
 0xd5d   :  { %v5260_v58 = vmul.f32 %v8333_v34, %v5258_v33 }
 0xd5f   :  { %v9186_v38 = vadd.f32 %v5261_v32, %v5260_v58 }
 0xd61   :  { %8336 = vtanh.f32 %v9186_v38  ;;  %v5654_v14 = vrot.slane %v9186_v38, 6 }
 0xd66   :  { %v8335_v0 = vpop.eup %8334 }
 0xd6b   :  { %v8337_v39 = vpop.eup %8336 }
 0xd6c   :  { %v5264_v40 = vmul.f32 %v8337_v39, %v8335_v0 }
 0xd6e   :  { %7668 = vmatmul.mubr.msk.f32.vlgmr.msra.gmra.mrb[64].mxu0 %vm3379_vm8, %v5264_v40  ;;  %7675 = vmatmul.mubr.msk.f32.vlgmr.msra.gmra.mrb[64].mxu1 %vm3379_vm8, %v5264_v40 }
 0xd6f   :  { %8079 = vmatpush3.bf16.msra.mxu0 %v8962_v42  ;;  %8082 = vmatpush3.bf16.msra.mxu1 %v8982_v50 }
 0xd70   :  { %7681 = vmatprep.mubr.msk.f32.mxu0 %vm8411_vm2, %v8412_v23  ;;  %7688 = vmatprep.mubr.msk.f32.mxu1 %vm8411_vm2, %v8412_v23 }
 0xd71   :  { %8083 = vmatprep.subr.bf16.mxu0 %v8410_v16  ;;  %8086 = vmatprep.subr.bf16.mxu1 %v8410_v16 }
 0xd72   :  { %7682 = vmatmul.mubr.msk.f32.vlgmr.msra.gmra.mrb[66].mxu0 %vm3379_vm8, %v5264_v40  ;;  %7689 = vmatmul.mubr.msk.f32.vlgmr.msra.gmra.mrb[66].mxu1 %vm3379_vm8, %v5264_v40 }
 0xd73   :  { %8085 = vmatpush3.bf16.msra.mxu0 %v8984_v51  ;;  %7695 = vmatprep.mubr.msk.f32.mxu0 %vm8411_vm2, %v8412_v23 }
 0xd74   :  { %8089 = vmatprep.subr.bf16.mxu0 %v8410_v16  ;;  %8088 = vmatpush3.bf16.msra.mxu1 %v9016_v54 }
 0xd75   :  { %7702 = vmatprep.mubr.msk.f32.mxu1 %vm8411_vm2, %v8412_v23  ;;  %8092 = vmatprep.subr.bf16.mxu1 %v8410_v16 }
 0xd76   :  { %7696 = vmatmul.mubr.msk.f32.vlgmr.msra.gmra.mrb[68].mxu0 %vm3379_vm8, %v5264_v40 }
 0xd77   :  { %8091 = vmatpush3.bf16.msra.mxu0 %v8960_v41  ;;  %7709 = vmatprep.mubr.msk.f32.mxu0 %vm8411_vm2, %v8412_v23 }
 0xd78   :  { %8095 = vmatprep.subr.bf16.mxu0 %v8410_v16 }
 0xe41   :  { %v5334_v25 = vpop.f32.mrb[64].mxu0  ;;  %v5404_v7 = vpop.f32.mrb[64].mxu1 }
 0xe42   :  { %v5409_v30 = vrot.slane %v5404_v7, 6  ;;  %v7676_v24 = vpop.f32.mrb[65].mxu1  ;;  %6542 = vrot.lane.b32.xlu1 %v5334_v25, %s8416_s14  ;;  %v7669_v43 = vpop.f32.mrb[65].mxu0 }
 0xe44   :  { %v5411_v46 = vadd.f32 %v5409_v30, %v9026_v60 }
 0xe45   :  { %v5484_v8 = vpop.f32.mrb[66].mxu0  ;;  %v5564_v47 = vpop.f32.mrb[66].mxu1 }
 0xe46   :  { %v6740_v52 = vmul.f32 -1.442695, %v5411_v46  ;;  %v5489_v53 = vrot.slane %v5484_v8, 6  ;;  %v7683_v55 = vpop.f32.mrb[67].mxu0  ;;  %v7690_v56 = vpop.f32.mrb[67].mxu1  ;;  %v5569_v63 = vrot.slane %v5564_v47, 6 }
 0xe48   :  { %8338 = vpow2.f32 %v6740_v52  ;;  %v5491_v57 = vadd.f32 %v5489_v53, %v9028_v61  ;;  %v5571_v11 = vadd.f32 %v5569_v63, %v9036_v3 }
 0xe49   :  { %v5639_v22 = vpop.f32.mrb[68].mxu0 }
 0xe4a   :  { %v6742_v59 = vmul.f32 -1.442695, %v5491_v57  ;;  %v5644_v48 = vrot.slane %v5639_v22, 6  ;;  %v7697_v62 = vpop.f32.mrb[69].mxu0 }
 0xe4c   :  { %8340 = vpow2.f32 %v6742_v59  ;;  %v5646_v10 = vadd.f32 %v5644_v48, %v9038_v4 }
 0xe4d   :  { %8342 = vtanh.f32 %v5571_v11 }
 0xe4e   :  { %v6745_v2 = vmul.f32 -1.442695, %v5646_v10 }
 0xe52   :  { %v8339_v1 = vpop.eup %8338 }
 0xe53   :  { %v5415_v5 = vadd.f32 1.0, %v8339_v1 }
 0xe55   :  { %8344 = vrcp.f32 %v5415_v5 }
 0xe56   :  { %v8341_v6 = vpop.eup %8340  ;;  %8346 = vpow2.f32 %v6745_v2 }
 0xe57   :  { %v5495_v17 = vadd.f32 1.0, %v8341_v6  ;;  %v8343_v18 = vpop.eup %8342 }
 0xe59   :  { %8348 = vrcp.f32 %v5495_v17 }
 0xe5f   :  { %v8345_v9 = vpop.eup %8344 }
 0xe60   :  { %v8347_v12 = vpop.eup %8346  ;;  %v5657_v13 = vmul.f32 %v8345_v9, %v8343_v18 }
 0xe61   :  { %v5650_v19 = vadd.f32 1.0, %v8347_v12 }
 0xe63   :  { %v8349_v15 = vpop.eup %8348  ;;  %8350 = vrcp.f32 %v5650_v19 }
 0xe64   :  { %v5656_v36 = vmul.f32 %v8349_v15, %v5654_v14 }
 0xe66   :  { %v9219_v37 = vadd.f32 %v5657_v13, %v5656_v36 }
 0xe68   :  { %8352 = vtanh.f32 %v9219_v37  ;;  %v6051_v59 = vrot.slane %v9219_v37, 6 }
 0xe6d   :  { %v8351_v20 = vpop.eup %8350 }
 0xe72   :  { %v8353_v21 = vpop.eup %8352 }
 0xe73   :  { %v5660_v26 = vmul.f32 %v8353_v21, %v8351_v20 }
 0xe75   :  { %v5662_v49 = vrot.slane %v5660_v26, 2 }
 0xe77   :  { %7703 = vmatmul.mubr.msk.f32.vlgmr.msra.gmra.mrb[68].mxu1 %vm3379_vm8, %v5662_v49  ;;  %7710 = vmatmul.mubr.msk.f32.vlgmr.msra.gmra.mrb[70].mxu0 %vm3379_vm8, %v5662_v49 }
 0xe78   :  { %8094 = vmatpush3.bf16.msra.mxu1 %v8962_v42  ;;  %8097 = vmatpush3.bf16.msra.mxu0 %v8982_v50 }
 0xe79   :  { %7716 = vmatprep.mubr.msk.f32.mxu1 %vm8411_vm2, %v8412_v23  ;;  %7723 = vmatprep.mubr.msk.f32.mxu0 %vm8411_vm2, %v8412_v23 }
 0xe7a   :  { %8098 = vmatprep.subr.bf16.mxu1 %v8410_v16  ;;  %8101 = vmatprep.subr.bf16.mxu0 %v8410_v16 }
 0xe7b   :  { %7717 = vmatmul.mubr.msk.f32.vlgmr.msra.gmra.mrb[70].mxu1 %vm3379_vm8, %v5662_v49  ;;  %7724 = vmatmul.mubr.msk.f32.vlgmr.msra.gmra.mrb[72].mxu0 %vm3379_vm8, %v5662_v49 }
 0xe7c   :  { %8100 = vmatpush3.bf16.msra.mxu1 %v8984_v51  ;;  %7730 = vmatprep.mubr.msk.f32.mxu1 %vm8411_vm2, %v8412_v23 }
 0xe7d   :  { %8104 = vmatprep.subr.bf16.mxu1 %v8410_v16  ;;  %8103 = vmatpush3.bf16.msra.mxu0 %v9016_v54 }
 0xe7e   :  { %7737 = vmatprep.mubr.msk.f32.mxu0 %vm8411_vm2, %v8412_v23  ;;  %8107 = vmatprep.subr.bf16.mxu0 %v8410_v16 }
 0xe7f   :  { %7731 = vmatmul.mubr.msk.f32.vlgmr.msra.gmra.mrb[72].mxu1 %vm3379_vm8, %v5662_v49 }
 0xe80   :  { %8106 = vmatpush3.bf16.msra.mxu1 %v8960_v41  ;;  %7744 = vmatprep.mubr.msk.f32.mxu1 %vm8411_vm2, %v8412_v23 }
 0xe81   :  { %8110 = vmatprep.subr.bf16.mxu1 %v8410_v16 }
 0xf4a   :  { %v5731_v27 = vpop.f32.mrb[68].mxu1  ;;  %v5801_v45 = vpop.f32.mrb[70].mxu0 }
 0xf4b   :  { %v5806_v28 = vrot.slane %v5801_v45, 4  ;;  %6546 = vrot.lane.b32.xlu0 %v5731_v27, %s8417_s4  ;;  %v7704_v44 = vpop.f32.mrb[69].mxu1  ;;  %v7711_v29 = vpop.f32.mrb[71].mxu0 }
 0xf4d   :  { %v5808_v32 = vadd.f32 %v5806_v28, %v9026_v60 }
 0xf4e   :  { %v5881_v33 = vpop.f32.mrb[70].mxu1  ;;  %v5961_v34 = vpop.f32.mrb[72].mxu0 }
 0xf4f   :  { %v6748_v35 = vmul.f32 -1.442695, %v5808_v32  ;;  %v5886_v58 = vrot.slane %v5881_v33, 4  ;;  %v7718_v38 = vpop.f32.mrb[71].mxu1  ;;  %v7725_v41 = vpop.f32.mrb[73].mxu0  ;;  %v5966_v30 = vrot.slane %v5961_v34, 4 }
 0xf51   :  { %8354 = vpow2.f32 %v6748_v35  ;;  %v5888_v0 = vadd.f32 %v5886_v58, %v9028_v61  ;;  %v5968_v43 = vadd.f32 %v5966_v30, %v9036_v3 }
 0xf52   :  { %v6036_v39 = vpop.f32.mrb[72].mxu1 }
 0xf53   :  { %v6750_v40 = vmul.f32 -1.442695, %v5888_v0  ;;  %v6041_v25 = vrot.slane %v6036_v39, 4  ;;  %v7732_v7 = vpop.f32.mrb[73].mxu1 }
 0xf54   :  { %v6539_v7 = vpop.permute.xlu1 %6538 }
 0xf55   :  { %8356 = vpow2.f32 %v6750_v40  ;;  %v6043_v24 = vadd.f32 %v6041_v25, %v9038_v4  ;;  %v6531_v25 = vpop.permute.xlu0 %6530 }
 0xf56   :  { %8358 = vtanh.f32 %v5968_v43  ;;  %v6557_v43 = vsel %vm40_vm1, %v9080_v31, %v6531_v25 }
 0xf57   :  { %v6753_v8 = vmul.f32 -1.442695, %v6043_v24 }
 0xf58   :  { %v6543_v24 = vpop.permute.xlu1 %6542 }
 0xf59   :  { %v6535_v30 = vpop.permute.xlu0 %6534 }
 0xf5b   :  { %v8355_v46 = vpop.eup %8354 }
 0xf5c   :  { %v5812_v47 = vadd.f32 1.0, %v8355_v46  ;;  %v6559_v46 = vsel %vm6558_vm9, %v6557_v43, %v6535_v30 }
 0xf5e   :  { %8360 = vrcp.f32 %v5812_v47  ;;  %v6561_v47 = vsel %vm6560_vm10, %v6559_v46, %v6539_v7 }
 0xf5f   :  { %v8357_v52 = vpop.eup %8356  ;;  %8362 = vpow2.f32 %v6753_v8 }
 0xf60   :  { %v5892_v53 = vadd.f32 1.0, %v8357_v52  ;;  %v8359_v55 = vpop.eup %8358 }
 0xf62   :  { %8364 = vrcp.f32 %v5892_v53  ;;  %v6562_v53 = vsel %vm3379_vm8, %v6561_v47, %v6543_v24 }
 0xf68   :  { %v8361_v56 = vpop.eup %8360 }
 0xf69   :  { %v8363_v57 = vpop.eup %8362  ;;  %v6054_v22 = vmul.f32 %v8361_v56, %v8359_v55 }
 0xf6a   :  { %v6047_v62 = vadd.f32 1.0, %v8363_v57 }
 0xf6c   :  { %v8365_v48 = vpop.eup %8364  ;;  %8366 = vrcp.f32 %v6047_v62 }
 0xf6d   :  { %v6053_v63 = vmul.f32 %v8365_v48, %v6051_v59 }
 0xf6f   :  { %v9252_v10 = vadd.f32 %v6054_v22, %v6053_v63 }
 0xf71   :  { %8368 = vtanh.f32 %v9252_v10  ;;  %v6448_v33 = vrot.slane %v9252_v10, 6 }
 0xf76   :  { %v8367_v11 = vpop.eup %8366 }
 0xf7b   :  { %v8369_v1 = vpop.eup %8368 }
 0xf7c   :  { %v6057_v2 = vmul.f32 %v8369_v1, %v8367_v11 }
 0xf7e   :  { %v6059_v5 = vrot.slane %v6057_v2, 4 }
 0xf80   :  { %7738 = vmatmul.mubr.msk.f32.vlgmr.msra.gmra.mrb[74].mxu0 %vm3379_vm8, %v6059_v5  ;;  %7745 = vmatmul.mubr.msk.f32.vlgmr.msra.gmra.mrb[74].mxu1 %vm3379_vm8, %v6059_v5 }
 0xf81   :  { %8109 = vmatpush3.bf16.msra.mxu0 %v8962_v42  ;;  %8112 = vmatpush3.bf16.msra.mxu1 %v8982_v50 }
 0xf82   :  { %7751 = vmatprep.mubr.msk.f32.mxu0 %vm8411_vm2, %v8412_v23  ;;  %7758 = vmatprep.mubr.msk.f32.mxu1 %vm8411_vm2, %v8412_v23 }
 0xf83   :  { %8113 = vmatprep.subr.bf16.mxu0 %v8410_v16  ;;  %8116 = vmatprep.subr.bf16.mxu1 %v8410_v16 }
 0xf84   :  { %7752 = vmatmul.mubr.msk.f32.vlgmr.msra.gmra.mrb[76].mxu0 %vm3379_vm8, %v6059_v5  ;;  %7759 = vmatmul.mubr.msk.f32.vlgmr.msra.gmra.mrb[76].mxu1 %vm3379_vm8, %v6059_v5 }
 0xf85   :  { %8115 = vmatpush3.bf16.msra.mxu0 %v8984_v51  ;;  %7765 = vmatprep.mubr.msk.f32.mxu0 %vm8411_vm2, %v8412_v23 }
 0xf86   :  { %8118 = vmatpush3.bf16.msra.mxu1 %v9016_v54  ;;  %7772 = vmatprep.mubr.msk.f32.mxu1 %vm8411_vm2, %v8412_v23 }
 0xf88   :  { %7766 = vmatmul.mubr.msk.f32.vlgmr.msra.gmra.mrb[78].mxu0 %vm3379_vm8, %v6059_v5 }
 0xfbd   :  { %v6547_v8 = vpop.permute.xlu0 %6546 }
 0xfbe   :  { %v6564_v55 = vsel %vm6563_vm11, %v6562_v53, %v6547_v8 }
0x1053   :  { %v6128_v42 = vpop.f32.mrb[74].mxu0  ;;  %v6198_v50 = vpop.f32.mrb[74].mxu1 }
0x1054   :  { %v6203_v6 = vrot.slane %v6198_v50, 2  ;;  %v7746_v16 = vpop.f32.mrb[75].mxu1  ;;  %6550 = vrot.lane.b32.xlu1 %v6128_v42, %s8418_s15  ;;  %v7739_v17 = vpop.f32.mrb[75].mxu0 }
0x1056   :  { %v6205_v18 = vadd.f32 %v6203_v6, %v9026_v60 }
0x1057   :  { %v6278_v51 = vpop.f32.mrb[76].mxu0  ;;  %v6358_v9 = vpop.f32.mrb[76].mxu1 }
0x1058   :  { %v6756_v12 = vmul.f32 -1.442695, %v6205_v18  ;;  %v6283_v13 = vrot.slane %v6278_v51, 2  ;;  %v7753_v14 = vpop.f32.mrb[77].mxu0  ;;  %v7760_v54 = vpop.f32.mrb[77].mxu1  ;;  %v6363_v20 = vrot.slane %v6358_v9, 2 }
0x105a   :  { %8370 = vpow2.f32 %v6756_v12  ;;  %v6285_v23 = vadd.f32 %v6283_v13, %v9028_v61  ;;  %v6365_v26 = vadd.f32 %v6363_v20, %v9036_v3 }
0x105b   :  { %v6433_v15 = vpop.f32.mrb[78].mxu0 }
0x105c   :  { %v6758_v19 = vmul.f32 -1.442695, %v6285_v23  ;;  %v6438_v36 = vrot.slane %v6433_v15, 2  ;;  %v7767_v37 = vpop.f32.mrb[79].mxu0 }
0x105e   :  { %8372 = vpow2.f32 %v6758_v19  ;;  %v6440_v21 = vadd.f32 %v6438_v36, %v9038_v4 }
0x105f   :  { %8374 = vtanh.f32 %v6365_v26 }
0x1060   :  { %v6761_v49 = vmul.f32 -1.442695, %v6440_v21 }
0x1064   :  { %v8371_v60 = vpop.eup %8370 }
0x1065   :  { %v6209_v27 = vadd.f32 1.0, %v8371_v60 }
0x1067   :  { %8376 = vrcp.f32 %v6209_v27 }
0x1068   :  { %v8373_v45 = vpop.eup %8372  ;;  %8378 = vpow2.f32 %v6761_v49 }
0x1069   :  { %v6289_v28 = vadd.f32 1.0, %v8373_v45  ;;  %v8375_v61 = vpop.eup %8374 }
0x106b   :  { %8380 = vrcp.f32 %v6289_v28 }
0x1071   :  { %v8377_v44 = vpop.eup %8376 }
0x1072   :  { %v8379_v29 = vpop.eup %8378  ;;  %v6451_v32 = vmul.f32 %v8377_v44, %v8375_v61 }
0x1073   :  { %v6444_v35 = vadd.f32 1.0, %v8379_v29 }
0x1075   :  { %v8381_v34 = vpop.eup %8380  ;;  %8382 = vrcp.f32 %v6444_v35 }
0x1076   :  { %v6450_v4 = vmul.f32 %v8381_v34, %v6448_v33 }
0x1078   :  { %v6452_v58 = vadd.f32 %v6451_v32, %v6450_v4 }
0x107a   :  { %8384 = vtanh.f32 %v6452_v58 }
0x107f   :  { %v8383_v3 = vpop.eup %8382 }
0x1084   :  { %v8385_v38 = vpop.eup %8384 }
0x1085   :  { %v6454_v41 = vmul.f32 %v8385_v38, %v8383_v3 }
0x1087   :  { %v6456_v0 = vrot.slane %v6454_v41, 6 }
0x1089   :  { %7773 = vmatmul.mubr.msk.f32.vlgmr.msra.gmra.mrb[78].mxu1 %vm3379_vm8, %v6456_v0 }
0x10c6   :  { %v6551_v52 = vpop.permute.xlu1 %6550 }
0x10c7   :  { %v6566_v56 = vsel %vm6565_vm12, %v6564_v55, %v6551_v52 }
0x115c   :  { %v6525_v39 = vpop.f32.mrb[78].mxu1 }
0x115d   :  { %6554 = vrot.lane.b32.xlu0 %v6525_v39, %s8419_s16  ;;  %v7774_v40 = vpop.f32.mrb[79].mxu1 }
0x11cf   :  { %v6555_v57 = vpop.permute.xlu0 %6554 }
0x11d0   :  { %v6568_v22 = vsel %vm6567_vm13, %v6566_v56, %v6555_v57 }
0x11d1   :  { %6569 = vst.msk [vmem:[#allocation3] sm:$0x3] %vm721_vm4, %v6568_v22 }
0x11d2   :  { %8397 = shalt.err (!%p8394_p4)
}
0x11d3   :  { %s8398_s21 = scalar_lea.hbm %s9304_s8, 32 }
0x11d4   :  { %p8399_p5 = scmp.ne.s32.totalorder %s9304_s8, %s8398_s21  ;;  %p8402_p6 = scmp.lt.u32.totalorder %s8398_s21, %s9304_s8 }
0x11d6   :  { %p8404_p7 = pnand %p8402_p6, %p8399_p5 }
0x11d8   :  { %8407 = shalt.err (!%p8404_p7)
}
0x11d9   :  { %6579 = dma.vmem_to_hbm [thread:$0]  %s6577_s18, 32, %s9304_s8, [#allocation4]  }
0x11da   :  { %8408 = dma.done.wait [#allocation4], 32  }
0x11db   :  { %8409 = vsyncadd [#allocation4], 4294967264 }
0x11dc   :  { %6583 = vsyncpa [#allocation4], 1 }

</bundles_post_ra>
